<compile_context>
chip_gen: v5e
topology: v5e:2x2
jax: 0.10.0
libtpu: 0.0.40
codegen_flags: <defaults>
</compile_context>

<pallas_src>
import jax
import jax.numpy as jnp
from jax import lax
from jax.experimental import pallas as pl

PAD_TOKEN = 0
SOS_TOKEN = 1
_HIGHEST = jax.lax.Precision.HIGHEST


def _greedy_decode_kernel(h0_ref, wf_ref, b_ref, wout_ref, bout_ref,
                          out_ref, hN_ref, cN_ref):
    """Whole greedy decode in one invocation; state lives in loop carries."""
    T, B, V = out_ref.shape
    H = h0_ref.shape[2]

    vocab_ids = lax.broadcasted_iota(jnp.int32, (B, V), 1)   # hoisted out of loop

    def step(t, carry):
        h, c, tok = carry

        # embedding lookup + ReLU + W_ih already folded into wf rows [0:V);
        # recurrent W_hh occupies rows [V:V+H). One fused MXU matmul per step.
        onehot = (vocab_ids == tok).astype(jnp.float32)                 # (B, V)
        xh = jnp.concatenate([onehot, h], axis=-1)                      # (B, V+H)
        gates = jnp.dot(xh, wf_ref[...], precision=_HIGHEST,
                        preferred_element_type=jnp.float32) + b_ref[...]  # (B, 4H)

        i_g = jax.nn.sigmoid(gates[:, 0 * H:1 * H])
        f_g = jax.nn.sigmoid(gates[:, 1 * H:2 * H])
        g_g = jnp.tanh(gates[:, 2 * H:3 * H])
        o_g = jax.nn.sigmoid(gates[:, 3 * H:4 * H])
        c_new = f_g * c + i_g * g_g
        h_new = o_g * jnp.tanh(c_new)

        # output projection + log-softmax
        logits = jnp.dot(h_new, wout_ref[...], precision=_HIGHEST,
                         preferred_element_type=jnp.float32) + bout_ref[...]
        m = jnp.max(logits, axis=-1, keepdims=True)
        z = logits - m
        logp = z - jnp.log(jnp.sum(jnp.exp(z), axis=-1, keepdims=True))
        out_ref[t] = logp                                               # (B, V)

        # greedy argmax (first max index, matching torch.topk) straight from
        # logits and its already-computed max -> no second reduction.
        tok_next = jnp.min(jnp.where(logits == m, vocab_ids, V),
                           axis=-1, keepdims=True)
        return h_new, c_new, tok_next

    h0 = h0_ref[0]
    c0 = jnp.zeros((B, H), jnp.float32)
    tok0 = jnp.full((B, 1), SOS_TOKEN, jnp.int32)
    hT, cT, _ = lax.fori_loop(0, T, step, (h0, c0, tok0))

    # final hidden / cell written exactly once
    hN_ref[...] = hT[None]
    cN_ref[...] = cT[None]


def code_decoder_forward(params, encoder_hidden, target_length):
    emb, wih, whh, b, wout, bout = params
    V, H = emb.shape
    B = encoder_hidden.shape[1]
    T = int(target_length)

    # Token-independent precompute: A[v] = ReLU(emb[v]) @ W_ih, fused with W_hh
    # so the recurrence needs a single matmul per step.
    a_tab = jnp.dot(jnp.maximum(emb, 0.0), wih, precision=_HIGHEST)     # (V, 4H)
    w_fused = jnp.concatenate([a_tab, whh], axis=0)                     # (V+H, 4H)

    # Single invocation (no grid): all operands fit comfortably in VMEM at
    # these sizes, so there is no pipeline overhead at all.
    logp_tbv, hN, cN = pl.pallas_call(
        _greedy_decode_kernel,
        out_shape=(
            jax.ShapeDtypeStruct((T, B, V), jnp.float32),   # per-step log-probs
            jax.ShapeDtypeStruct((1, B, H), jnp.float32),   # final h
            jax.ShapeDtypeStruct((1, B, H), jnp.float32),   # final c
        ),
    )(encoder_hidden, w_fused, b, wout, bout)

    # PyTorch returns (B, T, V) (concat over dim=1) and hidden tuple (h_n, c_n)
    return jnp.transpose(logp_tbv, (1, 0, 2)), (hN, cN)


def _reference(params, encoder_hidden, target_length):
    """Pure-JAX reference replicating the PyTorch forward semantics."""
    emb, wih, whh, b, wout, bout = params
    V, H = emb.shape
    B = encoder_hidden.shape[1]
    h = encoder_hidden[0]
    c = jnp.zeros((B, H), jnp.float32)
    tok = jnp.full((B,), SOS_TOKEN, jnp.int32)
    outs = []
    for _ in range(target_length):
        x = jnp.maximum(emb[tok], 0.0)
        gates = (jnp.dot(x, wih, precision=_HIGHEST)
                 + jnp.dot(h, whh, precision=_HIGHEST) + b[0])
        i_g = jax.nn.sigmoid(gates[:, :H])
        f_g = jax.nn.sigmoid(gates[:, H:2 * H])
        g_g = jnp.tanh(gates[:, 2 * H:3 * H])
        o_g = jax.nn.sigmoid(gates[:, 3 * H:])
        c = f_g * c + i_g * g_g
        h = o_g * jnp.tanh(c)
        logits = jnp.dot(h, wout, precision=_HIGHEST) + bout[0]
        logp = jax.nn.log_softmax(logits, axis=-1)
        outs.append(logp[:, None, :])
        tok = jnp.argmax(logp, axis=-1).astype(jnp.int32)
    return jnp.concatenate(outs, axis=1), (h[None], c[None])


if __name__ == "__main__":
    # batch, hidden_size, output_size (vocab), target_length
    # (H, V chosen as multiples of 128 so gate slices / logit stores are
    #  lane-aligned; B kept small — batching up is a caller-side lever.)
    B, H, V, T = 8, 128, 256, 6

    key = jax.random.PRNGKey(0)
    k = jax.random.split(key, 7)
    emb = 0.1 * jax.random.normal(k[0], (V, H), jnp.float32)
    emb = emb.at[PAD_TOKEN].set(0.0)                       # padding_idx row = 0
    wih = 0.1 * jax.random.normal(k[1], (H, 4 * H), jnp.float32)
    whh = 0.1 * jax.random.normal(k[2], (H, 4 * H), jnp.float32)
    b = 0.1 * jax.random.normal(k[3], (1, 4 * H), jnp.float32)  # b_ih + b_hh folded
    wout = 0.1 * jax.random.normal(k[4], (H, V), jnp.float32)
    bout = 0.1 * jax.random.normal(k[5], (1, V), jnp.float32)
    params = (emb, wih, whh, b, wout, bout)

    encoder_hidden = 0.5 * jax.random.normal(k[6], (1, B, H), jnp.float32)

    out, (hN, cN) = code_decoder_forward(params, encoder_hidden, T)
    jax.block_until_ready((out, hN, cN))

    ref_out, (ref_h, ref_c) = _reference(params, encoder_hidden, T)
    assert out.shape == (B, T, V) and hN.shape == (1, B, H) and cN.shape == (1, B, H)
    assert jnp.allclose(out, ref_out, atol=2e-4, rtol=2e-4)
    assert jnp.allclose(hN, ref_h, atol=2e-4, rtol=2e-4)
    assert jnp.allclose(cN, ref_c, atol=2e-4, rtol=2e-4)

    print("KERNEL_OK")
</pallas_src>

<mosaic_0001>
module attributes {stable_mosaic.version = 11 : i64} {
  func.func @_greedy_decode_kernel(%arg0: memref<1x8x128xf32, #tpu.memory_space<vmem>>, %arg1: memref<384x512xf32, #tpu.memory_space<vmem>>, %arg2: memref<1x512xf32, #tpu.memory_space<vmem>>, %arg3: memref<128x256xf32, #tpu.memory_space<vmem>>, %arg4: memref<1x256xf32, #tpu.memory_space<vmem>>, %arg5: memref<6x8x256xf32, #tpu.memory_space<vmem>>, %arg6: memref<1x8x128xf32, #tpu.memory_space<vmem>>, %arg7: memref<1x8x128xf32, #tpu.memory_space<vmem>>) attributes {dimension_semantics = [], scalar_prefetch = 0 : i64, scratch_operands = 0 : i64, tpu.core_type = #tpu.core_type<tc>} {
    %0 = tpu.iota {dimensions = array<i32: 1>} : vector<8x256xi32>
    %c0 = arith.constant 0 : index
    %c0_0 = arith.constant 0 : index
    %c0_1 = arith.constant 0 : index
    %1 = vector.load %arg0[%c0, %c0_0, %c0_1] : memref<1x8x128xf32, #tpu.memory_space<vmem>>, vector<1x8x128xf32>
    %2 = vector.shape_cast %1 : vector<1x8x128xf32> to vector<8x128xf32>
    %cst = arith.constant 0.000000e+00 : f32
    %3 = vector.broadcast %cst : f32 to vector<8x128xf32>
    %c1_i32 = arith.constant 1 : i32
    %4 = vector.broadcast %c1_i32 : i32 to vector<8x1xi32>
    %c0_i32 = arith.constant 0 : i32
    %c6_i32 = arith.constant 6 : i32
    %5 = arith.addi %c0_i32, %c6_i32 : i32
    %c1_i32_2 = arith.constant 1 : i32
    %6:3 = scf.for %arg8 = %c0_i32 to %5 step %c1_i32_2 iter_args(%arg9 = %2, %arg10 = %3, %arg11 = %4) -> (vector<8x128xf32>, vector<8x128xf32>, vector<8x1xi32>)  : i32 {
      %11 = vector.broadcast %arg11 : vector<8x1xi32> to vector<8x256xi32>
      %12 = arith.cmpi eq, %0, %11 : vector<8x256xi32>
      %13 = arith.extui %12 : vector<8x256xi1> to vector<8x256xi32>
      %14 = arith.sitofp %13 : vector<8x256xi32> to vector<8x256xf32>
      %15 = tpu.concatenate %14, %arg9 in 1 : vector<8x256xf32>, vector<8x128xf32> -> vector<8x384xf32>
      %c0_10 = arith.constant 0 : index
      %c0_11 = arith.constant 0 : index
      %16 = vector.load %arg1[%c0_10, %c0_11] : memref<384x512xf32, #tpu.memory_space<vmem>>, vector<384x512xf32>
      %cst_12 = arith.constant dense<0.000000e+00> : vector<8x512xf32>
      %17 = tpu.matmul %15, %16, %cst_12 {dimension_numbers = #tpu.dot_dimension_numbers<[1], [0], [0], [1], [0, 0, 1, 1], [], []>, precision = #tpu.contract_precision<fp32>} : vector<8x384xf32>, vector<384x512xf32>, vector<8x512xf32> -> vector<8x512xf32>
      %c0_13 = arith.constant 0 : index
      %c0_14 = arith.constant 0 : index
      %18 = vector.load %arg2[%c0_13, %c0_14] : memref<1x512xf32, #tpu.memory_space<vmem>>, vector<1x512xf32>
      %19 = vector.broadcast %18 : vector<1x512xf32> to vector<8x512xf32>
      %20 = arith.addf %17, %19 : vector<8x512xf32>
      %21 = vector.extract_strided_slice %20 {offsets = [0, 0], sizes = [8, 128], strides = [1, 1]} : vector<8x512xf32> to vector<8x128xf32>
      %22 = arith.negf %21 : vector<8x128xf32>
      %23 = math.exp %22 : vector<8x128xf32>
      %cst_15 = arith.constant 1.000000e+00 : f32
      %24 = vector.broadcast %cst_15 : f32 to vector<8x128xf32>
      %25 = arith.addf %24, %23 : vector<8x128xf32>
      %26 = arith.divf %24, %25 : vector<8x128xf32>
      %27 = vector.extract_strided_slice %20 {offsets = [0, 128], sizes = [8, 128], strides = [1, 1]} : vector<8x512xf32> to vector<8x128xf32>
      %28 = arith.negf %27 : vector<8x128xf32>
      %29 = math.exp %28 : vector<8x128xf32>
      %cst_16 = arith.constant 1.000000e+00 : f32
      %30 = vector.broadcast %cst_16 : f32 to vector<8x128xf32>
      %31 = arith.addf %30, %29 : vector<8x128xf32>
      %32 = arith.divf %30, %31 : vector<8x128xf32>
      %33 = vector.extract_strided_slice %20 {offsets = [0, 256], sizes = [8, 128], strides = [1, 1]} : vector<8x512xf32> to vector<8x128xf32>
      %34 = math.tanh %33 : vector<8x128xf32>
      %35 = vector.extract_strided_slice %20 {offsets = [0, 384], sizes = [8, 128], strides = [1, 1]} : vector<8x512xf32> to vector<8x128xf32>
      %36 = arith.negf %35 : vector<8x128xf32>
      %37 = math.exp %36 : vector<8x128xf32>
      %cst_17 = arith.constant 1.000000e+00 : f32
      %38 = vector.broadcast %cst_17 : f32 to vector<8x128xf32>
      %39 = arith.addf %38, %37 : vector<8x128xf32>
      %40 = arith.divf %38, %39 : vector<8x128xf32>
      %41 = arith.mulf %32, %arg10 : vector<8x128xf32>
      %42 = arith.mulf %26, %34 : vector<8x128xf32>
      %43 = arith.addf %41, %42 : vector<8x128xf32>
      %44 = math.tanh %43 : vector<8x128xf32>
      %45 = arith.mulf %40, %44 : vector<8x128xf32>
      %c0_18 = arith.constant 0 : index
      %c0_19 = arith.constant 0 : index
      %46 = vector.load %arg3[%c0_18, %c0_19] : memref<128x256xf32, #tpu.memory_space<vmem>>, vector<128x256xf32>
      %cst_20 = arith.constant dense<0.000000e+00> : vector<8x256xf32>
      %47 = tpu.matmul %45, %46, %cst_20 {dimension_numbers = #tpu.dot_dimension_numbers<[1], [0], [0], [1], [0, 0, 1, 1], [], []>, precision = #tpu.contract_precision<fp32>} : vector<8x128xf32>, vector<128x256xf32>, vector<8x256xf32> -> vector<8x256xf32>
      %c0_21 = arith.constant 0 : index
      %c0_22 = arith.constant 0 : index
      %48 = vector.load %arg4[%c0_21, %c0_22] : memref<1x256xf32, #tpu.memory_space<vmem>>, vector<1x256xf32>
      %49 = vector.broadcast %48 : vector<1x256xf32> to vector<8x256xf32>
      %50 = arith.addf %47, %49 : vector<8x256xf32>
      %cst_23 = arith.constant dense<0xFF800000> : vector<8xf32>
      %51 = vector.multi_reduction <maximumf>, %50, %cst_23 [1] : vector<8x256xf32> to vector<8xf32>
      %52 = vector.shape_cast %51 : vector<8xf32> to vector<8x1xf32>
      %53 = vector.broadcast %52 : vector<8x1xf32> to vector<8x256xf32>
      %54 = arith.subf %50, %53 : vector<8x256xf32>
      %55 = math.exp %54 : vector<8x256xf32>
      %cst_24 = arith.constant dense<0.000000e+00> : vector<8xf32>
      %56 = vector.multi_reduction <add>, %55, %cst_24 [1] : vector<8x256xf32> to vector<8xf32>
      %57 = vector.shape_cast %56 : vector<8xf32> to vector<8x1xf32>
      %58 = math.log %57 : vector<8x1xf32>
      %59 = vector.broadcast %58 : vector<8x1xf32> to vector<8x256xf32>
      %60 = arith.subf %54, %59 : vector<8x256xf32>
      %61 = arith.index_cast %arg8 : i32 to index
      %c0_25 = arith.constant 0 : index
      %c0_26 = arith.constant 0 : index
      %62 = vector.load %arg5[%61, %c0_25, %c0_26] : memref<6x8x256xf32, #tpu.memory_space<vmem>>, vector<1x8x256xf32>
      %63 = vector.shape_cast %62 : vector<1x8x256xf32> to vector<8x256xf32>
      %64 = vector.shape_cast %60 : vector<8x256xf32> to vector<1x8x256xf32>
      tpu.vector_store %arg5[%61, %c0_25, %c0_26], %64 {strides = array<i32>} : memref<6x8x256xf32, #tpu.memory_space<vmem>>, vector<1x8x256xf32>,
      %65 = vector.broadcast %52 : vector<8x1xf32> to vector<8x256xf32>
      %66 = arith.cmpf oeq, %50, %65 : vector<8x256xf32>
      %c256_i32 = arith.constant 256 : i32
      %67 = vector.broadcast %c256_i32 : i32 to vector<8x256xi32>
      %68 = arith.select %66, %0, %67 : vector<8x256xi1>, vector<8x256xi32>
      %cst_27 = arith.constant dense<2147483647> : vector<8xi32>
      %69 = vector.multi_reduction <minsi>, %68, %cst_27 [1] : vector<8x256xi32> to vector<8xi32>
      %70 = vector.shape_cast %69 : vector<8xi32> to vector<8x1xi32>
      scf.yield %45, %43, %70 : vector<8x128xf32>, vector<8x128xf32>, vector<8x1xi32>
    }
    %c6_i32_3 = arith.constant 6 : i32
    %7 = vector.shape_cast %6#0 : vector<8x128xf32> to vector<1x8x128xf32>
    %c0_4 = arith.constant 0 : index
    %c0_5 = arith.constant 0 : index
    %c0_6 = arith.constant 0 : index
    %8 = vector.load %arg6[%c0_4, %c0_5, %c0_6] : memref<1x8x128xf32, #tpu.memory_space<vmem>>, vector<1x8x128xf32>
    tpu.vector_store %arg6[%c0_4, %c0_5, %c0_6], %7 {strides = array<i32>} : memref<1x8x128xf32, #tpu.memory_space<vmem>>, vector<1x8x128xf32>,
    %9 = vector.shape_cast %6#1 : vector<8x128xf32> to vector<1x8x128xf32>
    %c0_7 = arith.constant 0 : index
    %c0_8 = arith.constant 0 : index
    %c0_9 = arith.constant 0 : index
    %10 = vector.load %arg7[%c0_7, %c0_8, %c0_9] : memref<1x8x128xf32, #tpu.memory_space<vmem>>, vector<1x8x128xf32>
    tpu.vector_store %arg7[%c0_7, %c0_8, %c0_9], %9 {strides = array<i32>} : memref<1x8x128xf32, #tpu.memory_space<vmem>>, vector<1x8x128xf32>,
    return
  }
}

</mosaic_0001>

<bundles_post_ra>
// kernel: tpu_custom_call.1
= control target key start
LH: loop header
LB: loop body
LE: loop exit
PB: predicated region body
PF: predicated region fallthrough
CT: control target
= control target key end

     0   :  { %13 = vsyncpa [#allocation3], 0  ;;  %s9398_s0 = inlined_call_operand.hbm [shape: f32[1,8,128], index: 0, kind: input, shape index: {}]   ;;  %s9399_s1 = inlined_call_operand.hbm [shape: f32[384,512], index: 1, kind: input, shape index: {}]   ;;  %s9400_s2 = inlined_call_operand.hbm [shape: f32[1,512], index: 2, kind: input, shape index: {}]   ;;  %s9401_s3 = inlined_call_operand.hbm [shape: f32[128,256], index: 3, kind: input, shape index: {}]   ;;  %s9402_s4 = inlined_call_operand.vmem [shape: f32[1,256], index: 4, kind: input, shape index: {}]   ;;  %s9403_s5 = inlined_call_operand.hbm [shape: f32[6,8,256], index: 5, kind: output, shape index: {0}]   ;;  %s9404_s6 = inlined_call_operand.hbm [shape: f32[1,8,128], index: 6, kind: output, shape index: {1}]   ;;  %s9405_s7 = inlined_call_operand.hbm [shape: f32[1,8,128], index: 7, kind: output, shape index: {2}]  }
   0x1   :  { %14 = vsyncpa [#allocation6], 0 }
   0x2   :  { %15 = vsyncpa [#allocation9], 0 }
   0x3   :  { %16 = vsyncpa [#allocation4], 0  ;;  %s33_s26 = sshll.u32 %s9399_s1, 4  ;;  %s34_s26 = int_to_ptr.hbm [resolvable:$true] %s33_s26 }
   0x4   :  { %17 = vsyncpa [#allocation12], 0  ;;  %s5601_s27 = smov [#allocation5]   ;;  %s23_s8 = sshll.u32 %s9398_s0, 4  ;;  %s24_s8 = int_to_ptr.hbm [resolvable:$true] %s23_s8 }
   0x5   :  { %s35_s28 = sshll.u32 %s5601_s27, 4  ;;  %s5602_s9 = smov 512   ;;  %s36_s28 = int_to_ptr.vmem [resolvable:$true] %s35_s28 }
   0x6   :  { %s5603_s10 = smov 32   ;;  %s5604_s11 = smov [#allocation2]  }
   0x7   :  { %41 = dma.hbm_to_vmem [thread:$0]  %s34_s26, 24576, %s36_s28, [#allocation6], %s5602_s9, %s5602_s9, %s5603_s10  }
   0x8   :  { %s25_s12 = sshll.u32 %s5604_s11, 4  ;;  %s47_s15 = sshll.u32 %s9400_s2, 4  ;;  %s26_s12 = int_to_ptr.vmem [resolvable:$true] %s25_s12  ;;  %s48_s15 = int_to_ptr.hbm [resolvable:$true] %s47_s15 }
   0x9   :  { %28 = dma.hbm_to_vmem [thread:$0]  %s24_s8, 128, %s26_s12, [#allocation3]  }
   0xa   :  { %s57_s17 = sshll.u32 %s9401_s3, 4  ;;  %s5605_s18 = smov [#allocation7]   ;;  %s58_s17 = int_to_ptr.hbm [resolvable:$true] %s57_s17 }
   0xb   :  { %s49_s19 = sshll.u32 %s5605_s18, 4  ;;  %s5606_s0 = smov [#allocation8]   ;;  %s50_s19 = int_to_ptr.vmem [resolvable:$true] %s49_s19 }
   0xc   :  { %52 = dma.hbm_to_vmem [thread:$0]  %s48_s15, 64, %s50_s19, [#allocation6]  }
   0xd   :  { %s59_s20 = sshll.u32 %s5606_s0, 4  ;;  %s5607_s21 = smov 256   ;;  %s60_s20 = int_to_ptr.vmem [resolvable:$true] %s59_s20 }
   0xe   :  { %s5608_s22 = smov 16  }
   0xf   :  { %65 = dma.hbm_to_vmem [thread:$0]  %s58_s17, 4096, %s60_s20, [#allocation9], %s5607_s21, %s5607_s21, %s5608_s22  }
  0x10   :  { %5575 = dma.done.wait [#allocation3], 128  }
  0x11   :  { %5576 = vsyncadd [#allocation3], 4294967168 }
  0x12   :  { %5577 = dma.done.wait [#allocation6], 24640  }
  0x13   :  { %5578 = vsyncadd [#allocation6], 4294942656 }
  0x14   :  { %5579 = dma.done.wait [#allocation9], 4096  }
  0x15   :  { %5580 = vsyncadd [#allocation9], 4294963200  ;;  %v84_v0 = vlaneseq  ;;  %v87_v3 = vld [vmem:[#allocation2] sm:$0xff]   ;;  %v5674_v4 = vmov 1   ;;  %v5676_v5 = vmov 0.0   ;;  %s5680_s2 = smov 0  }
  0x17   :  { %v5669_v1 = vand.u32 127, %v84_v0 }
  0x19   :  { %9579 = vst [vmem:[#allocation19_spill] sm:$0xff] %v5669_v1  ;;  %v5672_v2 = vadd.s32 128, %v5669_v1 }
  0x1b   :  { %9580 = vst [vmem:[#allocation20_spill] sm:$0xff] %v5672_v2 }
  0x1c LB: > { %9581 = vst [vmem:[#allocation21_spill] sm:$0xff] %v5591_v5  ;;  %v163_v6 = vld [vmem:[#allocation5 + $0x1e0] sm:$0xff]  ;;  %s5322_s24 = sshll.u32 %s5599_s2, 4  ;;  %s93_s2 = sadd.s32 1, %s5599_s2   ;;  %s5599_s2 = sphi %s5680_s2, %s93_s2   ;;  %v5595_v3 = vphi %v87_v3, %v9884_v3   ;;  %v5591_v5 = vphi %v5676_v5, %v9883_v5   ;;  %v5587_v4 = vphi %v5674_v4, %v5220_v4  }
  0x1d   : > { %9582 = vst [vmem:[#allocation22_spill] sm:$0xff] %v5595_v3  ;;  %v159_v7 = vld [vmem:[#allocation5 + $0x1c0] sm:$0xff]  ;;  %v5694_v9 = vand.u32 4294901760, %v163_v6  ;;  %s5198_s25 = scalar_lea.vmem [#allocation10], %s5322_s24  ;;  %p90_p0 = scmp.ge.s32.totalorder %s93_s2, 6  }
  0x1e   : > { %v155_v8 = vld [vmem:[#allocation5 + $0x1a0] sm:$0xff]  ;;  %v5696_v10 = vand.u32 4294901760, %v159_v7  ;;  %s5243_s28 = sshll.u32 (%p90_p0), %s9404_s6, 4  ;;  %s5611_s29 = smov (%p90_p0), [#allocation11]   ;;  %s5244_s28 = int_to_ptr.hbm [resolvable:$true] %s5243_s28 }
  0x1f   : > { %v5698_v11 = vand.u32 4294901760, %v155_v8  ;;  %v151_v12 = vld [vmem:[#allocation5 + $0x180] sm:$0xff]  ;;  %306 = vmatpush.msra.mxu0 %v5694_v9  ;;  %v5708_v20 = vsub.f32 %v163_v6, %v5694_v9  ;;  %502 = vmatpush.msra.mxu3 %v5694_v9  ;;  %s5241_s30 = sshll.u32 (%p90_p0), %s5611_s29, 4  ;;  %s5612_s8 = smov (%p90_p0), [#allocation10]   ;;  %s5242_s30 = int_to_ptr.vmem [resolvable:$true] %s5241_s30 }
  0x20   : > { %v147_v13 = vld [vmem:[#allocation5 + $0x160] sm:$0xff]  ;;  %v5700_v15 = vand.u32 4294901760, %v151_v12  ;;  %v5711_v21 = vsub.f32 %v159_v7, %v5696_v10  ;;  %v9599_v1 = vld [vmem:[#allocation19_spill] sm:$0xff]  ;;  %s5227_s9 = sshll.u32 (%p90_p0), %s5612_s8, 4  ;;  %s5229_s12 = sshll.u32 (%p90_p0), %s9403_s5, 4  ;;  %s5228_s9 = int_to_ptr.vmem [resolvable:$true] %s5227_s9  ;;  %s5230_s12 = int_to_ptr.hbm [resolvable:$true] %s5229_s12 }
  0x21   : > { %v143_v14 = vld [vmem:[#allocation5 + $0x140] sm:$0xff]  ;;  %v5702_v16 = vand.u32 4294901760, %v147_v13  ;;  %v5715_v22 = vsub.f32 %v155_v8, %v5698_v11  ;;  %308 = vmatpush.msra.mxu0 %v5696_v10  ;;  %449 = vmatpush.msra.mxu2 %v5708_v20  ;;  %v9418_v28 = vand.u32 4294901760, %v5708_v20  ;;  %vm5992_vm0 = vcmp.eq.s32.totalorder %v9599_v1, %v5587_v4  ;;  %s5254_s13 = sshll.u32 (%p90_p0), %s9405_s7, 4  ;;  %s5613_s14 = smov (%p90_p0), [#allocation13]   ;;  %s5255_s13 = int_to_ptr.hbm [resolvable:$true] %s5254_s13 }
  0x22   : > { %v5704_v17 = vand.u32 4294901760, %v143_v14  ;;  %v139_v18 = vld [vmem:[#allocation5 + $0x120] sm:$0xff]  ;;  %v5720_v25 = vsub.f32 %v151_v12, %v5700_v15  ;;  %v9417_v29 = vand.u32 4294901760, %v5711_v21  ;;  %504 = vmatpush.msra.mxu3 %v5696_v10  ;;  %s5252_s15 = sshll.u32 (%p90_p0), %s5613_s14, 4  ;;  %s5253_s15 = int_to_ptr.vmem [resolvable:$true] %s5252_s15 }
  0x23   : > { %v135_v19 = vld [vmem:[#allocation5 + $0x100] sm:$0xff]  ;;  %v5717_v23 = vand.u32 4294901760, %v139_v18  ;;  %v5723_v26 = vsub.f32 %v147_v13, %v5702_v16  ;;  %v9415_v30 = vand.u32 4294901760, %v5715_v22  ;;  %310 = vmatpush.msra.mxu0 %v5698_v11  ;;  %452 = vmatpush.msra.mxu2 %v5711_v21  ;;  %v349_v36 = vsub.f32 %v5708_v20, %v9418_v28 }
  0x24   : > { %v131_v24 = vld [vmem:[#allocation5 + $0xe0] sm:$0xff]  ;;  %v5726_v27 = vsub.f32 %v143_v14, %v5704_v17  ;;  %v5733_v31 = vand.u32 4294901760, %v135_v19  ;;  %v9414_v33 = vand.u32 4294901760, %v5720_v25  ;;  %v355_v37 = vsub.f32 %v5711_v21, %v9417_v29  ;;  %506 = vmatpush.msra.mxu3 %v5698_v11 }
  0x25   : > { %v127_v32 = vld [vmem:[#allocation5 + $0xc0] sm:$0xff]  ;;  %v5737_v34 = vand.u32 4294901760, %v131_v24  ;;  %v5740_v35 = vsub.f32 %v139_v18, %v5717_v23  ;;  %v361_v38 = vsub.f32 %v5715_v22, %v9415_v30  ;;  %v9413_v39 = vand.u32 4294901760, %v5723_v26  ;;  %312 = vmatpush.msra.mxu0 %v5700_v15  ;;  %455 = vmatpush.msra.mxu2 %v5715_v22 }
  0x26   : > { %v5755_v40 = vand.u32 4294901760, %v127_v32  ;;  %v9412_v41 = vand.u32 4294901760, %v5726_v27  ;;  %v123_v42 = vld [vmem:[#allocation5 + $0xa0] sm:$0xff]  ;;  %v350_v43 = vand.u32 4294901760, %v349_v36  ;;  %v356_v44 = vand.u32 4294901760, %v355_v37  ;;  %508 = vmatpush.msra.mxu3 %v5700_v15 }
  0x27   : > { %v367_v45 = vsub.f32 %v5720_v25, %v9414_v33  ;;  %v5764_v46 = vsub.f32 %v135_v19, %v5733_v31  ;;  %v5768_v47 = vsub.f32 %v131_v24, %v5737_v34  ;;  %v119_v48 = vld [vmem:[#allocation5 + $0x80] sm:$0xff]  ;;  %314 = vmatpush.msra.mxu0 %v5702_v16  ;;  %v362_v49 = vand.u32 4294901760, %v361_v38  ;;  %458 = vmatpush.msra.mxu2 %v5720_v25 }
  0x28   : > { %351 = vmatpush.msra.mxu1 %v350_v43  ;;  %v373_v50 = vsub.f32 %v5723_v26, %v9413_v39  ;;  %v5774_v51 = vand.u32 4294901760, %v123_v42  ;;  %v9410_v52 = vand.u32 4294901760, %v5740_v35  ;;  %510 = vmatpush.msra.mxu3 %v5702_v16  ;;  %v379_v53 = vsub.f32 %v5726_v27, %v9412_v41  ;;  %v115_v54 = vld [vmem:[#allocation5 + $0x60] sm:$0xff] }
  0x29   : > { %316 = vmatpush.msra.mxu0 %v5704_v17  ;;  %v368_v55 = vand.u32 4294901760, %v367_v45  ;;  %v5783_v56 = vand.u32 4294901760, %v119_v48  ;;  %v9409_v57 = vand.u32 4294901760, %v5764_v46  ;;  %v5787_v58 = vsub.f32 %v127_v32, %v5755_v40  ;;  %461 = vmatpush.msra.mxu2 %v5723_v26  ;;  %v111_v60 = vld [vmem:[#allocation5 + $0x40] sm:$0xff] }
  0x2a   : > { %357 = vmatpush.msra.mxu1 %v356_v44  ;;  %512 = vmatpush.msra.mxu3 %v5704_v17  ;;  %v9408_v59 = vand.u32 4294901760, %v5768_v47  ;;  %v374_v61 = vand.u32 4294901760, %v373_v50  ;;  %v385_v62 = vsub.f32 %v5740_v35, %v9410_v52  ;;  %v5796_v63 = vand.u32 4294901760, %v115_v54  ;;  %v227_v6 = vld [vmem:[#allocation5 + $0x3e0] sm:$0xff] }
  0x2b   : > { %318 = vmatpush.msra.mxu0 %v5717_v23  ;;  %v5799_v0 = vsub.f32 %v123_v42, %v5774_v51  ;;  %464 = vmatpush.msra.mxu2 %v5726_v27  ;;  %v380_v7 = vand.u32 4294901760, %v379_v53  ;;  %v107_v8 = vld [vmem:[#allocation5 + $0x20] sm:$0xff]  ;;  %v391_v12 = vsub.f32 %v5764_v46, %v9409_v57  ;;  %v5807_v13 = vand.u32 4294901760, %v111_v60 }
  0x2c   : > { %363 = vmatpush.msra.mxu1 %v362_v49  ;;  %514 = vmatpush.msra.mxu3 %v5717_v23  ;;  %v9406_v14 = vand.u32 4294901760, %v5787_v58  ;;  %v5811_v18 = vsub.f32 %v119_v48, %v5783_v56  ;;  %v103_v19 = vld [vmem:[#allocation5] sm:$0xff]  ;;  %v397_v32 = vsub.f32 %v5768_v47, %v9408_v59  ;;  %v5818_v36 = vand.u32 4294901760, %v227_v6 }
  0x2d   : > { %320 = vmatpush.msra.mxu0 %v5733_v31  ;;  %9583 = vst [vmem:[#allocation23_spill] sm:$0xff] %v5807_v13  ;;  %v223_v24 = vld [vmem:[#allocation5 + $0x3c0] sm:$0xff]  ;;  %467 = vmatpush.msra.mxu2 %v5740_v35  ;;  %v386_v37 = vand.u32 4294901760, %v385_v62  ;;  %v5821_v38 = vand.u32 4294901760, %v107_v8  ;;  %v9407_v42 = vand.u32 4294901760, %v5799_v0  ;;  %v5825_v43 = vsub.f32 %v115_v54, %v5796_v63 }
  0x2e   : > { %369 = vmatpush.msra.mxu1 %v368_v55  ;;  %516 = vmatpush.msra.mxu3 %v5733_v31  ;;  %v5829_v44 = vand.u32 4294901760, %v103_v19  ;;  %v5831_v45 = vand.u32 4294901760, %v223_v24  ;;  %v219_v48 = vld [vmem:[#allocation5 + $0x3a0] sm:$0xff]  ;;  %v392_v49 = vand.u32 4294901760, %v391_v12  ;;  %v403_v50 = vsub.f32 %v5787_v58, %v9406_v14 }
  0x2f   : > { %322 = vmatpush.msra.mxu0 %v5737_v34  ;;  %9584 = vst [vmem:[#allocation24_spill] sm:$0xff] %v5821_v38  ;;  %470 = vmatpush.msra.mxu2 %v5764_v46  ;;  %v9411_v53 = vand.u32 4294901760, %v5811_v18  ;;  %v5839_v54 = vsub.f32 %v111_v60, %v5807_v13  ;;  %v398_v55 = vand.u32 4294901760, %v397_v32  ;;  %v215_v62 = vld [vmem:[#allocation5 + $0x380] sm:$0xff]  ;;  %v9416_v12 = vand.u32 4294901760, %v5825_v43 }
  0x30   : > { %375 = vmatpush.msra.mxu1 %v374_v61  ;;  %518 = vmatpush.msra.mxu3 %v5737_v34  ;;  %9585 = vst [vmem:[#allocation25_spill] sm:$0xff] %v5829_v44  ;;  %v5844_v61 = vsub.f32 %v227_v6, %v5818_v36  ;;  %v5852_v60 = vsub.f32 %v107_v8, %v5821_v38  ;;  %v5854_v14 = vand.u32 4294901760, %v219_v48  ;;  %v211_v32 = vld [vmem:[#allocation5 + $0x360] sm:$0xff]  ;;  %v5869_v57 = vand.u32 4294901760, %v215_v62 }
  0x31   : > { %324 = vmatpush.msra.mxu0 %v5755_v40  ;;  %473 = vmatpush.msra.mxu2 %v5768_v47  ;;  %v5859_v6 = vsub.f32 %v103_v19, %v5829_v44  ;;  %v415_v8 = vsub.f32 %v5811_v18, %v9411_v53  ;;  %v9419_v59 = vand.u32 4294901760, %v5839_v54  ;;  %v207_v52 = vld [vmem:[#allocation5 + $0x340] sm:$0xff] }
  0x32   : > { %381 = vmatpush.msra.mxu1 %v380_v7  ;;  %520 = vmatpush.msra.mxu3 %v5755_v40  ;;  %v409_v7 = vsub.f32 %v5799_v0, %v9407_v42  ;;  %v404_v42 = vand.u32 4294901760, %v403_v50  ;;  %v9420_v19 = vand.u32 4294901760, %v5844_v61  ;;  %v421_v50 = vsub.f32 %v5825_v43, %v9416_v12  ;;  %v203_v39 = vld [vmem:[#allocation5 + $0x320] sm:$0xff] }
  0x33   : > { %326 = vmatpush.msra.mxu0 %v5774_v51  ;;  %476 = vmatpush.msra.mxu2 %v5787_v58  ;;  %v9421_v53 = vand.u32 4294901760, %v5852_v60  ;;  %v5882_v41 = vsub.f32 %v219_v48, %v5854_v14  ;;  %v5893_v48 = vsub.f32 %v215_v62, %v5869_v57  ;;  %v5895_v12 = vand.u32 4294901760, %v207_v52  ;;  %v199_v29 = vld [vmem:[#allocation5 + $0x300] sm:$0xff] }
  0x34   : > { %387 = vmatpush.msra.mxu1 %v386_v37  ;;  %522 = vmatpush.msra.mxu3 %v5774_v51  ;;  %v5862_v37 = vsub.f32 %v223_v24, %v5831_v45  ;;  %v5874_v24 = vand.u32 4294901760, %v211_v32  ;;  %v690_v28 = vsub.f32 %v5844_v61, %v9420_v19  ;;  %v422_v62 = vand.u32 4294901760, %v421_v50  ;;  %v195_v33 = vld [vmem:[#allocation5 + $0x2e0] sm:$0xff] }
  0x35   : > { %328 = vmatpush.msra.mxu0 %v5783_v56  ;;  %479 = vmatpush.msra.mxu2 %v5799_v0  ;;  %v5920_v50 = vand.u32 4294901760, %v199_v29  ;;  %v5925_v3 = vsub.f32 %v207_v52, %v5895_v12  ;;  %v9590_v52 = vand.u32 4294901760, %v5882_v41  ;;  %v187_v30 = vld [vmem:[#allocation5 + $0x2a0] sm:$0xff] }
  0x36   : > { %9586 = vst [vmem:[#allocation26_spill] sm:$0xff] %v5862_v37  ;;  %393 = vmatpush.msra.mxu1 %v392_v49  ;;  %524 = vmatpush.msra.mxu3 %v5783_v56  ;;  %v410_v49 = vand.u32 4294901760, %v409_v7  ;;  %v427_v7 = vsub.f32 %v5839_v54, %v9419_v59  ;;  %v433_v59 = vsub.f32 %v5852_v60, %v9421_v53  ;;  %v9588_v5 = vand.u32 4294901760, %v5862_v37  ;;  %v9615_v2 = vld [vmem:[#allocation20_spill] sm:$0xff] }
  0x37   : > { %330 = vmatpush.msra.mxu0 %v5796_v63  ;;  %482 = vmatpush.msra.mxu2 %v5811_v18  ;;  %vm6080_vm1 = vcmp.eq.s32.totalorder %v9615_v2, %v5587_v4  ;;  %v9620_v4 = vand.u32 4294901760, %v5839_v54 }
  0x38   : > { %399 = vmatpush.msra.mxu1 %v398_v55  ;;  %526 = vmatpush.msra.mxu3 %v5796_v63  ;;  %v416_v55 = vand.u32 4294901760, %v415_v8  ;;  %v5905_v8 = vand.u32 4294901760, %v203_v39  ;;  %v428_v53 = vand.u32 4294901760, %v427_v7  ;;  %v434_v7 = vand.u32 4294901760, %v433_v59 }
  0x39   : > { %332 = vmatpush.msra.mxu0 %v5807_v13  ;;  %485 = vmatpush.msra.mxu2 %v5825_v43  ;;  %v9592_v59 = vand.u32 4294901760, %v5893_v48 }
  0x3a   : > { %405 = vmatpush.msra.mxu1 %v404_v42  ;;  %528 = vmatpush.msra.mxu3 %v5807_v13  ;;  %v5903_v42 = vsub.f32 %v211_v32, %v5874_v24  ;;  %v9587_v32 = vand.u32 4294901760, %v5859_v6 }
  0x3b   : > { %334 = vmatpush.msra.mxu0 %v5821_v38  ;;  %488 = vmatpush.msra.mxu2 %v5839_v54 }
  0x3c   : > { %411 = vmatpush.msra.mxu1 %v410_v49  ;;  %530 = vmatpush.msra.mxu3 %v5821_v38  ;;  %v439_v19 = vsub.f32 %v5859_v6, %v9587_v32  ;;  %v696_v49 = vsub.f32 %v5862_v37, %v9588_v5  ;;  %v9589_v38 = vand.u32 4294901760, %v5708_v20  ;;  %v691_v32 = vand.u32 4294901760, %v690_v28 }
  0x3d   : > { %336 = vmatpush.msra.mxu0 %v5829_v44  ;;  %491 = vmatpush.msra.mxu2 %v5852_v60  ;;  %v5932_v5 = vsub.f32 %v203_v39, %v5905_v8  ;;  %v5934_v37 = vand.u32 4294901760, %v195_v33  ;;  %v702_v20 = vsub.f32 %v5882_v41, %v9590_v52  ;;  %v5944_v39 = vsub.f32 %v199_v29, %v5920_v50 }
  0x3e   : > { %417 = vmatpush.msra.mxu1 %v416_v55  ;;  %v191_v55 = vld [vmem:[#allocation5 + $0x2c0] sm:$0xff]  ;;  %532 = vmatpush.msra.mxu3 %v5829_v44  ;;  %v440_v28 = vand.u32 4294901760, %v439_v19  ;;  %v697_v13 = vand.u32 4294901760, %v696_v49  ;;  %v9594_v19 = vand.u32 4294901760, %v5903_v42  ;;  %v5963_v52 = vand.u32 4294901760, %v187_v30 }
  0x3f   : > { %543 = vmatpush.msrb.mxu0 %v9589_v38  ;;  %v9591_v38 = vand.u32 4294901760, %v5711_v21  ;;  %494 = vmatpush.msra.mxu2 %v5859_v6  ;;  %v5951_v44 = vand.u32 4294901760, %v191_v55  ;;  %v9593_v21 = vand.u32 4294901760, %v5715_v22  ;;  %v5960_v49 = vsub.f32 %v195_v33, %v5934_v37 }
  0x40   : > { %423 = vmatpush.msra.mxu1 %v422_v62  ;;  %v708_v62 = vsub.f32 %v5893_v48, %v9592_v59  ;;  %692 = vmatpush.msrb.mxu3 %v691_v32  ;;  %v714_v29 = vsub.f32 %v5903_v42, %v9594_v19  ;;  %v703_v59 = vand.u32 4294901760, %v702_v20  ;;  %v9595_v22 = vand.u32 4294901760, %v5720_v25 }
  0x41   : > { %547 = vmatpush.msrb.mxu0 %v9591_v38  ;;  %647 = vmatpush.msrb.mxu2 %v5818_v36  ;;  %v183_v38 = vld [vmem:[#allocation5 + $0x280] sm:$0xff]  ;;  %v9428_v32 = vand.u32 4294901760, %v5944_v39  ;;  %v9596_v33 = vand.u32 4294901760, %v5925_v3  ;;  %v9597_v25 = vand.u32 4294901760, %v5723_v26  ;;  %v9600_v26 = vmov 0 }
  0x42   : > { %429 = vmatpush.msra.mxu1 %v428_v53  ;;  %698 = vmatpush.msrb.mxu3 %v697_v13  ;;  %v709_v19 = vand.u32 4294901760, %v708_v62  ;;  %v5973_v53 = vsub.f32 %v191_v55, %v5951_v44  ;;  %v5975_v20 = vand.u32 4294901760, %v183_v38  ;;  %v715_v13 = vand.u32 4294901760, %v714_v29 }
  0x43   : > { %551 = vmatpush.msrb.mxu0 %v9593_v21  ;;  %649 = vmatpush.msrb.mxu2 %v5831_v45  ;;  %v179_v21 = vld [vmem:[#allocation5 + $0x260] sm:$0xff]  ;;  %v5986_v55 = vsub.f32 %v187_v30, %v5963_v52  ;;  %v9601_v26 = vsel %vm5992_vm0, 4294967295, %v9600_v26  ;;  %v732_v29 = vsub.f32 %v5944_v39, %v9428_v32  ;;  %v9604_v62 = vand.u32 4294901760, %v5740_v35 }
  0x44   : > { %435 = vmatpush.msra.mxu1 %v434_v7  ;;  %v720_v7 = vsub.f32 %v5925_v3, %v9596_v33  ;;  %704 = vmatpush.msrb.mxu3 %v703_v59  ;;  %v5988_v33 = vand.u32 4294901760, %v179_v21  ;;  %9602 = vst [vmem:[#allocation27_spill] sm:$0xff] %v9601_v26  ;;  %v175_v59 = vld [vmem:[#allocation5 + $0x240] sm:$0xff] }
  0x45   : > { %555 = vmatpush.msrb.mxu0 %v9595_v22  ;;  %651 = vmatpush.msrb.mxu2 %v5854_v14 }
  0x46   : > { %441 = vmatpush.msra.mxu1 %v440_v28  ;;  %v9598_v28 = vand.u32 4294901760, %v5932_v5  ;;  %710 = vmatpush.msrb.mxu3 %v709_v19  ;;  %v721_v30 = vand.u32 4294901760, %v720_v7  ;;  %v171_v19 = vld [vmem:[#allocation5 + $0x220] sm:$0xff]  ;;  %v6020_v35 = vsub.f32 %v179_v21, %v5988_v33 }
  0x47   : > { %559 = vmatpush.msrb.mxu0 %v9597_v25  ;;  %653 = vmatpush.msrb.mxu2 %v5869_v57  ;;  %v6017_v25 = vand.u32 4294901760, %v175_v59  ;;  %v6032_v21 = vand.u32 4294901760, %v171_v19 }
  0x48   : > { %610 = vmatpush.msrb.mxu1 %v5694_v9  ;;  %v726_v22 = vsub.f32 %v5932_v5, %v9598_v28  ;;  %v9603_v9 = vand.u32 4294901760, %v5726_v27  ;;  %v6005_v28 = vsub.f32 %v183_v38, %v5975_v20  ;;  %716 = vmatpush.msrb.mxu3 %v715_v13  ;;  %v9607_v13 = vand.u32 4294901760, %v5973_v53 }
  0x49   : > { %655 = vmatpush.msrb.mxu2 %v5874_v24 }
  0x4a   : > { %563 = vmatpush.msrb.mxu0 %v9603_v9  ;;  %612 = vmatpush.msrb.mxu1 %v5696_v10  ;;  %v9605_v10 = vand.u32 4294901760, %v5960_v49  ;;  %v5609_v9 = vmov 0.0   ;;  %v727_v7 = vand.u32 4294901760, %v726_v22  ;;  %v744_v22 = vsub.f32 %v5973_v53, %v9607_v13 }
  0x4b   : > { %v5291_v32 = vsel %vm5992_vm0, 1.0, %v5609_v9  ;;  %657 = vmatpush.msrb.mxu2 %v5895_v12  ;;  %722 = vmatpush.msrb.mxu3 %v721_v30  ;;  %v755_v38 = vand.u32 4294901760, %v6005_v28 }
  0x4c   : > { %567 = vmatpush.msrb.mxu0 %v9604_v62  ;;  %614 = vmatpush.msrb.mxu1 %v5698_v11  ;;  %v738_v27 = vsub.f32 %v5960_v49, %v9605_v10  ;;  %v9606_v11 = vand.u32 4294901760, %v5764_v46  ;;  %v733_v62 = vand.u32 4294901760, %v732_v29  ;;  %v167_v10 = vld [vmem:[#allocation5 + $0x200] sm:$0xff]  ;;  %v6030_v1 = vsub.f32 %v5291_v32, %v5291_v32 }
  0x4d   : > { %659 = vmatpush.msrb.mxu2 %v5905_v8  ;;  %v9609_v46 = vand.u32 4294901760, %v5768_v47  ;;  %728 = vmatpush.msrb.mxu3 %v727_v7  ;;  %v9610_v29 = vand.u32 4294901760, %v5986_v55  ;;  %v6043_v32 = vsub.f32 %v175_v59, %v6017_v25  ;;  %v6045_v13 = vand.u32 4294901760, %v167_v10 }
  0x4e   : > { %571 = vmatpush.msrb.mxu0 %v9606_v11  ;;  %616 = vmatpush.msrb.mxu1 %v5700_v15  ;;  %9608 = vst [vmem:[#allocation28_spill] sm:$0xff] %v6030_v1  ;;  %v739_v15 = vand.u32 4294901760, %v738_v27  ;;  %v761_v11 = vand.u32 4294901760, %v6020_v35  ;;  %v9611_v47 = vand.u32 4294901760, %v5787_v58  ;;  %v756_v27 = vsub.f32 %v6005_v28, %v755_v38 }
  0x4f   : > { %661 = vmatpush.msrb.mxu2 %v5920_v50  ;;  %v750_v30 = vsub.f32 %v5986_v55, %v9610_v29  ;;  %734 = vmatpush.msrb.mxu3 %v733_v62  ;;  %v6055_v7 = vand.u32 4294901760, %v6030_v1  ;;  %v6058_v59 = vsub.f32 %v171_v19, %v6032_v21  ;;  %v767_v62 = vand.u32 4294901760, %v6043_v32 }
  0x50   : > { %575 = vmatpush.msrb.mxu0 %v9609_v46  ;;  %618 = vmatpush.msrb.mxu1 %v5702_v16  ;;  %v745_v16 = vand.u32 4294901760, %v744_v22  ;;  %v9613_v46 = vand.u32 4294901760, %v5799_v0  ;;  %v762_v58 = vsub.f32 %v6020_v35, %v761_v11  ;;  %v6069_v22 = vsub.f32 %v167_v10, %v6045_v13 }
  0x51   : > { %663 = vmatpush.msrb.mxu2 %v5934_v37  ;;  %9612 = vst [vmem:[#allocation29_spill] sm:$0xff] %v6055_v7  ;;  %740 = vmatpush.msrb.mxu3 %v739_v15  ;;  %v9614_v19 = vand.u32 4294901760, %v5811_v18  ;;  %v340_v0 = vsub.f32 %v6030_v1, %v6055_v7  ;;  %v773_v15 = vand.u32 4294901760, %v6058_v59  ;;  %v9616_v29 = vmov 0 }
  0x52   : > { %579 = vmatpush.msrb.mxu0 %v9611_v47  ;;  %620 = vmatpush.msrb.mxu1 %v5704_v17  ;;  %v751_v17 = vand.u32 4294901760, %v750_v30  ;;  %v9617_v29 = vsel %vm6080_vm1, 4294967295, %v9616_v29  ;;  %v9619_v18 = vand.u32 4294901760, %v5825_v43  ;;  %v768_v10 = vsub.f32 %v6043_v32, %v767_v62 }
  0x53   : > { %665 = vmatpush.msrb.mxu2 %v5951_v44  ;;  %746 = vmatpush.msrb.mxu3 %v745_v16  ;;  %9618 = vst [vmem:[#allocation30_spill] sm:$0xff] %v9617_v29  ;;  %v779_v30 = vand.u32 4294901760, %v6069_v22  ;;  %v5292_v43 = vsel %vm6080_vm1, 1.0, %v5609_v9  ;;  %v774_v47 = vsub.f32 %v6058_v59, %v773_v15  ;;  %v9622_v16 = vand.u32 4294901760, %v5852_v60 }
  0x54   : > { %583 = vmatpush.msrb.mxu0 %v9613_v46  ;;  %622 = vmatpush.msrb.mxu1 %v5717_v23  ;;  %v757_v23 = vand.u32 4294901760, %v756_v27  ;;  %v6110_v9 = vsub.f32 %v5292_v43, %v5292_v43  ;;  %v9624_v27 = vand.u32 4294901760, %v5859_v6  ;;  %v9626_v6 = vld [vmem:[#allocation26_spill] sm:$0xff] }
  0x55   : > { %667 = vmatpush.msrb.mxu2 %v5963_v52  ;;  %752 = vmatpush.msrb.mxu3 %v751_v17  ;;  %v780_v54 = vsub.f32 %v6069_v22, %v779_v30  ;;  %v9627_v17 = vld [vmem:[#allocation23_spill] sm:$0xff] }
  0x56   : > { %587 = vmatpush.msrb.mxu0 %v9614_v19  ;;  %624 = vmatpush.msrb.mxu1 %v5733_v31  ;;  %v763_v31 = vand.u32 4294901760, %v762_v58  ;;  %9623 = vst [vmem:[#allocation32_spill] sm:$0xff] %v6110_v9  ;;  %v6121_v46 = vand.u32 4294901760, %v6110_v9  ;;  %v9630_v19 = vand.u32 4294901760, %v9626_v6 }
  0x57   : > { %669 = vmatpush.msrb.mxu2 %v5975_v20  ;;  %758 = vmatpush.msrb.mxu3 %v757_v23  ;;  %v781_v60 = vand.u32 4294901760, %v780_v54  ;;  %v9631_v23 = vld [vmem:[#allocation25_spill] sm:$0xff] }
  0x58   : > { %591 = vmatpush.msrb.mxu0 %v9619_v18  ;;  %626 = vmatpush.msrb.mxu1 %v5737_v34  ;;  %v6098_v34 = vand.u32 4294901760, %v340_v0  ;;  %9625 = vst [vmem:[#allocation33_spill] sm:$0xff] %v6121_v46  ;;  %v681_v58 = vsub.f32 %v6110_v9, %v6121_v46  ;;  %v9632_v0 = vand.u32 4294901760, %v5882_v41 }
  0x59   : > { %671 = vmatpush.msrb.mxu2 %v5988_v33  ;;  %764 = vmatpush.msrb.mxu3 %v763_v31  ;;  %v9634_v31 = vand.u32 4294901760, %v5893_v48 }
  0x5a   : > { %595 = vmatpush.msrb.mxu0 %v9620_v4  ;;  %628 = vmatpush.msrb.mxu1 %v5755_v40  ;;  %9621 = vst [vmem:[#allocation31_spill] sm:$0xff] %v6098_v34  ;;  %v769_v40 = vand.u32 4294901760, %v768_v10  ;;  %v6144_v18 = vand.u32 4294901760, %v681_v58  ;;  %v263_v10 = vld [vmem:[#allocation5 + $0x500] sm:$0xff] }
  0x5b   : > { %673 = vmatpush.msrb.mxu2 %v6017_v25  ;;  %342 = vmatmul.f32.vlgmr.msra.gmra.mxu0 %v6098_v34  ;;  %v259_v4 = vld [vmem:[#allocation5 + $0x4e0] sm:$0xff]  ;;  %v120_v34 = vld [vmem:[#allocation5 + $0x88] sm:$0xff] }
  0x5c   : > { %599 = vmatpush.msrb.mxu0 %v9622_v16  ;;  %630 = vmatpush.msrb.mxu1 %v5774_v51  ;;  %v775_v51 = vand.u32 4294901760, %v774_v47  ;;  %9633 = vst [vmem:[#allocation26_spill] sm:$0xff] %v6144_v18 }
  0x5d   : > { %675 = vmatpush.msrb.mxu2 %v6032_v21  ;;  %770 = vmatpush.msrb.mxu3 %v769_v40  ;;  %v255_v40 = vld [vmem:[#allocation5 + $0x4c0] sm:$0xff] }
  0x5e   : > { %603 = vmatpush.msrb.mxu0 %v9624_v27  ;;  %632 = vmatpush.msrb.mxu1 %v5783_v56  ;;  %v9628_v56 = vand.u32 4294901760, %v5844_v61  ;;  %v6283_v27 = vand.u32 4294901760, %v259_v4 }
  0x5f   : > { %677 = vmatpush.msrb.mxu2 %v6045_v13  ;;  %776 = vmatpush.msrb.mxu3 %v775_v51 }
  0x60   : > { %790 = vmatpush.msra.mxu0 %v5844_v61  ;;  %634 = vmatpush.msrb.mxu1 %v5796_v63  ;;  %v9629_v63 = vld [vmem:[#allocation24_spill] sm:$0xff]  ;;  %v9430_v61 = vmov 1.0  }
  0x61   : > { %497 = vmatmul.f32.vlgmr.msra.gmra.mxu2 %v6030_v1  ;;  %782 = vmatpush.msrb.mxu3 %v781_v60  ;;  %v251_v60 = vld [vmem:[#allocation5 + $0x4a0] sm:$0xff]  ;;  %v128_v1 = vld [vmem:[#allocation5 + $0xc8] sm:$0xff] }
  0x62   : > { %793 = vmatpush.msra.mxu0 %v9626_v6  ;;  %636 = vmatpush.msrb.mxu1 %v9627_v17 }
  0x63   : > { %884 = vmatpush.msra.mxu2 %v9628_v56  ;;  %536 = vmatmul.f32.vlgmr.msra.gmra.mxu3 %v6055_v7  ;;  %v6296_v56 = vand.u32 4294901760, %v255_v40  ;;  %v132_v7 = vld [vmem:[#allocation5 + $0xe8] sm:$0xff] }
  0x64   : > { %796 = vmatpush.msra.mxu0 %v5882_v41  ;;  %638 = vmatpush.msrb.mxu1 %v9629_v63  ;;  %v9635_v41 = vand.u32 4294901760, %v5903_v42  ;;  %v6497_v26 = vand.u32 4294901760, %v132_v7 }
  0x65   : > { %888 = vmatpush.msra.mxu2 %v9630_v19  ;;  %951 = vmatpush.msra.mxu3 %v5818_v36  ;;  %v247_v19 = vld [vmem:[#allocation5 + $0x480] sm:$0xff] }
  0x66   : > { %799 = vmatpush.msra.mxu0 %v5893_v48  ;;  %640 = vmatpush.msrb.mxu1 %v9631_v23  ;;  %v6307_v23 = vand.u32 4294901760, %v251_v60 }
  0x67   : > { %5293 = vmatmul.msk.f32.vlgmr.msra.gmra.mxu1 %vm5992_vm0, %v9430_v61  ;;  %892 = vmatpush.msra.mxu2 %v9632_v0 }
  0x68   : > { %802 = vmatpush.msra.mxu0 %v5903_v42  ;;  %843 = vmatpush.msra.mxu1 %v5818_v36  ;;  %v9636_v36 = vand.u32 4294901760, %v5925_v3  ;;  %v283_v42 = vld [vmem:[#allocation5 + $0x5a0] sm:$0xff] }
  0x69   : > { %953 = vmatpush.msra.mxu3 %v5831_v45  ;;  %896 = vmatpush.msra.mxu2 %v9634_v31  ;;  %v6311_v31 = vsub.f32 %v259_v4, %v6283_v27 }
  0x6a   : > { %805 = vmatpush.msra.mxu0 %v5925_v3  ;;  %845 = vmatpush.msra.mxu1 %v5831_v45  ;;  %v9638_v3 = vand.u32 4294901760, %v5944_v39  ;;  %v9639_v45 = vand.u32 4294901760, %v5960_v49 }
  0x6b   : > { %955 = vmatpush.msra.mxu3 %v5854_v14  ;;  %683 = vmatmul.f32.vlgmr.msrb.gmra.mxu2 %v6144_v18 }
  0x6c   : > { %808 = vmatpush.msra.mxu0 %v5932_v5  ;;  %847 = vmatpush.msra.mxu1 %v5854_v14  ;;  %v9637_v14 = vand.u32 4294901760, %v5932_v5 }
  0x6d   : > { %900 = vmatpush.msra.mxu2 %v9635_v41  ;;  %957 = vmatpush.msra.mxu3 %v5869_v57 }
  0x6e   : > { %5294 = vmatmul.msk.f32.vlgmr.msrb.gmra.mxu0 %vm5992_vm0, %v9430_v61  ;;  %5296 = vmatmul.msk.f32.vlgmr.msrb.gmra.mxu3 %vm6080_vm1, %v9430_v61 }
  0x6f   : > { %811 = vmatpush.msra.mxu0 %v5944_v39  ;;  %849 = vmatpush.msra.mxu1 %v5869_v57  ;;  %v291_v57 = vld [vmem:[#allocation5 + $0x5e0] sm:$0xff] }
  0x70   : > { %904 = vmatpush.msra.mxu2 %v9636_v36  ;;  %959 = vmatpush.msra.mxu3 %v5874_v24  ;;  %v6193_v48 = vand.u32 4294901760, %v291_v57  ;;  %v279_v39 = vld [vmem:[#allocation5 + $0x580] sm:$0xff] }
  0x71   : > { %5295 = vmatmul.msk.f32.vlgmr.msrb.gmra.mxu1 %vm5992_vm0, %v9430_v61  ;;  %814 = vmatpush.msra.mxu0 %v5960_v49  ;;  %v243_v36 = vld [vmem:[#allocation5 + $0x460] sm:$0xff] }
  0x72   : > { %851 = vmatpush.msra.mxu1 %v5874_v24  ;;  %908 = vmatpush.msra.mxu2 %v9637_v14  ;;  %v9640_v24 = vand.u32 4294901760, %v5973_v53 }
  0x73   : > { %961 = vmatpush.msra.mxu3 %v5895_v12  ;;  %817 = vmatpush.msra.mxu0 %v5973_v53  ;;  %v275_v53 = vld [vmem:[#allocation5 + $0x560] sm:$0xff] }
  0x74   : > { %853 = vmatpush.msra.mxu1 %v5895_v12  ;;  %912 = vmatpush.msra.mxu2 %v9638_v3  ;;  %v287_v12 = vld [vmem:[#allocation5 + $0x5c0] sm:$0xff]  ;;  %v6319_v3 = vand.u32 4294901760, %v247_v19 }
  0x75   : > { %963 = vmatpush.msra.mxu3 %v5905_v8  ;;  %820 = vmatpush.msra.mxu0 %v5986_v55  ;;  %v6200_v5 = vand.u32 4294901760, %v287_v12 }
  0x76   : > { %855 = vmatpush.msra.mxu1 %v5905_v8  ;;  %916 = vmatpush.msra.mxu2 %v9639_v45  ;;  %v9641_v8 = vand.u32 4294901760, %v5986_v55  ;;  %v271_v55 = vld [vmem:[#allocation5 + $0x540] sm:$0xff]  ;;  %v6323_v45 = vsub.f32 %v255_v40, %v6296_v56 }
  0x77   : > { %965 = vmatpush.msra.mxu3 %v5920_v50  ;;  %823 = vmatpush.msra.mxu0 %v6005_v28  ;;  %v6220_v49 = vsub.f32 %v287_v12, %v6200_v5  ;;  %v6224_v28 = vand.u32 4294901760, %v275_v53  ;;  %v235_v40 = vld [vmem:[#allocation5 + $0x420] sm:$0xff] }
  0x78   : > { %857 = vmatpush.msra.mxu1 %v5920_v50  ;;  %920 = vmatpush.msra.mxu2 %v9640_v24  ;;  %v6204_v50 = vand.u32 4294901760, %v283_v42  ;;  %v239_v24 = vld [vmem:[#allocation5 + $0x440] sm:$0xff] }
  0x79   : > { %967 = vmatpush.msra.mxu3 %v5934_v37  ;;  %826 = vmatpush.msra.mxu0 %v6020_v35  ;;  %v6235_v35 = vand.u32 4294901760, %v271_v55  ;;  %v6346_v4 = vand.u32 4294901760, %v239_v24 }
  0x7a   : > { %859 = vmatpush.msra.mxu1 %v5934_v37  ;;  %924 = vmatpush.msra.mxu2 %v9641_v8  ;;  %v6210_v37 = vsub.f32 %v291_v57, %v6193_v48 }
  0x7b   : > { %969 = vmatpush.msra.mxu3 %v5951_v44  ;;  %829 = vmatpush.msra.mxu0 %v6043_v32 }
  0x7c   : > { %861 = vmatpush.msra.mxu1 %v5951_v44  ;;  %928 = vmatpush.msra.mxu2 %v755_v38  ;;  %v6217_v44 = vand.u32 4294901760, %v279_v39  ;;  %v6227_v38 = vsub.f32 %v283_v42, %v6204_v50  ;;  %v9642_v42 = vld [vmem:[#allocation22_spill] sm:$0xff] }
  0x7d   : > { %971 = vmatpush.msra.mxu3 %v5963_v52  ;;  %832 = vmatpush.msra.mxu0 %v6058_v59  ;;  %v6328_v8 = vand.u32 4294901760, %v9642_v42 }
  0x7e   : > { %863 = vmatpush.msra.mxu1 %v5963_v52  ;;  %932 = vmatpush.msra.mxu2 %v761_v11  ;;  %v9444_v52 = vand.u32 4294901760, %v6210_v37  ;;  %v267_v11 = vld [vmem:[#allocation5 + $0x520] sm:$0xff]  ;;  %v6242_v32 = vsub.f32 %v279_v39, %v6217_v44 }
  0x7f   : > { %973 = vmatpush.msra.mxu3 %v5975_v20  ;;  %835 = vmatpush.msra.mxu0 %v6069_v22  ;;  %9643 = vst [vmem:[#allocation23_spill] sm:$0xff] %v6328_v8 }
  0x80   : > { %865 = vmatpush.msra.mxu1 %v5975_v20  ;;  %936 = vmatpush.msra.mxu2 %v767_v62  ;;  %v9442_v20 = vand.u32 4294901760, %v6220_v49  ;;  %v9441_v62 = vand.u32 4294901760, %v6227_v38  ;;  %v1031_v59 = vsub.f32 %v6210_v37, %v9444_v52  ;;  %v9440_v43 = vand.u32 4294901760, %v6242_v32 }
  0x81   : > { %975 = vmatpush.msra.mxu3 %v5988_v33  ;;  %838 = vmatmul.f32.vlgmr.msra.gmra.mxu0 %v6110_v9  ;;  %v136_v9 = vld [vmem:[#allocation5 + $0x108] sm:$0xff] }
  0x82   : > { %867 = vmatpush.msra.mxu1 %v5988_v33  ;;  %988 = vmatpush.msrb.mxu0 %v6193_v48  ;;  %v6248_v33 = vsub.f32 %v275_v53, %v6224_v28  ;;  %v1037_v22 = vsub.f32 %v6220_v49, %v9442_v20  ;;  %v1043_v47 = vsub.f32 %v6227_v38, %v9441_v62  ;;  %v1032_v54 = vand.u32 4294901760, %v1031_v59  ;;  %v148_v20 = vld [vmem:[#allocation5 + $0x168] sm:$0xff] }
  0x83   : > { %940 = vmatpush.msra.mxu2 %v773_v15  ;;  %977 = vmatpush.msra.mxu3 %v6017_v25  ;;  %v6256_v15 = vand.u32 4294901760, %v267_v11  ;;  %v1049_v17 = vsub.f32 %v6242_v32, %v9440_v43  ;;  %v6334_v53 = vand.u32 4294901760, %v243_v36  ;;  %v6437_v2 = vand.u32 4294901760, %v148_v20 }
  0x84   : > { %869 = vmatpush.msra.mxu1 %v6017_v25  ;;  %990 = vmatpush.msrb.mxu0 %v6200_v5  ;;  %v6263_v25 = vsub.f32 %v271_v55, %v6235_v35  ;;  %v9438_v16 = vand.u32 4294901760, %v6248_v33  ;;  %v1038_v6 = vand.u32 4294901760, %v1037_v22  ;;  %v1044_v58 = vand.u32 4294901760, %v1043_v47 }
  0x85   : > { %944 = vmatpush.msra.mxu2 %v779_v30  ;;  %979 = vmatpush.msra.mxu3 %v6032_v21  ;;  %v6270_v30 = vand.u32 4294901760, %v263_v10  ;;  %v1050_v14 = vand.u32 4294901760, %v1049_v17  ;;  %v9433_v55 = vand.u32 4294901760, %v6311_v31  ;;  %v9432_v22 = vand.u32 4294901760, %v6323_v45 }
  0x86   : > { %5297 = vmatmul.msk.f32.vlgmr.msra.gmra.mxu2 %vm6080_vm1, %v9430_v61  ;;  %992 = vmatpush.msrb.mxu0 %v6204_v50  ;;  %v9437_v51 = vand.u32 4294901760, %v6263_v25  ;;  %v6350_v47 = vsub.f32 %v247_v19, %v6319_v3  ;;  %v6368_v19 = vand.u32 4294901760, %v235_v40 }
  0x87   : > { %1131 = vmatpush.msrb.mxu2 %v6210_v37  ;;  %871 = vmatpush.msra.mxu1 %v6032_v21  ;;  %v6286_v21 = vsub.f32 %v267_v11, %v6256_v15  ;;  %v6299_v63 = vsub.f32 %v263_v10, %v6270_v30  ;;  %v6338_v11 = vsub.f32 %v251_v60, %v6307_v23 }
  0x88   : > { %981 = vmatpush.msra.mxu3 %v6045_v13  ;;  %994 = vmatpush.msrb.mxu0 %v6217_v44  ;;  %v1061_v41 = vsub.f32 %v6263_v25, %v9437_v51 }
  0x89   : > { %5298 = vmatmul.msk.f32.vlgmr.msra.gmra.mxu3 %vm6080_vm1, %v9430_v61  ;;  %1134 = vmatpush.msrb.mxu2 %v6220_v49  ;;  %v9435_v0 = vand.u32 4294901760, %v6286_v21  ;;  %v9434_v57 = vand.u32 4294901760, %v6299_v63  ;;  %v9436_v17 = vand.u32 4294901760, %v6338_v11  ;;  %v160_v61 = vld [vmem:[#allocation5 + $0x1c8] sm:$0xff] }
  0x8a   : > { %1184 = vmatpush.msrb.mxu3 %v6193_v48  ;;  %873 = vmatpush.msra.mxu1 %v6045_v13  ;;  %v1055_v13 = vsub.f32 %v6248_v33, %v9438_v16  ;;  %v1062_v10 = vand.u32 4294901760, %v1061_v41  ;;  %v231_v41 = vld [vmem:[#allocation5 + $0x400] sm:$0xff]  ;;  %v6402_v51 = vand.u32 4294901760, %v160_v61  ;;  %v152_v16 = vld [vmem:[#allocation5 + $0x188] sm:$0xff] }
  0x8b   : > { %996 = vmatpush.msrb.mxu0 %v6224_v28  ;;  %877 = vmatmul.f32.vlgmr.msra.gmra.mxu1 %v6121_v46  ;;  %v1067_v39 = vsub.f32 %v6286_v21, %v9435_v0  ;;  %v1073_v59 = vsub.f32 %v6299_v63, %v9434_v57  ;;  %v6395_v57 = vsub.f32 %v235_v40, %v6368_v19  ;;  %v156_v0 = vld [vmem:[#allocation5 + $0x1a8] sm:$0xff] }
  0x8c   : > { %1137 = vmatpush.msrb.mxu2 %v6227_v38  ;;  %1033 = vmatpush.msrb.mxu1 %v1032_v54  ;;  %v1056_v12 = vand.u32 4294901760, %v1055_v13  ;;  %v6356_v54 = vsub.f32 %v9642_v42, %v6328_v8  ;;  %v164_v13 = vld [vmem:[#allocation5 + $0x1e8] sm:$0xff]  ;;  %v9439_v42 = vand.u32 4294901760, %v6350_v47  ;;  %v6418_v62 = vand.u32 4294901760, %v156_v0 }
  0x8d   : > { %1186 = vmatpush.msrb.mxu3 %v6200_v5  ;;  %998 = vmatpush.msrb.mxu0 %v6235_v35  ;;  %v1068_v60 = vand.u32 4294901760, %v1067_v39 }
  0x8e   : > { %1140 = vmatpush.msrb.mxu2 %v6242_v32  ;;  %1039 = vmatpush.msrb.mxu1 %v1038_v6  ;;  %9644 = vst [vmem:[#allocation24_spill] sm:$0xff] %v6356_v54  ;;  %v1079_v6 = vsub.f32 %v6311_v31, %v9433_v55  ;;  %v6381_v39 = vand.u32 4294901760, %v6356_v54 }
  0x8f   : > { %1188 = vmatpush.msrb.mxu3 %v6204_v50  ;;  %1000 = vmatpush.msrb.mxu0 %v6256_v15 }
  0x90   : > { %1143 = vmatpush.msrb.mxu2 %v6248_v33  ;;  %1045 = vmatpush.msrb.mxu1 %v1044_v58  ;;  %v6364_v58 = vsub.f32 %v243_v36, %v6334_v53  ;;  %v6376_v36 = vsub.f32 %v239_v24, %v6346_v4  ;;  %9645 = vst [vmem:[#allocation25_spill] sm:$0xff] %v6381_v39  ;;  %v6389_v24 = vand.u32 4294901760, %v231_v41 }
  0x91   : > { %1190 = vmatpush.msrb.mxu3 %v6217_v44  ;;  %1002 = vmatpush.msrb.mxu0 %v6270_v30  ;;  %v1022_v40 = vsub.f32 %v6356_v54, %v6381_v39 }
  0x92   : > { %1146 = vmatpush.msrb.mxu2 %v6263_v25  ;;  %1051 = vmatpush.msrb.mxu1 %v1050_v14  ;;  %v1074_v14 = vand.u32 4294901760, %v1073_v59  ;;  %v1080_v59 = vand.u32 4294901760, %v1079_v6  ;;  %v9443_v55 = vand.u32 4294901760, %v6364_v58  ;;  %v1097_v6 = vsub.f32 %v6350_v47, %v9439_v42 }
  0x93   : > { %1192 = vmatpush.msrb.mxu3 %v6224_v28  ;;  %1004 = vmatpush.msrb.mxu0 %v6283_v27  ;;  %v6416_v43 = vsub.f32 %v231_v41, %v6389_v24  ;;  %v6434_v52 = vand.u32 4294901760, %v1022_v40  ;;  %v9647_v40 = vand.u32 4294901760, %v6395_v57 }
  0x94   : > { %1149 = vmatpush.msrb.mxu2 %v6286_v21  ;;  %1057 = vmatpush.msrb.mxu1 %v1056_v12  ;;  %v1085_v12 = vsub.f32 %v6323_v45, %v9432_v22  ;;  %v1091_v22 = vsub.f32 %v6338_v11, %v9436_v17  ;;  %v9445_v17 = vand.u32 4294901760, %v6376_v36  ;;  %v1103_v42 = vsub.f32 %v6364_v58, %v9443_v55 }
  0x95   : > { %1194 = vmatpush.msrb.mxu3 %v6235_v35  ;;  %1006 = vmatpush.msrb.mxu0 %v6296_v56  ;;  %v6430_v55 = vsub.f32 %v160_v61, %v6402_v51  ;;  %9646 = vst [vmem:[#allocation22_spill] sm:$0xff] %v6434_v52  ;;  %v6442_v61 = vsub.f32 %v156_v0, %v6418_v62 }
  0x96   : > { %1152 = vmatpush.msrb.mxu2 %v6299_v63  ;;  %1063 = vmatpush.msrb.mxu1 %v1062_v10  ;;  %v6383_v10 = vand.u32 4294901760, %v164_v13  ;;  %v1109_v41 = vsub.f32 %v6376_v36, %v9445_v17 }
  0x97   : > { %1196 = vmatpush.msrb.mxu3 %v6256_v15  ;;  %1008 = vmatpush.msrb.mxu0 %v6307_v23 }
  0x98   : > { %1155 = vmatpush.msrb.mxu2 %v6311_v31  ;;  %1069 = vmatpush.msrb.mxu1 %v1068_v60  ;;  %v1086_v60 = vand.u32 4294901760, %v1085_v12  ;;  %v1092_v12 = vand.u32 4294901760, %v1091_v22  ;;  %v1098_v22 = vand.u32 4294901760, %v1097_v6  ;;  %v1104_v6 = vand.u32 4294901760, %v1103_v42 }
  0x99   : > { %1198 = vmatpush.msrb.mxu3 %v6270_v30  ;;  %1010 = vmatpush.msrb.mxu0 %v6319_v3  ;;  %v1110_v42 = vand.u32 4294901760, %v1109_v41  ;;  %v9650_v41 = vand.u32 4294901760, %v6416_v43 }
  0x9a   : > { %1158 = vmatpush.msrb.mxu2 %v6323_v45  ;;  %1075 = vmatpush.msrb.mxu1 %v1074_v14  ;;  %v6409_v14 = vsub.f32 %v164_v13, %v6383_v10  ;;  %v1115_v13 = vsub.f32 %v6395_v57, %v9647_v40 }
  0x9b   : > { %1200 = vmatpush.msrb.mxu3 %v6283_v27  ;;  %1012 = vmatpush.msrb.mxu0 %v6334_v53  ;;  %v1121_v17 = vsub.f32 %v6416_v43, %v9650_v41 }
  0x9c   : > { %1161 = vmatpush.msrb.mxu2 %v6338_v11  ;;  %1081 = vmatpush.msrb.mxu1 %v1080_v59  ;;  %v6423_v59 = vand.u32 4294901760, %v152_v16  ;;  %v9648_v46 = vand.u32 4294901760, %v6409_v14 }
  0x9d   : > { %1202 = vmatpush.msrb.mxu3 %v6296_v56  ;;  %1014 = vmatpush.msrb.mxu0 %v6346_v4 }
  0x9e   : > { %1164 = vmatpush.msrb.mxu2 %v6350_v47  ;;  %1087 = vmatpush.msrb.mxu1 %v1086_v60  ;;  %v144_v60 = vld [vmem:[#allocation5 + $0x148] sm:$0xff]  ;;  %v6450_v29 = vsub.f32 %v152_v16, %v6423_v59  ;;  %v1372_v40 = vsub.f32 %v6409_v14, %v9648_v46  ;;  %v6462_v16 = vsub.f32 %v148_v20, %v6437_v2  ;;  %v1116_v46 = vand.u32 4294901760, %v1115_v13 }
  0x9f   : > { %1204 = vmatpush.msrb.mxu3 %v6307_v23  ;;  %1016 = vmatpush.msrb.mxu0 %v6368_v19  ;;  %v6454_v0 = vand.u32 4294901760, %v144_v60 }
  0xa0   : > { %1167 = vmatpush.msrb.mxu2 %v6364_v58  ;;  %1093 = vmatpush.msrb.mxu1 %v1092_v12  ;;  %v140_v12 = vld [vmem:[#allocation5 + $0x128] sm:$0xff]  ;;  %v1373_v13 = vand.u32 4294901760, %v1372_v40  ;;  %v9655_v40 = vand.u32 4294901760, %v6450_v29 }
  0xa1   : > { %1206 = vmatpush.msrb.mxu3 %v6319_v3  ;;  %1018 = vmatpush.msrb.mxu0 %v6389_v24  ;;  %v6470_v18 = vand.u32 4294901760, %v140_v12  ;;  %v6481_v41 = vsub.f32 %v144_v60, %v6454_v0 }
  0xa2   : > { %1170 = vmatpush.msrb.mxu2 %v6376_v36  ;;  %1099 = vmatpush.msrb.mxu1 %v1098_v22  ;;  %v9649_v22 = vand.u32 4294901760, %v6210_v37  ;;  %v9651_v37 = vand.u32 4294901760, %v6220_v49  ;;  %v9653_v49 = vand.u32 4294901760, %v6227_v38  ;;  %v1390_v38 = vsub.f32 %v6450_v29, %v9655_v40 }
  0xa3   : > { %1208 = vmatpush.msrb.mxu3 %v6334_v53  ;;  %1024 = vmatmul.f32.vlgmr.msrb.gmra.mxu0 %v6434_v52  ;;  %v6483_v52 = vand.u32 4294901760, %v136_v9 }
  0xa4   : > { %1173 = vmatpush.msrb.mxu2 %v6395_v57  ;;  %1225 = vmatpush.msra.mxu0 %v9649_v22 }
  0xa5   : > { %1105 = vmatpush.msrb.mxu1 %v1104_v6  ;;  %1210 = vmatpush.msrb.mxu3 %v6346_v4  ;;  %v9652_v6 = vand.u32 4294901760, %v6430_v55 }
  0xa6   : > { %1176 = vmatpush.msrb.mxu2 %v6416_v43  ;;  %1229 = vmatpush.msra.mxu0 %v9651_v37  ;;  %v9654_v37 = vand.u32 4294901760, %v6442_v61 }
  0xa7   : > { %1111 = vmatpush.msrb.mxu1 %v1110_v42  ;;  %v1378_v22 = vsub.f32 %v6430_v55, %v9652_v6  ;;  %1212 = vmatpush.msrb.mxu3 %v6368_v19  ;;  %v1122_v42 = vand.u32 4294901760, %v1121_v17  ;;  %v6495_v6 = vsub.f32 %v140_v12, %v6470_v18  ;;  %v9656_v17 = vand.u32 4294901760, %v6242_v32 }
  0xa8   : > { %1179 = vmatmul.f32.vlgmr.msrb.gmra.mxu2 %v6356_v54  ;;  %1233 = vmatpush.msra.mxu0 %v9653_v49  ;;  %v1384_v60 = vsub.f32 %v6442_v61, %v9654_v37  ;;  %v124_v49 = vld [vmem:[#allocation5 + $0xa8] sm:$0xff]  ;;  %v6508_v12 = vsub.f32 %v136_v9, %v6483_v52  ;;  %v6510_v54 = vand.u32 4294901760, %v128_v1  ;;  %v9658_v32 = vand.u32 4294901760, %v6248_v33 }
  0xa9   : > { %1329 = vmatpush.msra.mxu2 %v6383_v10  ;;  %1117 = vmatpush.msrb.mxu1 %v1116_v46  ;;  %v1379_v20 = vand.u32 4294901760, %v1378_v22  ;;  %v9657_v46 = vand.u32 4294901760, %v6462_v16  ;;  %v6520_v9 = vsub.f32 %v132_v7, %v6497_v26  ;;  %v6522_v37 = vand.u32 4294901760, %v124_v49 }
  0xaa   : > { %1214 = vmatpush.msrb.mxu3 %v6389_v24  ;;  %1237 = vmatpush.msra.mxu0 %v9656_v17  ;;  %v1385_v22 = vand.u32 4294901760, %v1384_v60  ;;  %v9468_v17 = vand.u32 4294901760, %v6495_v6  ;;  %v9659_v33 = vand.u32 4294901760, %v6481_v41  ;;  %v6532_v7 = vsub.f32 %v128_v1, %v6510_v54  ;;  %v112_v60 = vld [vmem:[#allocation5 + $0x48] sm:$0xff] }
  0xab   : > { %1218 = vmatmul.f32.vlgmr.msrb.gmra.mxu3 %v6381_v39  ;;  %1331 = vmatpush.msra.mxu2 %v6402_v51  ;;  %v1396_v40 = vsub.f32 %v6462_v16, %v9657_v46  ;;  %v116_v39 = vld [vmem:[#allocation5 + $0x68] sm:$0xff]  ;;  %v6534_v46 = vand.u32 4294901760, %v120_v34  ;;  %v6545_v1 = vsub.f32 %v124_v49, %v6522_v37 }
  0xac   : > { %1374 = vmatpush.msra.mxu3 %v1373_v13  ;;  %1123 = vmatpush.msrb.mxu1 %v1122_v42  ;;  %v1391_v13 = vand.u32 4294901760, %v1390_v38  ;;  %v1402_v42 = vsub.f32 %v6481_v41, %v9659_v33  ;;  %v6547_v33 = vand.u32 4294901760, %v116_v39 }
  0xad   : > { %1241 = vmatpush.msra.mxu0 %v9658_v32  ;;  %1125 = vmatmul.f32.vlgmr.msrb.gmra.mxu1 %v6328_v8  ;;  %v9660_v32 = vand.u32 4294901760, %v6263_v25  ;;  %v1397_v38 = vand.u32 4294901760, %v1396_v40  ;;  %v9661_v25 = vand.u32 4294901760, %v6286_v21  ;;  %v9662_v40 = vand.u32 4294901760, %v6508_v12 }
  0xae   : > { %1333 = vmatpush.msra.mxu2 %v6418_v62  ;;  %1292 = vmatpush.msra.mxu1 %v6193_v48  ;;  %v1408_v48 = vsub.f32 %v6495_v6, %v9468_v17  ;;  %v6558_v49 = vsub.f32 %v120_v34, %v6534_v46  ;;  %v108_v17 = vld [vmem:[#allocation5 + $0x28] sm:$0xff]  ;;  %v6563_v21 = vand.u32 4294901760, %v112_v60  ;;  %v6571_v34 = vsub.f32 %v116_v39, %v6547_v33 }
  0xaf   : > { %1380 = vmatpush.msra.mxu3 %v1379_v20  ;;  %1245 = vmatpush.msra.mxu0 %v9660_v32  ;;  %v1425_v32 = vand.u32 4294901760, %v6532_v7  ;;  %v9663_v20 = vand.u32 4294901760, %v6299_v63  ;;  %v9665_v63 = vand.u32 4294901760, %v6311_v31  ;;  %v9666_v39 = vand.u32 4294901760, %v6323_v45 }
  0xb0   : > { %1335 = vmatpush.msra.mxu2 %v6423_v59  ;;  %1294 = vmatpush.msra.mxu1 %v6200_v5  ;;  %v1403_v5 = vand.u32 4294901760, %v1402_v42  ;;  %v6587_v31 = vsub.f32 %v112_v60, %v6563_v21  ;;  %v9667_v45 = vand.u32 4294901760, %v6338_v11 }
  0xb1   : > { %1386 = vmatpush.msra.mxu3 %v1385_v22  ;;  %1249 = vmatpush.msra.mxu0 %v9661_v25  ;;  %v1414_v22 = vsub.f32 %v6508_v12, %v9662_v40  ;;  %v1431_v25 = vand.u32 4294901760, %v6545_v1  ;;  %v104_v40 = vld [vmem:[#allocation5 + $0x8] sm:$0xff] }
  0xb2   : > { %1337 = vmatpush.msra.mxu2 %v6437_v2  ;;  %1296 = vmatpush.msra.mxu1 %v6204_v50  ;;  %v1409_v50 = vand.u32 4294901760, %v1408_v48  ;;  %v1437_v48 = vand.u32 4294901760, %v6558_v49  ;;  %v1449_v11 = vand.u32 4294901760, %v6587_v31 }
  0xb3   : > { %1392 = vmatpush.msra.mxu3 %v1391_v13  ;;  %1253 = vmatpush.msra.mxu0 %v9663_v20  ;;  %v9664_v13 = vand.u32 4294901760, %v6520_v9  ;;  %v6576_v20 = vand.u32 4294901760, %v108_v17 }
  0xb4   : > { %1339 = vmatpush.msra.mxu2 %v6454_v0  ;;  %1298 = vmatpush.msra.mxu1 %v6217_v44  ;;  %v1415_v44 = vand.u32 4294901760, %v1414_v22  ;;  %v1443_v22 = vand.u32 4294901760, %v6571_v34 }
  0xb5   : > { %1398 = vmatpush.msra.mxu3 %v1397_v38  ;;  %v1420_v42 = vsub.f32 %v6520_v9, %v9664_v13  ;;  %1257 = vmatpush.msra.mxu0 %v9665_v63  ;;  %v1426_v38 = vsub.f32 %v6532_v7, %v1425_v32  ;;  %v6589_v13 = vand.u32 4294901760, %v104_v40  ;;  %v6600_v60 = vsub.f32 %v108_v17, %v6576_v20 }
  0xb6   : > { %1341 = vmatpush.msra.mxu2 %v6470_v18  ;;  %1300 = vmatpush.msra.mxu1 %v6224_v28  ;;  %v1444_v17 = vsub.f32 %v6571_v34, %v1443_v22 }
  0xb7   : > { %1404 = vmatpush.msra.mxu3 %v1403_v5  ;;  %1261 = vmatpush.msra.mxu0 %v9666_v39  ;;  %v1421_v28 = vand.u32 4294901760, %v1420_v42  ;;  %v1432_v5 = vsub.f32 %v6545_v1, %v1431_v25  ;;  %v9668_v42 = vand.u32 4294901760, %v6350_v47  ;;  %v6611_v63 = vsub.f32 %v104_v40, %v6589_v13 }
  0xb8   : > { %1343 = vmatpush.msra.mxu2 %v6483_v52  ;;  %1302 = vmatpush.msra.mxu1 %v6235_v35  ;;  %v1427_v35 = vand.u32 4294901760, %v1426_v38  ;;  %v1455_v47 = vand.u32 4294901760, %v6600_v60  ;;  %v9670_v38 = vand.u32 4294901760, %v6376_v36  ;;  %v1445_v39 = vand.u32 4294901760, %v1444_v17  ;;  %v9682_v17 = vld [vmem:[#allocation31_spill] sm:$0xff] }
  0xb9   : > { %1410 = vmatpush.msra.mxu3 %v1409_v50  ;;  %1265 = vmatpush.msra.mxu0 %v9667_v45  ;;  %v1438_v50 = vsub.f32 %v6558_v49, %v1437_v48  ;;  %v9672_v36 = vand.u32 4294901760, %v6416_v43 }
  0xba   : > { %1345 = vmatpush.msra.mxu2 %v6497_v26  ;;  %1304 = vmatpush.msra.mxu1 %v6256_v15  ;;  %v1433_v15 = vand.u32 4294901760, %v1432_v5 }
  0xbb   : > { %1416 = vmatpush.msra.mxu3 %v1415_v44  ;;  %1269 = vmatpush.msra.mxu0 %v9668_v42  ;;  %v9669_v44 = vand.u32 4294901760, %v6364_v58  ;;  %v1439_v40 = vand.u32 4294901760, %v1438_v50  ;;  %v1461_v58 = vand.u32 4294901760, %v6611_v63 }
  0xbc   : > { %1347 = vmatpush.msra.mxu2 %v6510_v54  ;;  %1306 = vmatpush.msra.mxu1 %v6270_v30  ;;  %v1450_v30 = vsub.f32 %v6587_v31, %v1449_v11 }
  0xbd   : > { %1422 = vmatpush.msra.mxu3 %v1421_v28  ;;  %1273 = vmatpush.msra.mxu0 %v9669_v44  ;;  %v9671_v28 = vand.u32 4294901760, %v6395_v57  ;;  %v1462_v57 = vsub.f32 %v6611_v63, %v1461_v58 }
  0xbe   : > { %1349 = vmatpush.msra.mxu2 %v6522_v37  ;;  %1308 = vmatpush.msra.mxu1 %v6283_v27  ;;  %v1456_v27 = vsub.f32 %v6600_v60, %v1455_v47 }
  0xbf   : > { %1428 = vmatpush.msra.mxu3 %v1427_v35  ;;  %1277 = vmatpush.msra.mxu0 %v9670_v38  ;;  %v1463_v43 = vand.u32 4294901760, %v1462_v57 }
  0xc0   : > { %1351 = vmatpush.msra.mxu2 %v6534_v46  ;;  %1310 = vmatpush.msra.mxu1 %v6296_v56  ;;  %v1451_v56 = vand.u32 4294901760, %v1450_v30  ;;  %v1457_v5 = vand.u32 4294901760, %v1456_v27 }
  0xc1   : > { %1434 = vmatpush.msra.mxu3 %v1433_v15  ;;  %1281 = vmatpush.msra.mxu0 %v9671_v28 }
  0xc2   : > { %1353 = vmatpush.msra.mxu2 %v6547_v33  ;;  %1312 = vmatpush.msra.mxu1 %v6307_v23  ;;  %v9673_v23 = vand.u32 4294901760, %v6409_v14 }
  0xc3   : > { %1440 = vmatpush.msra.mxu3 %v1439_v40  ;;  %1285 = vmatpush.msra.mxu0 %v9672_v36 }
  0xc4   : > { %1355 = vmatpush.msra.mxu2 %v6563_v21  ;;  %1314 = vmatpush.msra.mxu1 %v6319_v3  ;;  %v9674_v3 = vand.u32 4294901760, %v6430_v55 }
  0xc5   : > { %1446 = vmatpush.msra.mxu3 %v1445_v39  ;;  %1287 = vmatmul.f32.vlgmr.msra.gmra.mxu0 %v6328_v8 }
  0xc6   : > { %1357 = vmatpush.msra.mxu2 %v6576_v20  ;;  %1472 = vmatpush.msrb.mxu0 %v6409_v14  ;;  %v295_v14 = vld [vmem:[#allocation7] sm:$0xf] }
  0xc7   : > { %1316 = vmatpush.msra.mxu1 %v6334_v53  ;;  %1452 = vmatpush.msra.mxu3 %v1451_v56  ;;  %v9675_v53 = vand.u32 4294901760, %v6442_v61 }
  0xc8   : > { %1359 = vmatpush.msra.mxu2 %v6589_v13  ;;  %1475 = vmatpush.msrb.mxu0 %v6430_v55  ;;  %v9676_v55 = vand.u32 4294901760, %v6450_v29 }
  0xc9   : > { %1318 = vmatpush.msra.mxu1 %v6346_v4  ;;  %1458 = vmatpush.msra.mxu3 %v1457_v5  ;;  %v9677_v4 = vand.u32 4294901760, %v6462_v16 }
  0xca   : > { %1566 = vmatpush.msrb.mxu2 %v9673_v23  ;;  %1478 = vmatpush.msrb.mxu0 %v6442_v61  ;;  %v220_v61 = vld [vmem:[#allocation5 + $0x3a8] sm:$0xff] }
  0xcb   : > { %1320 = vmatpush.msra.mxu1 %v6368_v19  ;;  %1464 = vmatpush.msra.mxu3 %v1463_v43  ;;  %v9678_v19 = vand.u32 4294901760, %v6481_v41 }
  0xcc   : > { %1570 = vmatpush.msrb.mxu2 %v9674_v3  ;;  %1481 = vmatpush.msrb.mxu0 %v6450_v29  ;;  %v9679_v29 = vand.u32 4294901760, %v6495_v6 }
  0xcd   : > { %1633 = vmatpush.msrb.mxu3 %v6383_v10  ;;  %1322 = vmatpush.msra.mxu1 %v6389_v24 }
  0xce   : > { %1574 = vmatpush.msrb.mxu2 %v9675_v53  ;;  %1324 = vmatmul.f32.vlgmr.msra.gmra.mxu1 %v6328_v8  ;;  %v188_v53 = vld [vmem:[#allocation5 + $0x2a8] sm:$0xff] }
  0xcf   : > { %1484 = vmatpush.msrb.mxu0 %v6462_v16  ;;  %1525 = vmatpush.msrb.mxu1 %v6383_v10  ;;  %v9681_v10 = vand.u32 4294901760, %v6520_v9 }
  0xd0   : > { %1635 = vmatpush.msrb.mxu3 %v6402_v51  ;;  %1578 = vmatpush.msrb.mxu2 %v9676_v55 }
  0xd1   : > { %1487 = vmatpush.msrb.mxu0 %v6481_v41  ;;  %1527 = vmatpush.msrb.mxu1 %v6402_v51  ;;  %v9680_v51 = vand.u32 4294901760, %v6508_v12  ;;  %v216_v41 = vld [vmem:[#allocation5 + $0x388] sm:$0xff] }
  0xd2   : > { %1637 = vmatpush.msrb.mxu3 %v6418_v62  ;;  %1582 = vmatpush.msrb.mxu2 %v9677_v4 }
  0xd3   : > { %1490 = vmatpush.msrb.mxu0 %v6495_v6  ;;  %1529 = vmatpush.msrb.mxu1 %v6418_v62  ;;  %v228_v62 = vld [vmem:[#allocation5 + $0x3e8] sm:$0xff] }
  0xd4   : > { %1639 = vmatpush.msrb.mxu3 %v6423_v59  ;;  %1586 = vmatpush.msrb.mxu2 %v9678_v19  ;;  %v6694_v24 = vand.u32 4294901760, %v228_v62 }
  0xd5   : > { %1493 = vmatpush.msrb.mxu0 %v6508_v12  ;;  %1531 = vmatpush.msrb.mxu1 %v6423_v59 }
  0xd6   : > { %1641 = vmatpush.msrb.mxu3 %v6437_v2  ;;  %1590 = vmatpush.msrb.mxu2 %v9679_v29 }
  0xd7   : > { %1496 = vmatpush.msrb.mxu0 %v6520_v9  ;;  %1533 = vmatpush.msrb.mxu1 %v6437_v2  ;;  %v224_v2 = vld [vmem:[#allocation5 + $0x3c8] sm:$0xff] }
  0xd8   : > { %1643 = vmatpush.msrb.mxu3 %v6454_v0  ;;  %1594 = vmatpush.msrb.mxu2 %v9680_v51  ;;  %v6703_v59 = vand.u32 4294901760, %v224_v2  ;;  %v343_v16 = vpop.f32.mrf.mxu0  ;;  %v212_v9 = vld [vmem:[#allocation5 + $0x368] sm:$0xff] }
  0xd9   : > { %1499 = vmatpush.msrb.mxu0 %v6532_v7  ;;  %1535 = vmatpush.msrb.mxu1 %v6454_v0  ;;  %v297_v0 = vperm.slane %v295_v14, 0  ;;  %v6729_v7 = vand.u32 4294901760, %v216_v41  ;;  %v184_v51 = vld [vmem:[#allocation5 + $0x288] sm:$0xff] }
  0xda   : > { %1645 = vmatpush.msrb.mxu3 %v6470_v18  ;;  %1598 = vmatpush.msrb.mxu2 %v9681_v10  ;;  %v6721_v6 = vsub.f32 %v224_v2, %v6703_v59  ;;  %v6812_v10 = vand.u32 4294901760, %v188_v53 }
  0xdb   : > { %1502 = vmatpush.msrb.mxu0 %v6545_v1  ;;  %1537 = vmatpush.msrb.mxu1 %v6470_v18  ;;  %v6709_v18 = vsub.f32 %v228_v62, %v6694_v24  ;;  %v344_v12 = vadd.f32 %v343_v16, %v297_v0 }
  0xdc   : > { %1647 = vmatpush.msrb.mxu3 %v6483_v52  ;;  %1602 = vmatpush.msrb.mxu2 %v1425_v32 }
  0xdd   : > { %1505 = vmatpush.msrb.mxu0 %v6558_v49  ;;  %1539 = vmatpush.msrb.mxu1 %v6483_v52  ;;  %v6716_v52 = vand.u32 4294901760, %v220_v61  ;;  %v208_v49 = vld [vmem:[#allocation5 + $0x348] sm:$0xff]  ;;  %v9690_v27 = vand.u32 4294901760, %v6709_v18 }
  0xde   : > { %1649 = vmatpush.msrb.mxu3 %v6497_v26  ;;  %1606 = vmatpush.msrb.mxu2 %v1431_v25 }
  0xdf   : > { %1508 = vmatpush.msrb.mxu0 %v6571_v34  ;;  %1541 = vmatpush.msrb.mxu1 %v6497_v26  ;;  %v9483_v26 = vand.u32 4294901760, %v6709_v18  ;;  %v6737_v1 = vsub.f32 %v220_v61, %v6716_v52  ;;  %v9481_v34 = vand.u32 4294901760, %v6721_v6 }
  0xe0   : > { %1651 = vmatpush.msrb.mxu3 %v6510_v54  ;;  %1610 = vmatpush.msrb.mxu2 %v1437_v48 }
  0xe1   : > { %1511 = vmatpush.msrb.mxu0 %v6587_v31  ;;  %1543 = vmatpush.msrb.mxu1 %v6510_v54  ;;  %v6734_v54 = vand.u32 4294901760, %v212_v9  ;;  %v1713_v48 = vsub.f32 %v6709_v18, %v9483_v26  ;;  %v204_v31 = vld [vmem:[#allocation5 + $0x328] sm:$0xff]  ;;  %v1719_v42 = vsub.f32 %v6721_v6, %v9481_v34 }
  0xe2   : > { %1653 = vmatpush.msrb.mxu3 %v6522_v37  ;;  %1614 = vmatpush.msrb.mxu2 %v1443_v22  ;;  %v6753_v22 = vsub.f32 %v216_v41, %v6729_v7  ;;  %v180_v41 = vld [vmem:[#allocation5 + $0x268] sm:$0xff] }
  0xe3   : > { %1514 = vmatpush.msrb.mxu0 %v6600_v60  ;;  %1545 = vmatpush.msrb.mxu1 %v6522_v37  ;;  %v9480_v60 = vand.u32 4294901760, %v6737_v1  ;;  %v6760_v50 = vsub.f32 %v212_v9, %v6734_v54  ;;  %v1720_v36 = vand.u32 4294901760, %v1719_v42  ;;  %v264_v26 = vld [vmem:[#allocation5 + $0x508] sm:$0xff] }
  0xe4   : > { %1655 = vmatpush.msrb.mxu3 %v6534_v46  ;;  %1618 = vmatpush.msrb.mxu2 %v1449_v11  ;;  %v444_v32 = vpop.f32.mrf.mxu1  ;;  %v498_v25 = vpop.f32.mrf.mxu2  ;;  %v6767_v11 = vand.u32 4294901760, %v204_v31  ;;  %v9479_v40 = vand.u32 4294901760, %v6753_v22 }
  0xe5   : > { %1517 = vmatpush.msrb.mxu0 %v6611_v63  ;;  %1547 = vmatpush.msrb.mxu1 %v6534_v46  ;;  %v445_v37 = vadd.f32 %v444_v32, %v344_v12  ;;  %v6750_v46 = vand.u32 4294901760, %v208_v49  ;;  %v1714_v63 = vand.u32 4294901760, %v1713_v48  ;;  %v1725_v39 = vsub.f32 %v6737_v1, %v9480_v60  ;;  %v9685_v48 = vld [vmem:[#allocation28_spill] sm:$0xff] }
  0xe6   : > { %1657 = vmatpush.msrb.mxu3 %v6547_v33  ;;  %1622 = vmatpush.msrb.mxu2 %v1455_v47  ;;  %v537_v35 = vpop.f32.mrf.mxu3  ;;  %v196_v47 = vld [vmem:[#allocation5 + $0x2e8] sm:$0xff]  ;;  %v9478_v28 = vand.u32 4294901760, %v6760_v50  ;;  %v6792_v57 = vsub.f32 %v204_v31, %v6767_v11  ;;  %v1731_v55 = vsub.f32 %v6753_v22, %v9479_v40  ;;  %v6832_v32 = vand.u32 4294901760, %v184_v51 }
  0xe7   : > { %1670 = vmatpush.msra.mxu0 %v6694_v24  ;;  %1549 = vmatpush.msrb.mxu1 %v6547_v33  ;;  %v499_v45 = vadd.f32 %v498_v25, %v445_v37  ;;  %v200_v33 = vld [vmem:[#allocation5 + $0x308] sm:$0xff]  ;;  %v6777_v38 = vsub.f32 %v208_v49, %v6750_v46  ;;  %v6789_v56 = vand.u32 4294901760, %v196_v47 }
  0xe8   : > { %1659 = vmatpush.msrb.mxu3 %v6563_v21  ;;  %1626 = vmatpush.msrb.mxu2 %v1461_v58  ;;  %v192_v58 = vld [vmem:[#allocation5 + $0x2c8] sm:$0xff]  ;;  %v1737_v29 = vsub.f32 %v6760_v50, %v9478_v28  ;;  %v9475_v2 = vand.u32 4294901760, %v6792_v57  ;;  %v1732_v12 = vand.u32 4294901760, %v1731_v55 }
  0xe9   : > { %1672 = vmatpush.msra.mxu0 %v6703_v59  ;;  %1551 = vmatpush.msrb.mxu1 %v6563_v21  ;;  %v538_v15 = vadd.f32 %v537_v35, %v499_v45  ;;  %v6773_v21 = vand.u32 4294901760, %v200_v33  ;;  %v6796_v23 = vand.u32 4294901760, %v192_v58  ;;  %v9477_v4 = vand.u32 4294901760, %v6777_v38  ;;  %v176_v37 = vld [vmem:[#allocation5 + $0x248] sm:$0xff] }
  0xea   : > { %1661 = vmatpush.msrb.mxu3 %v6576_v20  ;;  %1365 = vmatmul.f32.vlgmr.msra.gmra.mxu2 %v9682_v17  ;;  %v6816_v14 = vsub.f32 %v196_v47, %v6789_v56  ;;  %v1738_v25 = vand.u32 4294901760, %v1737_v29  ;;  %v1749_v31 = vsub.f32 %v6792_v57, %v9475_v2  ;;  %v6841_v45 = vand.u32 4294901760, %v180_v41  ;;  %v168_v29 = vld [vmem:[#allocation5 + $0x208] sm:$0xff] }
  0xeb   : > { %1674 = vmatpush.msra.mxu0 %v6716_v52  ;;  %v606_v44 = vpop.f32.mrf.mxu0  ;;  %1813 = vmatpush.msra.mxu2 %v6709_v18  ;;  %v6804_v19 = vsub.f32 %v200_v33, %v6773_v21  ;;  %v6823_v16 = vsub.f32 %v192_v58, %v6796_v23  ;;  %v1743_v9 = vsub.f32 %v6777_v38, %v9477_v4  ;;  %v172_v58 = vld [vmem:[#allocation5 + $0x228] sm:$0xff]  ;;  %v6984_v17 = vand.u32 4294901760, %v264_v26 }
  0xec   : > { %1553 = vmatpush.msrb.mxu1 %v6576_v20  ;;  %v607_v30 = vadd.f32 %v606_v44, %v538_v15  ;;  %1663 = vmatpush.msrb.mxu3 %v6589_v13  ;;  %v9683_v20 = vmov 1.0   ;;  %v9471_v35 = vand.u32 4294901760, %v6816_v14  ;;  %v6845_v33 = vsub.f32 %v188_v53, %v6812_v10  ;;  %v292_v53 = vld [vmem:[#allocation5 + $0x5e8] sm:$0xff] }
  0xed   : > { %1676 = vmatpush.msra.mxu0 %v6729_v7  ;;  %5299 = vmatmul.msk.f32.vlgmr.msra.gmra.mxu3 %vm5992_vm0, %v9683_v20  ;;  %v9473_v49 = vand.u32 4294901760, %v6804_v19  ;;  %v9470_v42 = vand.u32 4294901760, %v6823_v16  ;;  %v1744_v15 = vand.u32 4294901760, %v1743_v9  ;;  %v6856_v44 = vand.u32 4294901760, %v176_v37  ;;  %v268_v40 = vld [vmem:[#allocation5 + $0x528] sm:$0xff] }
  0xee   : > { %1816 = vmatpush.msra.mxu2 %v6721_v6  ;;  %v643_v5 = vpop.f32.mrf.mxu1  ;;  %1866 = vmatpush.msra.mxu3 %v6694_v24  ;;  %v684_v3 = vpop.f32.mrf.mxu2  ;;  %v6859_v47 = vsub.f32 %v184_v51, %v6832_v32  ;;  %v6890_v9 = vand.u32 4294901760, %v292_v53  ;;  %v260_v18 = vld [vmem:[#allocation5 + $0x4e8] sm:$0xff] }
  0xef   : > { %1555 = vmatpush.msrb.mxu1 %v6589_v13  ;;  %v644_v43 = vadd.f32 %v643_v5, %v607_v30  ;;  %1678 = vmatpush.msra.mxu0 %v6734_v54  ;;  %v1726_v13 = vand.u32 4294901760, %v1725_v39  ;;  %v9686_v30 = vld [vmem:[#allocation29_spill] sm:$0xff]  ;;  %v1750_v39 = vand.u32 4294901760, %v1749_v31  ;;  %v9469_v5 = vand.u32 4294901760, %v6845_v33 }
  0xf0   : > { %1819 = vmatpush.msra.mxu2 %v6737_v1  ;;  %1868 = vmatpush.msra.mxu3 %v6703_v59  ;;  %v6881_v51 = vsub.f32 %v176_v37, %v6856_v44  ;;  %v6894_v31 = vand.u32 4294901760, %v168_v29 }
  0xf1   : > { %1715 = vmatpush.msra.mxu1 %v1714_v63  ;;  %v685_v62 = vadd.f32 %v684_v3, %v644_v43  ;;  %1680 = vmatpush.msra.mxu0 %v6750_v46  ;;  %v785_v61 = vpop.f32.mrf.mxu3  ;;  %v1755_v63 = vsub.f32 %v6804_v19, %v9473_v49  ;;  %v6869_v43 = vsub.f32 %v180_v41, %v6841_v45  ;;  %v276_v49 = vld [vmem:[#allocation5 + $0x568] sm:$0xff] }
  0xf2   : > { %1822 = vmatpush.msra.mxu2 %v6753_v22  ;;  %1870 = vmatpush.msra.mxu3 %v6716_v52  ;;  %v1767_v3 = vsub.f32 %v6823_v16, %v9470_v42  ;;  %v1773_v41 = vsub.f32 %v6845_v33, %v9469_v5  ;;  %9687 = vst [vmem:[#allocation34_spill] sm:$0xff] %v6894_v31  ;;  %v9476_v5 = vand.u32 4294901760, %v6881_v51  ;;  %v284_v42 = vld [vmem:[#allocation5 + $0x5a8] sm:$0xff]  ;;  %v6937_v2 = vand.u32 4294901760, %v276_v49 }
  0xf3   : > { %1721 = vmatpush.msra.mxu1 %v1720_v36  ;;  %v6820_v0 = vadd.f32 %v785_v61, %v685_v62  ;;  %5300 = vmatmul.msk.f32.vlgmr.msrb.gmra.mxu2 %vm5992_vm0, %v9683_v20  ;;  %v1761_v36 = vsub.f32 %v6816_v14, %v9471_v35  ;;  %v1756_v55 = vand.u32 4294901760, %v1755_v63  ;;  %v9472_v62 = vand.u32 4294901760, %v6859_v47  ;;  %v280_v35 = vld [vmem:[#allocation5 + $0x588] sm:$0xff] }
  0xf4   : > { %1682 = vmatpush.msra.mxu0 %v6767_v11  ;;  %1825 = vmatpush.msra.mxu2 %v6760_v50  ;;  %v1768_v37 = vand.u32 4294901760, %v1767_v3 }
  0xf5   : > { %1727 = vmatpush.msra.mxu1 %v1726_v13  ;;  %1872 = vmatpush.msra.mxu3 %v6729_v7  ;;  %v6877_v13 = vand.u32 4294901760, %v172_v58  ;;  %v1762_v61 = vand.u32 4294901760, %v1761_v36  ;;  %v1779_v63 = vsub.f32 %v6859_v47, %v9472_v62  ;;  %v6921_v62 = vand.u32 4294901760, %v284_v42 }
  0xf6   : > { %1520 = vmatmul.f32.vlgmr.msrb.gmra.mxu0 %v9685_v48  ;;  %5301 = vmatmul.msk.f32.vlgmr.msrb.gmra.mxu3 %vm5992_vm0, %v9683_v20 }
  0xf7   : > { %1684 = vmatpush.msra.mxu0 %v6773_v21  ;;  %1733 = vmatpush.msra.mxu1 %v1732_v12  ;;  %v9474_v12 = vand.u32 4294901760, %v6869_v43  ;;  %v6902_v36 = vsub.f32 %v172_v58, %v6877_v13  ;;  %v6914_v58 = vsub.f32 %v292_v53, %v6890_v9  ;;  %9688 = vst [vmem:[#allocation35_spill] sm:$0xff] %v6921_v62 }
  0xf8   : > { %1828 = vmatpush.msra.mxu2 %v6777_v38  ;;  %1874 = vmatpush.msra.mxu3 %v6734_v54  ;;  %v6943_v28 = vsub.f32 %v284_v42, %v6921_v62 }
  0xf9   : > { %1559 = vmatmul.f32.vlgmr.msrb.gmra.mxu1 %v9686_v30  ;;  %1686 = vmatpush.msra.mxu0 %v6789_v56  ;;  %v9482_v53 = vand.u32 4294901760, %v6902_v36 }
  0xfa   : > { %1739 = vmatpush.msra.mxu1 %v1738_v25  ;;  %1831 = vmatpush.msra.mxu2 %v6792_v57  ;;  %v288_v25 = vld [vmem:[#allocation5 + $0x5c8] sm:$0xff] }
  0xfb   : > { %1876 = vmatpush.msra.mxu3 %v6750_v46  ;;  %1688 = vmatpush.msra.mxu0 %v6796_v23  ;;  %v6907_v3 = vand.u32 4294901760, %v288_v25 }
  0xfc   : > { %1745 = vmatpush.msra.mxu1 %v1744_v15  ;;  %1834 = vmatpush.msra.mxu2 %v6804_v19 }
  0xfd   : > { %1878 = vmatpush.msra.mxu3 %v6767_v11  ;;  %1690 = vmatpush.msra.mxu0 %v6812_v10 }
  0xfe   : > { %1751 = vmatpush.msra.mxu1 %v1750_v39  ;;  %1837 = vmatpush.msra.mxu2 %v6816_v14  ;;  %v839_v15 = vpop.f32.mrf.mxu0 }
  0xff   : > { %1880 = vmatpush.msra.mxu3 %v6773_v21  ;;  %1692 = vmatpush.msra.mxu0 %v6832_v32  ;;  %v840_v39 = vadd.f32 %v839_v15, %v6820_v0  ;;  %v1785_v0 = vsub.f32 %v6869_v43, %v9474_v12  ;;  %v6919_v15 = vsub.f32 %v168_v29, %v6894_v31  ;;  %v6928_v12 = vand.u32 4294901760, %v280_v35 }
 0x100   : > { %1757 = vmatpush.msra.mxu1 %v1756_v55  ;;  %1840 = vmatpush.msra.mxu2 %v6823_v16  ;;  %v1774_v55 = vand.u32 4294901760, %v1773_v41  ;;  %v1791_v41 = vsub.f32 %v6881_v51, %v9476_v5  ;;  %v6933_v29 = vsub.f32 %v288_v25, %v6907_v3  ;;  %v272_v5 = vld [vmem:[#allocation5 + $0x548] sm:$0xff] }
 0x101   : > { %1882 = vmatpush.msra.mxu3 %v6789_v56  ;;  %1694 = vmatpush.msra.mxu0 %v6841_v45  ;;  %v6955_v4 = vand.u32 4294901760, %v272_v5  ;;  %v9691_v60 = vand.u32 4294901760, %v6919_v15 }
 0x102   : > { %1763 = vmatpush.msra.mxu1 %v1762_v61  ;;  %1843 = vmatpush.msra.mxu2 %v6845_v33  ;;  %v1780_v61 = vand.u32 4294901760, %v1779_v63  ;;  %v9485_v63 = vand.u32 4294901760, %v6914_v58  ;;  %v1792_v25 = vand.u32 4294901760, %v1791_v41 }
 0x103   : > { %1884 = vmatpush.msra.mxu3 %v6796_v23  ;;  %1696 = vmatpush.msra.mxu0 %v6856_v44  ;;  %v1803_v30 = vsub.f32 %v6919_v15, %v9691_v60  ;;  %v9693_v60 = vand.u32 4294901760, %v6933_v29  ;;  %v6982_v48 = vsub.f32 %v272_v5, %v6955_v4  ;;  %v9696_v5 = vand.u32 4294901760, %v6943_v28 }
 0x104   : > { %1769 = vmatpush.msra.mxu1 %v1768_v37  ;;  %1846 = vmatpush.msra.mxu2 %v6859_v47  ;;  %v1786_v37 = vand.u32 4294901760, %v1785_v0  ;;  %v6950_v0 = vsub.f32 %v280_v35, %v6928_v12  ;;  %v2054_v41 = vsub.f32 %v6914_v58, %v9485_v63 }
 0x105   : > { %1886 = vmatpush.msra.mxu3 %v6812_v10  ;;  %1698 = vmatpush.msra.mxu0 %v6877_v13 }
 0x106   : > { %1775 = vmatpush.msra.mxu1 %v1774_v55  ;;  %1849 = vmatpush.msra.mxu2 %v6869_v43  ;;  %v1797_v55 = vsub.f32 %v6902_v36, %v9482_v53  ;;  %v6962_v53 = vsub.f32 %v276_v49, %v6937_v2 }
 0x107   : > { %1888 = vmatpush.msra.mxu3 %v6832_v32  ;;  %1700 = vmatpush.msra.mxu0 %v6894_v31 }
 0x108   : > { %1781 = vmatpush.msra.mxu1 %v1780_v61  ;;  %1852 = vmatpush.msra.mxu2 %v6881_v51  ;;  %v878_v42 = vpop.f32.mrf.mxu1  ;;  %v9689_v61 = vld [vmem:[#allocation26_spill] sm:$0xff] }
 0x109   : > { %1890 = vmatpush.msra.mxu3 %v6841_v45  ;;  %v947_v34 = vpop.f32.mrf.mxu2  ;;  %1706 = vmatmul.f32.vlgmr.msra.gmra.mxu0 %v9689_v61  ;;  %v879_v35 = vadd.f32 %v878_v42, %v840_v39  ;;  %v6971_v61 = vand.u32 4294901760, %v268_v40  ;;  %v1798_v39 = vand.u32 4294901760, %v1797_v55  ;;  %v2066_v42 = vsub.f32 %v6943_v28, %v9696_v5 }
 0x10a   : > { %1787 = vmatpush.msra.mxu1 %v1786_v37  ;;  %1907 = vmatpush.msrb.mxu0 %v9690_v27  ;;  %v9692_v27 = vand.u32 4294901760, %v6721_v6  ;;  %v2060_v37 = vsub.f32 %v6933_v29, %v9693_v60  ;;  %v1804_v60 = vand.u32 4294901760, %v1803_v30  ;;  %v9699_v30 = vand.u32 4294901760, %v6753_v22 }
 0x10b   : > { %1855 = vmatpush.msra.mxu2 %v6902_v36  ;;  %1892 = vmatpush.msra.mxu3 %v6856_v44  ;;  %v948_v49 = vadd.f32 %v947_v34, %v879_v35  ;;  %v9694_v34 = vld [vmem:[#allocation32_spill] sm:$0xff]  ;;  %v256_v35 = vld [vmem:[#allocation5 + $0x4c8] sm:$0xff]  ;;  %v6998_v8 = vsub.f32 %v268_v40, %v6971_v61  ;;  %v7011_v40 = vsub.f32 %v264_v26, %v6984_v17  ;;  %v9701_v22 = vand.u32 4294901760, %v6760_v50 }
 0x10c   : > { %1793 = vmatpush.msra.mxu1 %v1792_v25  ;;  %v984_v63 = vpop.f32.mrf.mxu3  ;;  %1911 = vmatpush.msrb.mxu0 %v9692_v27  ;;  %v2055_v25 = vand.u32 4294901760, %v2054_v41  ;;  %v9695_v27 = vand.u32 4294901760, %v6737_v1  ;;  %v252_v41 = vld [vmem:[#allocation5 + $0x4a8] sm:$0xff]  ;;  %v7013_v6 = vand.u32 4294901760, %v256_v35  ;;  %v9703_v50 = vand.u32 4294901760, %v6982_v48 }
 0x10d   : > { %1858 = vmatpush.msra.mxu2 %v6919_v15  ;;  %1894 = vmatpush.msra.mxu3 %v6877_v13  ;;  %v6988_v55 = vadd.f32 %v984_v63, %v948_v49  ;;  %v9697_v63 = vand.u32 4294901760, %v6950_v0  ;;  %v9698_v49 = vld [vmem:[#allocation33_spill] sm:$0xff]  ;;  %v7025_v5 = vand.u32 4294901760, %v252_v41 }
 0x10e   : > { %1861 = vmatmul.f32.vlgmr.msra.gmra.mxu2 %v9694_v34  ;;  %1915 = vmatpush.msrb.mxu0 %v9695_v27  ;;  %v7000_v34 = vand.u32 4294901760, %v260_v18  ;;  %v2061_v27 = vand.u32 4294901760, %v2060_v37  ;;  %v2067_v37 = vand.u32 4294901760, %v2066_v42  ;;  %v2084_v42 = vsub.f32 %v6982_v48, %v9703_v50 }
 0x10f   : > { %2011 = vmatpush.msrb.mxu2 %v6890_v9  ;;  %1799 = vmatpush.msra.mxu1 %v1798_v39  ;;  %v2072_v1 = vsub.f32 %v6950_v0, %v9697_v63  ;;  %v9700_v39 = vand.u32 4294901760, %v6962_v53  ;;  %v9708_v50 = vand.u32 4294901760, %v6804_v19  ;;  %v9710_v19 = vand.u32 4294901760, %v6816_v14 }
 0x110   : > { %1896 = vmatpush.msra.mxu3 %v6894_v31  ;;  %1919 = vmatpush.msrb.mxu0 %v9699_v30  ;;  %v248_v31 = vld [vmem:[#allocation5 + $0x488] sm:$0xff]  ;;  %v7023_v26 = vsub.f32 %v260_v18, %v7000_v34  ;;  %v9704_v30 = vand.u32 4294901760, %v6777_v38  ;;  %v9706_v38 = vand.u32 4294901760, %v6792_v57 }
 0x111   : > { %1900 = vmatmul.f32.vlgmr.msra.gmra.mxu3 %v9698_v49  ;;  %2013 = vmatpush.msrb.mxu2 %v6907_v3  ;;  %v2078_v63 = vsub.f32 %v6962_v53, %v9700_v39  ;;  %v244_v39 = vld [vmem:[#allocation5 + $0x468] sm:$0xff] }
 0x112   : > { %2056 = vmatpush.msrb.mxu3 %v2055_v25  ;;  %1805 = vmatpush.msra.mxu1 %v1804_v60  ;;  %v2073_v25 = vand.u32 4294901760, %v2072_v1  ;;  %v7037_v60 = vsub.f32 %v256_v35, %v7013_v6  ;;  %v7050_v35 = vsub.f32 %v252_v41, %v7025_v5  ;;  %v7052_v18 = vand.u32 4294901760, %v244_v39 }
 0x113   : > { %1923 = vmatpush.msrb.mxu0 %v9701_v22  ;;  %5302 = vmatmul.msk.f32.vlgmr.msra.gmra.mxu1 %vm6080_vm1, %v9683_v20  ;;  %v7039_v22 = vand.u32 4294901760, %v248_v31  ;;  %v2079_v1 = vand.u32 4294901760, %v2078_v63  ;;  %v9707_v63 = vand.u32 4294901760, %v7011_v40 }
 0x114   : > { %2015 = vmatpush.msrb.mxu2 %v6921_v62  ;;  %1974 = vmatpush.msrb.mxu1 %v6694_v24  ;;  %v9705_v24 = vand.u32 4294901760, %v6998_v8  ;;  %v240_v62 = vld [vmem:[#allocation5 + $0x448] sm:$0xff] }
 0x115   : > { %2062 = vmatpush.msrb.mxu3 %v2061_v27  ;;  %1927 = vmatpush.msrb.mxu0 %v9704_v30  ;;  %v2107_v30 = vand.u32 4294901760, %v7037_v60  ;;  %v7063_v41 = vsub.f32 %v248_v31, %v7039_v22  ;;  %v7068_v57 = vand.u32 4294901760, %v240_v62  ;;  %v7076_v31 = vsub.f32 %v244_v39, %v7052_v18 }
 0x116   : > { %2017 = vmatpush.msrb.mxu2 %v6928_v12  ;;  %1976 = vmatpush.msrb.mxu1 %v6703_v59  ;;  %v2090_v27 = vsub.f32 %v6998_v8, %v9705_v24  ;;  %v2085_v59 = vand.u32 4294901760, %v2084_v42  ;;  %v236_v24 = vld [vmem:[#allocation5 + $0x428] sm:$0xff]  ;;  %v9711_v39 = vand.u32 4294901760, %v6823_v16  ;;  %v9712_v16 = vand.u32 4294901760, %v6845_v33 }
 0x117   : > { %2068 = vmatpush.msrb.mxu3 %v2067_v37  ;;  %1931 = vmatpush.msrb.mxu0 %v9706_v38  ;;  %v2096_v37 = vsub.f32 %v7011_v40, %v9707_v63  ;;  %v2113_v38 = vand.u32 4294901760, %v7050_v35  ;;  %v232_v63 = vld [vmem:[#allocation5 + $0x408] sm:$0xff]  ;;  %v7092_v14 = vsub.f32 %v240_v62, %v7068_v57 }
 0x118   : > { %2019 = vmatpush.msrb.mxu2 %v6937_v2  ;;  %1978 = vmatpush.msrb.mxu1 %v6716_v52  ;;  %v2091_v52 = vand.u32 4294901760, %v2090_v27  ;;  %v2119_v27 = vand.u32 4294901760, %v7063_v41 }
 0x119   : > { %2074 = vmatpush.msrb.mxu3 %v2073_v25  ;;  %1935 = vmatpush.msrb.mxu0 %v9708_v50  ;;  %v9709_v25 = vand.u32 4294901760, %v7023_v26  ;;  %v7081_v50 = vand.u32 4294901760, %v236_v24 }
 0x11a   : > { %2021 = vmatpush.msrb.mxu2 %v6955_v4  ;;  %1980 = vmatpush.msrb.mxu1 %v6729_v7  ;;  %v2097_v7 = vand.u32 4294901760, %v2096_v37  ;;  %v2125_v37 = vand.u32 4294901760, %v7076_v31 }
 0x11b   : > { %2080 = vmatpush.msrb.mxu3 %v2079_v1  ;;  %v2102_v42 = vsub.f32 %v7023_v26, %v9709_v25  ;;  %1939 = vmatpush.msrb.mxu0 %v9710_v19  ;;  %v2108_v1 = vsub.f32 %v7037_v60, %v2107_v30  ;;  %v7094_v25 = vand.u32 4294901760, %v232_v63  ;;  %v7105_v62 = vsub.f32 %v236_v24, %v7081_v50 }
 0x11c   : > { %2023 = vmatpush.msrb.mxu2 %v6971_v61  ;;  %1982 = vmatpush.msrb.mxu1 %v6734_v54  ;;  %v9713_v19 = vand.u32 4294901760, %v6859_v47  ;;  %v9714_v47 = vand.u32 4294901760, %v6869_v43 }
 0x11d   : > { %2086 = vmatpush.msrb.mxu3 %v2085_v59  ;;  %1943 = vmatpush.msrb.mxu0 %v9711_v39  ;;  %v2103_v54 = vand.u32 4294901760, %v2102_v42  ;;  %v2114_v59 = vsub.f32 %v7050_v35, %v2113_v38  ;;  %v2131_v39 = vand.u32 4294901760, %v7092_v14  ;;  %v7117_v24 = vsub.f32 %v232_v63, %v7094_v25 }
 0x11e   : > { %2025 = vmatpush.msrb.mxu2 %v6984_v17  ;;  %1984 = vmatpush.msrb.mxu1 %v6750_v46  ;;  %v2109_v46 = vand.u32 4294901760, %v2108_v1  ;;  %v9715_v1 = vand.u32 4294901760, %v6881_v51  ;;  %v9717_v51 = vand.u32 4294901760, %v6919_v15 }
 0x11f   : > { %2092 = vmatpush.msrb.mxu3 %v2091_v52  ;;  %1947 = vmatpush.msrb.mxu0 %v9712_v16  ;;  %v2120_v52 = vsub.f32 %v7063_v41, %v2119_v27  ;;  %v2143_v43 = vand.u32 4294901760, %v7117_v24 }
 0x120   : > { %2027 = vmatpush.msrb.mxu2 %v7000_v34  ;;  %1986 = vmatpush.msrb.mxu1 %v6767_v11  ;;  %v1025_v42 = vpop.f32.mrf.mxu0  ;;  %v2115_v11 = vand.u32 4294901760, %v2114_v59  ;;  %v9716_v59 = vand.u32 4294901760, %v6902_v36 }
 0x121   : > { %2098 = vmatpush.msrb.mxu3 %v2097_v7  ;;  %1951 = vmatpush.msrb.mxu0 %v9713_v19  ;;  %v1026_v33 = vadd.f32 %v1025_v42, %v6988_v55  ;;  %v2126_v7 = vsub.f32 %v7076_v31, %v2125_v37  ;;  %v2137_v55 = vand.u32 4294901760, %v7105_v62  ;;  %v2121_v63 = vand.u32 4294901760, %v2120_v52  ;;  %v9718_v42 = vld [vmem:[#allocation22_spill] sm:$0xff] }
 0x122   : > { %2029 = vmatpush.msrb.mxu2 %v7013_v6  ;;  %1988 = vmatpush.msrb.mxu1 %v6773_v21  ;;  %v2132_v21 = vsub.f32 %v7092_v14, %v2131_v39  ;;  %v2144_v36 = vsub.f32 %v7117_v24, %v2143_v43  ;;  %v9719_v19 = vand.u32 4294901760, %v6914_v58 }
 0x123   : > { %2104 = vmatpush.msrb.mxu3 %v2103_v54  ;;  %1955 = vmatpush.msrb.mxu0 %v9714_v47  ;;  %v2127_v54 = vand.u32 4294901760, %v2126_v7  ;;  %v9732_v7 = vld [vmem:[#allocation24_spill] sm:$0xff] }
 0x124   : > { %2031 = vmatpush.msrb.mxu2 %v7025_v5  ;;  %1990 = vmatpush.msrb.mxu1 %v6789_v56  ;;  %v2138_v56 = vsub.f32 %v7105_v62, %v2137_v55  ;;  %v2145_v52 = vand.u32 4294901760, %v2144_v36 }
 0x125   : > { %2110 = vmatpush.msrb.mxu3 %v2109_v46  ;;  %1959 = vmatpush.msrb.mxu0 %v9715_v1 }
 0x126   : > { %2033 = vmatpush.msrb.mxu2 %v7039_v22  ;;  %1992 = vmatpush.msrb.mxu1 %v6796_v23  ;;  %v2133_v23 = vand.u32 4294901760, %v2132_v21  ;;  %v133_v21 = vld [vmem:[#allocation5 + $0xf0] sm:$0xff] }
 0x127   : > { %2116 = vmatpush.msrb.mxu3 %v2115_v11  ;;  %1963 = vmatpush.msrb.mxu0 %v9716_v59  ;;  %v9726_v11 = vand.u32 4294901760, %v6962_v53  ;;  %v129_v59 = vld [vmem:[#allocation5 + $0xd0] sm:$0xff] }
 0x128   : > { %2035 = vmatpush.msrb.mxu2 %v7052_v18  ;;  %1994 = vmatpush.msrb.mxu1 %v6812_v10  ;;  %v2139_v10 = vand.u32 4294901760, %v2138_v56  ;;  %v7295_v56 = vand.u32 4294901760, %v133_v21 }
 0x129   : > { %2122 = vmatpush.msrb.mxu3 %v2121_v63  ;;  %1967 = vmatpush.msrb.mxu0 %v9717_v51  ;;  %v137_v63 = vld [vmem:[#allocation5 + $0x110] sm:$0xff] }
 0x12a   : > { %2037 = vmatpush.msrb.mxu2 %v7068_v57  ;;  %1996 = vmatpush.msrb.mxu1 %v6832_v32  ;;  %v1126_v16 = vpop.f32.mrf.mxu1 }
 0x12b   : > { %2128 = vmatpush.msrb.mxu3 %v2127_v54  ;;  %v1180_v46 = vpop.f32.mrf.mxu2  ;;  %5303 = vmatmul.msk.f32.vlgmr.msrb.gmra.mxu0 %vm6080_vm1, %v9683_v20  ;;  %v1127_v15 = vadd.f32 %v1126_v16, %v1026_v33  ;;  %v9721_v33 = vand.u32 4294901760, %v6933_v29 }
 0x12c   : > { %2039 = vmatpush.msrb.mxu2 %v7081_v50  ;;  %2154 = vmatpush.msra.mxu0 %v6914_v58  ;;  %v9724_v58 = vand.u32 4294901760, %v6950_v0 }
 0x12d   : > { %1998 = vmatpush.msrb.mxu1 %v6841_v45  ;;  %2134 = vmatpush.msrb.mxu3 %v2133_v23  ;;  %v1181_v32 = vadd.f32 %v1180_v46, %v1127_v15  ;;  %v9720_v45 = vld [vmem:[#allocation23_spill] sm:$0xff] }
 0x12e   : > { %2041 = vmatpush.msrb.mxu2 %v7094_v25  ;;  %2157 = vmatpush.msra.mxu0 %v6933_v29  ;;  %v9725_v29 = vld [vmem:[#allocation35_spill] sm:$0xff] }
 0x12f   : > { %2000 = vmatpush.msrb.mxu1 %v6856_v44  ;;  %2140 = vmatpush.msrb.mxu3 %v2139_v10  ;;  %v9722_v44 = vld [vmem:[#allocation34_spill] sm:$0xff] }
 0x130   : > { %2047 = vmatmul.f32.vlgmr.msrb.gmra.mxu2 %v9718_v42  ;;  %2160 = vmatpush.msra.mxu0 %v6943_v28  ;;  %v125_v46 = vld [vmem:[#allocation5 + $0xb0] sm:$0xff] }
 0x131   : > { %2248 = vmatpush.msra.mxu2 %v9719_v19  ;;  %2002 = vmatpush.msrb.mxu1 %v6877_v13  ;;  %v9723_v13 = vand.u32 4294901760, %v6943_v28  ;;  %v9727_v28 = vand.u32 4294901760, %v6982_v48  ;;  %v9733_v19 = vld [vmem:[#allocation25_spill] sm:$0xff] }
 0x132   : > { %2146 = vmatpush.msrb.mxu3 %v2145_v52  ;;  %2163 = vmatpush.msra.mxu0 %v6950_v0  ;;  %v161_v0 = vld [vmem:[#allocation5 + $0x1d0] sm:$0xff] }
 0x133   : > { %2148 = vmatmul.f32.vlgmr.msrb.gmra.mxu3 %v9720_v45  ;;  %2252 = vmatpush.msra.mxu2 %v9721_v33  ;;  %v7322_v33 = vsub.f32 %v133_v21, %v7295_v56 }
 0x134   : > { %2315 = vmatpush.msra.mxu3 %v6890_v9  ;;  %2004 = vmatpush.msrb.mxu1 %v9722_v44 }
 0x135   : > { %2166 = vmatpush.msra.mxu0 %v6962_v53  ;;  %5304 = vmatmul.msk.f32.vlgmr.msrb.gmra.mxu1 %vm6080_vm1, %v9683_v20  ;;  %v9729_v53 = vand.u32 4294901760, %v7011_v40 }
 0x136   : > { %2256 = vmatpush.msra.mxu2 %v9723_v13  ;;  %2207 = vmatpush.msra.mxu1 %v6890_v9  ;;  %v9728_v9 = vand.u32 4294901760, %v6998_v8 }
 0x137   : > { %2317 = vmatpush.msra.mxu3 %v6907_v3  ;;  %2169 = vmatpush.msra.mxu0 %v6982_v48 }
 0x138   : > { %2260 = vmatpush.msra.mxu2 %v9724_v58  ;;  %2209 = vmatpush.msra.mxu1 %v6907_v3  ;;  %v1219_v3 = vpop.f32.mrf.mxu3  ;;  %v7328_v58 = vand.u32 4294901760, %v125_v46 }
 0x139   : > { %2319 = vmatpush.msra.mxu3 %v9725_v29  ;;  %2172 = vmatpush.msra.mxu0 %v6998_v8  ;;  %v1220_v48 = vadd.f32 %v1219_v3, %v1181_v32  ;;  %v9730_v8 = vand.u32 4294901760, %v7023_v26 }
 0x13a   : > { %2264 = vmatpush.msra.mxu2 %v9726_v11  ;;  %2211 = vmatpush.msra.mxu1 %v9725_v29 }
 0x13b   : > { %2321 = vmatpush.msra.mxu3 %v6928_v12  ;;  %2175 = vmatpush.msra.mxu0 %v7011_v40 }
 0x13c   : > { %2268 = vmatpush.msra.mxu2 %v9727_v28  ;;  %2213 = vmatpush.msra.mxu1 %v6928_v12  ;;  %v165_v12 = vld [vmem:[#allocation5 + $0x1f0] sm:$0xff] }
 0x13d   : > { %2323 = vmatpush.msra.mxu3 %v6937_v2  ;;  %2178 = vmatpush.msra.mxu0 %v7023_v26  ;;  %v7213_v40 = vand.u32 4294901760, %v165_v12  ;;  %v7220_v26 = vand.u32 4294901760, %v161_v0  ;;  %v117_v28 = vld [vmem:[#allocation5 + $0x70] sm:$0xff] }
 0x13e   : > { %2272 = vmatpush.msra.mxu2 %v9728_v9  ;;  %2215 = vmatpush.msra.mxu1 %v6937_v2 }
 0x13f   : > { %2325 = vmatpush.msra.mxu3 %v6955_v4  ;;  %2181 = vmatpush.msra.mxu0 %v7037_v60 }
 0x140   : > { %2276 = vmatpush.msra.mxu2 %v9729_v53  ;;  %2217 = vmatpush.msra.mxu1 %v6955_v4 }
 0x141   : > { %2327 = vmatpush.msra.mxu3 %v6971_v61  ;;  %2184 = vmatpush.msra.mxu0 %v7050_v35  ;;  %v7230_v35 = vsub.f32 %v165_v12, %v7213_v40  ;;  %v113_v12 = vld [vmem:[#allocation5 + $0x50] sm:$0xff] }
 0x142   : > { %2280 = vmatpush.msra.mxu2 %v9730_v8  ;;  %2219 = vmatpush.msra.mxu1 %v6971_v61  ;;  %v1288_v2 = vpop.f32.mrf.mxu0  ;;  %v157_v61 = vld [vmem:[#allocation5 + $0x1b0] sm:$0xff]  ;;  %v9493_v8 = vand.u32 4294901760, %v7322_v33 }
 0x143   : > { %2329 = vmatpush.msra.mxu3 %v6984_v17  ;;  %2187 = vmatpush.msra.mxu0 %v7063_v41  ;;  %v1289_v4 = vadd.f32 %v1288_v2, %v1220_v48  ;;  %v7227_v60 = vand.u32 4294901760, %v157_v61 }
 0x144   : > { %2284 = vmatpush.msra.mxu2 %v2107_v30  ;;  %2221 = vmatpush.msra.mxu1 %v6984_v17  ;;  %v153_v17 = vld [vmem:[#allocation5 + $0x190] sm:$0xff]  ;;  %v2443_v21 = vsub.f32 %v7322_v33, %v9493_v8 }
 0x145   : > { %2331 = vmatpush.msra.mxu3 %v7000_v34  ;;  %2190 = vmatpush.msra.mxu0 %v7076_v31  ;;  %v7237_v30 = vand.u32 4294901760, %v153_v17 }
 0x146   : > { %2288 = vmatpush.msra.mxu2 %v2113_v38  ;;  %2223 = vmatpush.msra.mxu1 %v7000_v34  ;;  %v149_v34 = vld [vmem:[#allocation5 + $0x170] sm:$0xff] }
 0x147   : > { %2333 = vmatpush.msra.mxu3 %v7013_v6  ;;  %2193 = vmatpush.msra.mxu0 %v7092_v14  ;;  %v145_v38 = vld [vmem:[#allocation5 + $0x150] sm:$0xff]  ;;  %v7247_v31 = vand.u32 4294901760, %v149_v34  ;;  %v7264_v47 = vsub.f32 %v153_v17, %v7237_v30 }
 0x148   : > { %2292 = vmatpush.msra.mxu2 %v2119_v27  ;;  %2225 = vmatpush.msra.mxu1 %v7013_v6  ;;  %v7240_v6 = vsub.f32 %v161_v0, %v7220_v26  ;;  %v7251_v27 = vsub.f32 %v157_v61, %v7227_v60  ;;  %v141_v14 = vld [vmem:[#allocation5 + $0x130] sm:$0xff]  ;;  %v7350_v0 = vand.u32 4294901760, %v117_v28  ;;  %v7353_v61 = vsub.f32 %v125_v46, %v7328_v58 }
 0x149   : > { %2335 = vmatpush.msra.mxu3 %v7025_v5  ;;  %2196 = vmatpush.msra.mxu0 %v7105_v62  ;;  %v7274_v62 = vand.u32 4294901760, %v141_v14  ;;  %v7278_v1 = vsub.f32 %v149_v34, %v7247_v31  ;;  %v109_v34 = vld [vmem:[#allocation5 + $0x30] sm:$0xff] }
 0x14a   : > { %2296 = vmatpush.msra.mxu2 %v2125_v37  ;;  %2227 = vmatpush.msra.mxu1 %v7025_v5  ;;  %v9505_v5 = vand.u32 4294901760, %v7230_v35  ;;  %v7377_v46 = vsub.f32 %v117_v28, %v7350_v0 }
 0x14b   : > { %2337 = vmatpush.msra.mxu3 %v7039_v22  ;;  %2199 = vmatpush.msra.mxu0 %v7117_v24  ;;  %v1325_v41 = vpop.f32.mrf.mxu1  ;;  %v7287_v24 = vand.u32 4294901760, %v137_v63  ;;  %v9498_v36 = vand.u32 4294901760, %v7278_v1  ;;  %v7304_v16 = vsub.f32 %v141_v14, %v7274_v62  ;;  %v7362_v14 = vand.u32 4294901760, %v113_v12 }
 0x14c   : > { %2300 = vmatpush.msra.mxu2 %v2131_v39  ;;  %2229 = vmatpush.msra.mxu1 %v7039_v22  ;;  %v7253_v37 = vadd.f32 %v1325_v41, %v1289_v4  ;;  %v7260_v22 = vand.u32 4294901760, %v145_v38  ;;  %v9503_v39 = vand.u32 4294901760, %v7240_v6 }
 0x14d   : > { %2339 = vmatpush.msra.mxu3 %v7052_v18  ;;  %2202 = vmatmul.f32.vlgmr.msra.gmra.mxu0 %v9732_v7  ;;  %v7317_v32 = vsub.f32 %v137_v63, %v7287_v24  ;;  %v2419_v13 = vsub.f32 %v7278_v1, %v9498_v36  ;;  %v9495_v29 = vand.u32 4294901760, %v7304_v16 }
 0x14e   : > { %9731 = vst [vmem:[#allocation34_spill] sm:$0xff] %v7253_v37  ;;  %2304 = vmatpush.msra.mxu2 %v2137_v55  ;;  %2352 = vmatpush.msrb.mxu0 %v7213_v40  ;;  %v9501_v55 = vand.u32 4294901760, %v7251_v27  ;;  %v7291_v54 = vsub.f32 %v145_v38, %v7260_v22 }
 0x14f   : > { %2231 = vmatpush.msra.mxu1 %v7052_v18  ;;  %2341 = vmatpush.msra.mxu3 %v7068_v57  ;;  %v2395_v18 = vsub.f32 %v7230_v35, %v9505_v5  ;;  %v9494_v48 = vand.u32 4294901760, %v7317_v32  ;;  %v2420_v2 = vand.u32 4294901760, %v2419_v13  ;;  %v2431_v4 = vsub.f32 %v7304_v16, %v9495_v29  ;;  %v213_v29 = vld [vmem:[#allocation5 + $0x370] sm:$0xff] }
 0x150   : > { %2308 = vmatpush.msra.mxu2 %v2143_v43  ;;  %2354 = vmatpush.msrb.mxu0 %v7220_v26  ;;  %v9500_v43 = vand.u32 4294901760, %v7264_v47  ;;  %v2407_v23 = vsub.f32 %v7251_v27, %v9501_v55  ;;  %v9497_v52 = vand.u32 4294901760, %v7291_v54  ;;  %v7435_v36 = vand.u32 4294901760, %v213_v29 }
 0x151   : > { %2233 = vmatpush.msra.mxu1 %v7068_v57  ;;  %2343 = vmatpush.msra.mxu3 %v7081_v50  ;;  %v2401_v57 = vsub.f32 %v7240_v6, %v9503_v39  ;;  %v2396_v51 = vand.u32 4294901760, %v2395_v18  ;;  %v2437_v38 = vsub.f32 %v7317_v32, %v9494_v48  ;;  %v229_v18 = vld [vmem:[#allocation5 + $0x3f0] sm:$0xff] }
 0x152   : > { %2310 = vmatmul.f32.vlgmr.msra.gmra.mxu2 %v9720_v45  ;;  %2356 = vmatpush.msrb.mxu0 %v7227_v60  ;;  %v2413_v15 = vsub.f32 %v7264_v47, %v9500_v43  ;;  %v2408_v44 = vand.u32 4294901760, %v2407_v23  ;;  %v2425_v3 = vsub.f32 %v7291_v54, %v9497_v52  ;;  %v9492_v23 = vand.u32 4294901760, %v7353_v61 }
 0x153   : > { %2495 = vmatpush.msrb.mxu2 %v7230_v35  ;;  %2235 = vmatpush.msra.mxu1 %v7081_v50  ;;  %v7308_v50 = vand.u32 4294901760, %v129_v59  ;;  %v2402_v10 = vand.u32 4294901760, %v2401_v57  ;;  %v105_v57 = vld [vmem:[#allocation5 + $0x10] sm:$0xff] }
 0x154   : > { %2345 = vmatpush.msra.mxu3 %v7094_v25  ;;  %2358 = vmatpush.msrb.mxu0 %v7237_v30  ;;  %v2414_v9 = vand.u32 4294901760, %v2413_v15  ;;  %v2426_v41 = vand.u32 4294901760, %v2425_v3  ;;  %v7384_v15 = vand.u32 4294901760, %v229_v18  ;;  %v7387_v13 = vand.u32 4294901760, %v105_v57 }
 0x155   : > { %2347 = vmatmul.f32.vlgmr.msra.gmra.mxu3 %v9720_v45  ;;  %2498 = vmatpush.msrb.mxu2 %v7240_v6  ;;  %v7334_v11 = vsub.f32 %v129_v59, %v7308_v50  ;;  %v2432_v59 = vand.u32 4294901760, %v2431_v4  ;;  %v2444_v3 = vand.u32 4294901760, %v2443_v21  ;;  %v2455_v4 = vsub.f32 %v7353_v61, %v9492_v23 }
 0x156   : > { %2548 = vmatpush.msrb.mxu3 %v7213_v40  ;;  %2237 = vmatpush.msra.mxu1 %v7094_v25  ;;  %v121_v25 = vld [vmem:[#allocation5 + $0x90] sm:$0xff]  ;;  %v7416_v8 = vsub.f32 %v105_v57, %v7387_v13  ;;  %v9735_v45 = vand.u32 4294901760, %v7230_v35 }
 0x157   : > { %2360 = vmatpush.msrb.mxu0 %v7247_v31  ;;  %2241 = vmatmul.f32.vlgmr.msra.gmra.mxu1 %v9733_v19  ;;  %v7340_v53 = vand.u32 4294901760, %v121_v25  ;;  %v9491_v17 = vand.u32 4294901760, %v7334_v11 }
 0x158   : > { %2501 = vmatpush.msrb.mxu2 %v7251_v27  ;;  %2397 = vmatpush.msrb.mxu1 %v2396_v51  ;;  %v7373_v51 = vand.u32 4294901760, %v109_v34 }
 0x159   : > { %2550 = vmatpush.msrb.mxu3 %v7220_v26  ;;  %2362 = vmatpush.msrb.mxu0 %v7260_v22  ;;  %v7365_v63 = vsub.f32 %v121_v25, %v7340_v53  ;;  %v225_v25 = vld [vmem:[#allocation5 + $0x3d0] sm:$0xff] }
 0x15a   : > { %2504 = vmatpush.msrb.mxu2 %v7264_v47  ;;  %2403 = vmatpush.msrb.mxu1 %v2402_v10  ;;  %v2449_v10 = vsub.f32 %v7334_v11, %v9491_v17  ;;  %v217_v17 = vld [vmem:[#allocation5 + $0x390] sm:$0xff] }
 0x15b   : > { %2552 = vmatpush.msrb.mxu3 %v7227_v60  ;;  %2364 = vmatpush.msrb.mxu0 %v7274_v62  ;;  %v9496_v28 = vand.u32 4294901760, %v7365_v63 }
 0x15c   : > { %2507 = vmatpush.msrb.mxu2 %v7278_v1  ;;  %2409 = vmatpush.msrb.mxu1 %v2408_v44  ;;  %v2438_v44 = vand.u32 4294901760, %v2437_v38  ;;  %v7401_v38 = vsub.f32 %v109_v34, %v7373_v51  ;;  %v2450_v21 = vand.u32 4294901760, %v2449_v10  ;;  %v2456_v10 = vand.u32 4294901760, %v2455_v4 }
 0x15d   : > { %2554 = vmatpush.msrb.mxu3 %v7237_v30  ;;  %2366 = vmatpush.msrb.mxu0 %v7287_v24  ;;  %v2461_v23 = vsub.f32 %v7365_v63, %v9496_v28 }
 0x15e   : > { %2510 = vmatpush.msrb.mxu2 %v7291_v54  ;;  %2415 = vmatpush.msrb.mxu1 %v2414_v9  ;;  %v7391_v9 = vsub.f32 %v113_v12, %v7362_v14  ;;  %v7403_v12 = vand.u32 4294901760, %v225_v25  ;;  %v9504_v57 = vand.u32 4294901760, %v7401_v38 }
 0x15f   : > { %2556 = vmatpush.msrb.mxu3 %v7247_v31  ;;  %2368 = vmatpush.msrb.mxu0 %v7295_v56  ;;  %v2462_v4 = vand.u32 4294901760, %v2461_v23 }
 0x160   : > { %2513 = vmatpush.msrb.mxu2 %v7304_v16  ;;  %2421 = vmatpush.msrb.mxu1 %v2420_v2  ;;  %v221_v2 = vld [vmem:[#allocation5 + $0x3b0] sm:$0xff]  ;;  %9734 = vst [vmem:[#allocation35_spill] sm:$0xff] %v7403_v12  ;;  %v9502_v34 = vand.u32 4294901760, %v7391_v9  ;;  %v7430_v28 = vsub.f32 %v225_v25, %v7403_v12  ;;  %v9508_v25 = vand.u32 4294901760, %v7416_v8 }
 0x161   : > { %2558 = vmatpush.msrb.mxu3 %v7260_v22  ;;  %2370 = vmatpush.msrb.mxu0 %v7308_v50  ;;  %v7418_v48 = vand.u32 4294901760, %v221_v2 }
 0x162   : > { %2516 = vmatpush.msrb.mxu2 %v7317_v32  ;;  %2427 = vmatpush.msrb.mxu1 %v2426_v41  ;;  %v9499_v41 = vand.u32 4294901760, %v7377_v46  ;;  %v2485_v39 = vsub.f32 %v7416_v8, %v9508_v25 }
 0x163   : > { %2560 = vmatpush.msrb.mxu3 %v7274_v62  ;;  %2372 = vmatpush.msrb.mxu0 %v7328_v58  ;;  %v7443_v43 = vsub.f32 %v221_v2, %v7418_v48 }
 0x164   : > { %2519 = vmatpush.msrb.mxu2 %v7322_v33  ;;  %2433 = vmatpush.msrb.mxu1 %v2432_v59  ;;  %v7408_v59 = vsub.f32 %v229_v18, %v7384_v15  ;;  %v7422_v18 = vand.u32 4294901760, %v217_v17 }
 0x165   : > { %2562 = vmatpush.msrb.mxu3 %v7287_v24  ;;  %2374 = vmatpush.msrb.mxu0 %v7340_v53 }
 0x166   : > { %2522 = vmatpush.msrb.mxu2 %v7334_v11  ;;  %2439 = vmatpush.msrb.mxu1 %v2438_v44  ;;  %v2467_v44 = vsub.f32 %v7377_v46, %v9499_v41  ;;  %v9507_v52 = vand.u32 4294901760, %v7408_v59  ;;  %v2473_v41 = vsub.f32 %v7391_v9, %v9502_v34  ;;  %v7448_v55 = vsub.f32 %v217_v17, %v7422_v18 }
 0x167   : > { %2564 = vmatpush.msrb.mxu3 %v7295_v56  ;;  %2376 = vmatpush.msrb.mxu0 %v7350_v0  ;;  %v2479_v34 = vsub.f32 %v7401_v38, %v9504_v57 }
 0x168   : > { %2525 = vmatpush.msrb.mxu2 %v7353_v61  ;;  %2445 = vmatpush.msrb.mxu1 %v2444_v3  ;;  %v209_v3 = vld [vmem:[#allocation5 + $0x350] sm:$0xff]  ;;  %v2468_v23 = vand.u32 4294901760, %v2467_v44  ;;  %v2736_v17 = vsub.f32 %v7408_v59, %v9507_v52  ;;  %v2474_v57 = vand.u32 4294901760, %v2473_v41 }
 0x169   : > { %2566 = vmatpush.msrb.mxu3 %v7308_v50  ;;  %2378 = vmatpush.msrb.mxu0 %v7362_v14  ;;  %v7455_v2 = vand.u32 4294901760, %v209_v3  ;;  %v201_v44 = vld [vmem:[#allocation5 + $0x310] sm:$0xff]  ;;  %v2480_v41 = vand.u32 4294901760, %v2479_v34  ;;  %v2486_v34 = vand.u32 4294901760, %v2485_v39 }
 0x16a   : > { %2528 = vmatpush.msrb.mxu2 %v7365_v63  ;;  %2451 = vmatpush.msrb.mxu1 %v2450_v21  ;;  %v205_v21 = vld [vmem:[#allocation5 + $0x330] sm:$0xff]  ;;  %v7483_v19 = vand.u32 4294901760, %v201_v44  ;;  %v2737_v35 = vand.u32 4294901760, %v2736_v17  ;;  %v9740_v17 = vand.u32 4294901760, %v7448_v55 }
 0x16b   : > { %2568 = vmatpush.msrb.mxu3 %v7328_v58  ;;  %2380 = vmatpush.msrb.mxu0 %v7373_v51  ;;  %v7470_v37 = vand.u32 4294901760, %v205_v21  ;;  %v197_v52 = vld [vmem:[#allocation5 + $0x2f0] sm:$0xff]  ;;  %v7481_v5 = vsub.f32 %v209_v3, %v7455_v2 }
 0x16c   : > { %2531 = vmatpush.msrb.mxu2 %v7377_v46  ;;  %2457 = vmatpush.msrb.mxu1 %v2456_v10  ;;  %v7463_v10 = vsub.f32 %v213_v29, %v7435_v36  ;;  %v193_v29 = vld [vmem:[#allocation5 + $0x2d0] sm:$0xff]  ;;  %v7496_v42 = vand.u32 4294901760, %v197_v52 }
 0x16d   : > { %2570 = vmatpush.msrb.mxu3 %v7340_v53  ;;  %2382 = vmatpush.msrb.mxu0 %v7387_v13  ;;  %v7494_v7 = vsub.f32 %v205_v21, %v7470_v37  ;;  %v7507_v21 = vsub.f32 %v201_v44, %v7483_v19 }
 0x16e   : > { %2534 = vmatpush.msrb.mxu2 %v7391_v9  ;;  %2463 = vmatpush.msrb.mxu1 %v2462_v4  ;;  %v9736_v4 = vand.u32 4294901760, %v7430_v28  ;;  %v7519_v44 = vsub.f32 %v197_v52, %v7496_v42 }
 0x16f   : > { %2572 = vmatpush.msrb.mxu3 %v7350_v0  ;;  %2589 = vmatpush.msra.mxu0 %v9735_v45  ;;  %v9737_v45 = vand.u32 4294901760, %v7240_v6  ;;  %v9739_v6 = vand.u32 4294901760, %v7251_v27  ;;  %v9741_v27 = vand.u32 4294901760, %v7264_v47  ;;  %v9743_v47 = vand.u32 4294901760, %v7278_v1 }
 0x170   : > { %2537 = vmatpush.msrb.mxu2 %v7401_v38  ;;  %2469 = vmatpush.msrb.mxu1 %v2468_v23  ;;  %v2742_v25 = vsub.f32 %v7430_v28, %v9736_v4  ;;  %v9738_v4 = vand.u32 4294901760, %v7443_v43  ;;  %v7509_v23 = vand.u32 4294901760, %v193_v29  ;;  %v9745_v1 = vand.u32 4294901760, %v7291_v54 }
 0x171   : > { %2574 = vmatpush.msrb.mxu3 %v7362_v14  ;;  %2593 = vmatpush.msra.mxu0 %v9737_v45  ;;  %v189_v45 = vld [vmem:[#allocation5 + $0x2b0] sm:$0xff]  ;;  %v9746_v54 = vand.u32 4294901760, %v7304_v16 }
 0x172   : > { %2540 = vmatpush.msrb.mxu2 %v7416_v8  ;;  %2475 = vmatpush.msrb.mxu1 %v2474_v57  ;;  %v2748_v3 = vsub.f32 %v7443_v43, %v9738_v4  ;;  %v2754_v57 = vsub.f32 %v7448_v55, %v9740_v17  ;;  %v2743_v39 = vand.u32 4294901760, %v2742_v25  ;;  %v9512_v4 = vand.u32 4294901760, %v7494_v7 }
 0x173   : > { %2576 = vmatpush.msrb.mxu3 %v7373_v51  ;;  %2597 = vmatpush.msra.mxu0 %v9739_v6  ;;  %v9742_v6 = vand.u32 4294901760, %v7463_v10  ;;  %v7521_v49 = vand.u32 4294901760, %v189_v45  ;;  %v7532_v52 = vsub.f32 %v193_v29, %v7509_v23 }
 0x174   : > { %2693 = vmatpush.msra.mxu2 %v7384_v15  ;;  %2481 = vmatpush.msrb.mxu1 %v2480_v41  ;;  %v185_v41 = vld [vmem:[#allocation5 + $0x290] sm:$0xff]  ;;  %v2749_v25 = vand.u32 4294901760, %v2748_v3  ;;  %v2777_v3 = vand.u32 4294901760, %v7507_v21 }
 0x175   : > { %2578 = vmatpush.msrb.mxu3 %v7387_v13  ;;  %2601 = vmatpush.msra.mxu0 %v9741_v27  ;;  %v2760_v17 = vsub.f32 %v7463_v10, %v9742_v6  ;;  %v2755_v27 = vand.u32 4294901760, %v2754_v57  ;;  %v7534_v6 = vand.u32 4294901760, %v185_v41  ;;  %v2772_v57 = vsub.f32 %v7494_v7, %v9512_v4 }
 0x176   : > { %2695 = vmatpush.msra.mxu2 %v7403_v12  ;;  %2487 = vmatpush.msrb.mxu1 %v2486_v34  ;;  %v181_v12 = vld [vmem:[#allocation5 + $0x270] sm:$0xff]  ;;  %v7545_v29 = vsub.f32 %v189_v45, %v7521_v49  ;;  %v9747_v4 = vand.u32 4294901760, %v7317_v32  ;;  %v9748_v32 = vand.u32 4294901760, %v7322_v33 }
 0x177   : > { %2738 = vmatpush.msra.mxu3 %v2737_v35  ;;  %2605 = vmatpush.msra.mxu0 %v9743_v47  ;;  %v9744_v35 = vand.u32 4294901760, %v7481_v5  ;;  %v7547_v47 = vand.u32 4294901760, %v181_v12  ;;  %v7558_v45 = vsub.f32 %v185_v41, %v7534_v6  ;;  %v2773_v16 = vand.u32 4294901760, %v2772_v57 }
 0x178   : > { %2656 = vmatpush.msra.mxu1 %v7213_v40  ;;  %2697 = vmatpush.msra.mxu2 %v7418_v48  ;;  %v2761_v40 = vand.u32 4294901760, %v2760_v17  ;;  %v2778_v17 = vsub.f32 %v7507_v21, %v2777_v3 }
 0x179   : > { %2744 = vmatpush.msra.mxu3 %v2743_v39  ;;  %v2766_v34 = vsub.f32 %v7481_v5, %v9744_v35  ;;  %2609 = vmatpush.msra.mxu0 %v9745_v1  ;;  %v2783_v39 = vand.u32 4294901760, %v7519_v44  ;;  %v177_v35 = vld [vmem:[#allocation5 + $0x250] sm:$0xff]  ;;  %v7571_v41 = vsub.f32 %v181_v12, %v7547_v47  ;;  %v2801_v57 = vand.u32 4294901760, %v7558_v45 }
 0x17a   : > { %2658 = vmatpush.msra.mxu1 %v7220_v26  ;;  %2699 = vmatpush.msra.mxu2 %v7422_v18  ;;  %v173_v1 = vld [vmem:[#allocation5 + $0x230] sm:$0xff]  ;;  %v9749_v12 = vand.u32 4294901760, %v7334_v11  ;;  %v9750_v11 = vand.u32 4294901760, %v7353_v61 }
 0x17b   : > { %2750 = vmatpush.msra.mxu3 %v2749_v25  ;;  %2613 = vmatpush.msra.mxu0 %v9746_v54  ;;  %v2767_v26 = vand.u32 4294901760, %v2766_v34  ;;  %v2789_v25 = vand.u32 4294901760, %v7532_v52  ;;  %v2795_v34 = vand.u32 4294901760, %v7545_v29  ;;  %v169_v54 = vld [vmem:[#allocation5 + $0x210] sm:$0xff] }
 0x17c   : > { %2660 = vmatpush.msra.mxu1 %v7227_v60  ;;  %2701 = vmatpush.msra.mxu2 %v7435_v36  ;;  %v7563_v60 = vand.u32 4294901760, %v177_v35 }
 0x17d   : > { %2756 = vmatpush.msra.mxu3 %v2755_v27  ;;  %2617 = vmatpush.msra.mxu0 %v9747_v4  ;;  %v2784_v27 = vsub.f32 %v7519_v44, %v2783_v39  ;;  %v2779_v4 = vand.u32 4294901760, %v2778_v17  ;;  %v2796_v17 = vsub.f32 %v7545_v29, %v2795_v34 }
 0x17e   : > { %2662 = vmatpush.msra.mxu1 %v7237_v30  ;;  %2703 = vmatpush.msra.mxu2 %v7455_v2  ;;  %v7576_v30 = vand.u32 4294901760, %v173_v1  ;;  %v7587_v33 = vsub.f32 %v177_v35, %v7563_v60 }
 0x17f   : > { %2762 = vmatpush.msra.mxu3 %v2761_v40  ;;  %2621 = vmatpush.msra.mxu0 %v9748_v32  ;;  %v2790_v40 = vsub.f32 %v7532_v52, %v2789_v25  ;;  %v2807_v32 = vand.u32 4294901760, %v7571_v41 }
 0x180   : > { %2664 = vmatpush.msra.mxu1 %v7247_v31  ;;  %2705 = vmatpush.msra.mxu2 %v7470_v37  ;;  %v7589_v31 = vand.u32 4294901760, %v169_v54  ;;  %v2813_v61 = vand.u32 4294901760, %v7587_v33 }
 0x181   : > { %2768 = vmatpush.msra.mxu3 %v2767_v26  ;;  %2625 = vmatpush.msra.mxu0 %v9749_v12  ;;  %v2785_v26 = vand.u32 4294901760, %v2784_v27  ;;  %v2791_v35 = vand.u32 4294901760, %v2790_v40  ;;  %v9751_v27 = vand.u32 4294901760, %v7365_v63  ;;  %v9752_v40 = vand.u32 4294901760, %v7377_v46 }
 0x182   : > { %2666 = vmatpush.msra.mxu1 %v7260_v22  ;;  %2707 = vmatpush.msra.mxu2 %v7483_v19  ;;  %v7600_v22 = vsub.f32 %v173_v1, %v7576_v30  ;;  %v2797_v1 = vand.u32 4294901760, %v2796_v17  ;;  %v2814_v12 = vsub.f32 %v7587_v33, %v2813_v61 }
 0x183   : > { %2774 = vmatpush.msra.mxu3 %v2773_v16  ;;  %2629 = vmatpush.msra.mxu0 %v9750_v11  ;;  %v2802_v16 = vsub.f32 %v7558_v45, %v2801_v57 }
 0x184   : > { %2668 = vmatpush.msra.mxu1 %v7274_v62  ;;  %2709 = vmatpush.msra.mxu2 %v7496_v42  ;;  %v7611_v62 = vsub.f32 %v169_v54, %v7589_v31  ;;  %v9753_v54 = vand.u32 4294901760, %v7391_v9  ;;  %v2815_v17 = vand.u32 4294901760, %v2814_v12 }
 0x185   : > { %2780 = vmatpush.msra.mxu3 %v2779_v4  ;;  %2633 = vmatpush.msra.mxu0 %v9751_v27  ;;  %v2808_v4 = vsub.f32 %v7571_v41, %v2807_v32  ;;  %v2803_v63 = vand.u32 4294901760, %v2802_v16 }
 0x186   : > { %2670 = vmatpush.msra.mxu1 %v7287_v24  ;;  %2711 = vmatpush.msra.mxu2 %v7509_v23  ;;  %v2819_v24 = vand.u32 4294901760, %v7600_v22  ;;  %v2825_v46 = vand.u32 4294901760, %v7611_v62 }
 0x187   : > { %2786 = vmatpush.msra.mxu3 %v2785_v26  ;;  %2637 = vmatpush.msra.mxu0 %v9752_v40  ;;  %v9754_v26 = vand.u32 4294901760, %v7401_v38 }
 0x188   : > { %2672 = vmatpush.msra.mxu1 %v7295_v56  ;;  %2713 = vmatpush.msra.mxu2 %v7521_v49  ;;  %v2809_v56 = vand.u32 4294901760, %v2808_v4  ;;  %v2820_v9 = vsub.f32 %v7600_v22, %v2819_v24  ;;  %v2826_v38 = vsub.f32 %v7611_v62, %v2825_v46 }
 0x189   : > { %2792 = vmatpush.msra.mxu3 %v2791_v35  ;;  %2641 = vmatpush.msra.mxu0 %v9753_v54  ;;  %v9759_v35 = vld [vmem:[#allocation29_spill] sm:$0xff]  ;;  %v253_v54 = vld [vmem:[#allocation5 + $0x4b0] sm:$0xff] }
 0x18a   : > { %2674 = vmatpush.msra.mxu1 %v7308_v50  ;;  %2715 = vmatpush.msra.mxu2 %v7534_v6  ;;  %v9755_v50 = vand.u32 4294901760, %v7416_v8  ;;  %v2821_v11 = vand.u32 4294901760, %v2820_v9  ;;  %v9757_v8 = vld [vmem:[#allocation28_spill] sm:$0xff]  ;;  %v9771_v9 = vld [vmem:[#allocation33_spill] sm:$0xff] }
 0x18b   : > { %2798 = vmatpush.msra.mxu3 %v2797_v1  ;;  %2645 = vmatpush.msra.mxu0 %v9754_v26  ;;  %v257_v1 = vld [vmem:[#allocation5 + $0x4d0] sm:$0xff] }
 0x18c   : > { %2676 = vmatpush.msra.mxu1 %v7328_v58  ;;  %2717 = vmatpush.msra.mxu2 %v7547_v47  ;;  %v9756_v58 = vld [vmem:[#allocation31_spill] sm:$0xff] }
 0x18d   : > { %2804 = vmatpush.msra.mxu3 %v2803_v63  ;;  %2649 = vmatpush.msra.mxu0 %v9755_v50  ;;  %v249_v50 = vld [vmem:[#allocation5 + $0x490] sm:$0xff] }
 0x18e   : > { %2678 = vmatpush.msra.mxu1 %v7340_v53  ;;  %2719 = vmatpush.msra.mxu2 %v7563_v60  ;;  %v2827_v53 = vand.u32 4294901760, %v2826_v38  ;;  %v7829_v38 = vand.u32 4294901760, %v253_v54 }
 0x18f   : > { %2810 = vmatpush.msra.mxu3 %v2809_v56  ;;  %2388 = vmatmul.f32.vlgmr.msrb.gmra.mxu0 %v9756_v58  ;;  %v7818_v56 = vand.u32 4294901760, %v257_v1  ;;  %v118_v58 = vld [vmem:[#allocation5 + $0x78] sm:$0xff] }
 0x190   : > { %2680 = vmatpush.msra.mxu1 %v7350_v0  ;;  %2836 = vmatpush.msrb.mxu0 %v7408_v59  ;;  %v9758_v0 = vand.u32 4294901760, %v7408_v59  ;;  %v9763_v59 = vld [vmem:[#allocation35_spill] sm:$0xff] }
 0x191   : > { %2721 = vmatpush.msra.mxu2 %v7576_v30  ;;  %2816 = vmatpush.msra.mxu3 %v2815_v17 }
 0x192   : > { %2682 = vmatpush.msra.mxu1 %v7362_v14  ;;  %2839 = vmatpush.msrb.mxu0 %v7430_v28  ;;  %v9760_v14 = vand.u32 4294901760, %v7430_v28  ;;  %v9764_v28 = vand.u32 4294901760, %v7448_v55 }
 0x193   : > { %2723 = vmatpush.msra.mxu2 %v7589_v31  ;;  %2822 = vmatpush.msra.mxu3 %v2821_v11 }
 0x194   : > { %2543 = vmatmul.f32.vlgmr.msrb.gmra.mxu2 %v9757_v8  ;;  %2842 = vmatpush.msrb.mxu0 %v7443_v43 }
 0x195   : > { %2930 = vmatpush.msrb.mxu2 %v9758_v0  ;;  %2684 = vmatpush.msra.mxu1 %v7373_v51  ;;  %v9762_v51 = vand.u32 4294901760, %v7443_v43  ;;  %v9766_v43 = vand.u32 4294901760, %v7463_v10 }
 0x196   : > { %2828 = vmatpush.msra.mxu3 %v2827_v53  ;;  %2845 = vmatpush.msrb.mxu0 %v7448_v55  ;;  %v138_v55 = vld [vmem:[#allocation5 + $0x118] sm:$0xff] }
 0x197   : > { %2582 = vmatmul.f32.vlgmr.msrb.gmra.mxu3 %v9759_v35  ;;  %2934 = vmatpush.msrb.mxu2 %v9760_v14  ;;  %v245_v14 = vld [vmem:[#allocation5 + $0x470] sm:$0xff]  ;;  %v130_v35 = vld [vmem:[#allocation5 + $0xd8] sm:$0xff] }
 0x198   : > { %2997 = vmatpush.msrb.mxu3 %v7384_v15  ;;  %2686 = vmatpush.msra.mxu1 %v7387_v13  ;;  %v9765_v13 = vld [vmem:[#allocation26_spill] sm:$0xff]  ;;  %v8018_v16 = vand.u32 4294901760, %v130_v35 }
 0x199   : > { %2848 = vmatpush.msrb.mxu0 %v7463_v10  ;;  %5305 = vmatmul.msk.f32.vlgmr.msrb.gmra.mxu1 %vm5992_vm0, %v9683_v20  ;;  %v277_v10 = vld [vmem:[#allocation5 + $0x570] sm:$0xff] }
 0x19a   : > { %2938 = vmatpush.msrb.mxu2 %v9762_v51  ;;  %2889 = vmatpush.msrb.mxu1 %v7384_v15  ;;  %v9768_v15 = vand.u32 4294901760, %v7481_v5 }
 0x19b   : > { %2999 = vmatpush.msrb.mxu3 %v9763_v59  ;;  %2851 = vmatpush.msrb.mxu0 %v7481_v5  ;;  %v293_v5 = vld [vmem:[#allocation5 + $0x5f0] sm:$0xff] }
 0x19c   : > { %2942 = vmatpush.msrb.mxu2 %v9764_v28  ;;  %2891 = vmatpush.msrb.mxu1 %v9763_v59  ;;  %v7841_v59 = vand.u32 4294901760, %v249_v50 }
 0x19d   : > { %3001 = vmatpush.msrb.mxu3 %v7418_v48  ;;  %2729 = vmatmul.f32.vlgmr.msra.gmra.mxu2 %v9765_v13  ;;  %v9777_v13 = vld [vmem:[#allocation24_spill] sm:$0xff] }
 0x19e   : > { %2854 = vmatpush.msrb.mxu0 %v7494_v7  ;;  %2893 = vmatpush.msrb.mxu1 %v7418_v48  ;;  %v9769_v48 = vand.u32 4294901760, %v7494_v7  ;;  %v289_v7 = vld [vmem:[#allocation5 + $0x5d0] sm:$0xff] }
 0x19f   : > { %2946 = vmatpush.msrb.mxu2 %v9766_v43  ;;  %3003 = vmatpush.msrb.mxu3 %v7422_v18  ;;  %v7845_v43 = vsub.f32 %v257_v1, %v7818_v56 }
 0x1a0   : > { %5306 = vmatmul.msk.f32.vlgmr.msra.gmra.mxu0 %vm5992_vm0, %v9683_v20  ;;  %5308 = vmatmul.msk.f32.vlgmr.msra.gmra.mxu3 %vm6080_vm1, %v9683_v20 }
 0x1a1   : > { %2857 = vmatpush.msrb.mxu0 %v7507_v21  ;;  %2895 = vmatpush.msrb.mxu1 %v7422_v18  ;;  %v7722_v18 = vand.u32 4294901760, %v289_v7 }
 0x1a2   : > { %2950 = vmatpush.msrb.mxu2 %v9768_v15  ;;  %3005 = vmatpush.msrb.mxu3 %v7435_v36 }
 0x1a3   : > { %5307 = vmatmul.msk.f32.vlgmr.msra.gmra.mxu1 %vm5992_vm0, %v9683_v20  ;;  %2860 = vmatpush.msrb.mxu0 %v7519_v44  ;;  %v7742_v21 = vsub.f32 %v289_v7, %v7722_v18  ;;  %v273_v44 = vld [vmem:[#allocation5 + $0x550] sm:$0xff]  ;;  %v7853_v7 = vand.u32 4294901760, %v245_v14 }
 0x1a4   : > { %2897 = vmatpush.msrb.mxu1 %v7435_v36  ;;  %2954 = vmatpush.msrb.mxu2 %v9769_v48  ;;  %v7715_v36 = vand.u32 4294901760, %v293_v5  ;;  %v241_v48 = vld [vmem:[#allocation5 + $0x450] sm:$0xff] }
 0x1a5   : > { %3007 = vmatpush.msrb.mxu3 %v7455_v2  ;;  %2863 = vmatpush.msrb.mxu0 %v7532_v52 }
 0x1a6   : > { %2899 = vmatpush.msrb.mxu1 %v7455_v2  ;;  %2958 = vmatpush.msrb.mxu2 %v2777_v3  ;;  %v7746_v3 = vand.u32 4294901760, %v277_v10 }
 0x1a7   : > { %3009 = vmatpush.msrb.mxu3 %v7470_v37  ;;  %2866 = vmatpush.msrb.mxu0 %v7545_v29  ;;  %v7757_v29 = vand.u32 4294901760, %v273_v44 }
 0x1a8   : > { %2901 = vmatpush.msrb.mxu1 %v7470_v37  ;;  %2962 = vmatpush.msrb.mxu2 %v2783_v39  ;;  %v285_v37 = vld [vmem:[#allocation5 + $0x5b0] sm:$0xff]  ;;  %v9770_v39 = vld [vmem:[#allocation32_spill] sm:$0xff] }
 0x1a9   : > { %3011 = vmatpush.msrb.mxu3 %v7483_v19  ;;  %2869 = vmatpush.msrb.mxu0 %v7558_v45  ;;  %v7729_v2 = vand.u32 4294901760, %v285_v37 }
 0x1aa   : > { %2903 = vmatpush.msrb.mxu1 %v7483_v19  ;;  %2966 = vmatpush.msrb.mxu2 %v2789_v25  ;;  %v281_v19 = vld [vmem:[#allocation5 + $0x590] sm:$0xff] }
 0x1ab   : > { %3013 = vmatpush.msrb.mxu3 %v7496_v42  ;;  %2872 = vmatpush.msrb.mxu0 %v7571_v41  ;;  %v7753_v52 = vsub.f32 %v285_v37, %v7729_v2  ;;  %v269_v25 = vld [vmem:[#allocation5 + $0x530] sm:$0xff] }
 0x1ac   : > { %2905 = vmatpush.msrb.mxu1 %v7496_v42  ;;  %2970 = vmatpush.msrb.mxu2 %v2795_v34  ;;  %v7732_v42 = vsub.f32 %v293_v5, %v7715_v36  ;;  %v7769_v34 = vsub.f32 %v277_v10, %v7746_v3 }
 0x1ad   : > { %3015 = vmatpush.msrb.mxu3 %v7509_v23  ;;  %2875 = vmatpush.msrb.mxu0 %v7587_v33  ;;  %v9523_v33 = vand.u32 4294901760, %v7753_v52 }
 0x1ae   : > { %2907 = vmatpush.msrb.mxu1 %v7509_v23  ;;  %2974 = vmatpush.msrb.mxu2 %v2801_v57  ;;  %v7739_v23 = vand.u32 4294901760, %v281_v19  ;;  %v7777_v57 = vand.u32 4294901760, %v269_v25 }
 0x1af   : > { %3017 = vmatpush.msrb.mxu3 %v7521_v49  ;;  %2878 = vmatpush.msrb.mxu0 %v7600_v22  ;;  %v3089_v40 = vsub.f32 %v7753_v52, %v9523_v33  ;;  %v146_v33 = vld [vmem:[#allocation5 + $0x158] sm:$0xff] }
 0x1b0   : > { %2909 = vmatpush.msrb.mxu1 %v7521_v49  ;;  %2978 = vmatpush.msrb.mxu2 %v2807_v32  ;;  %v9526_v49 = vand.u32 4294901760, %v7732_v42  ;;  %v7764_v45 = vsub.f32 %v281_v19, %v7739_v23  ;;  %v261_v32 = vld [vmem:[#allocation5 + $0x4f0] sm:$0xff]  ;;  %v7857_v19 = vsub.f32 %v253_v54, %v7829_v38  ;;  %v166_v54 = vld [vmem:[#allocation5 + $0x1f8] sm:$0xff] }
 0x1b1   : > { %3019 = vmatpush.msrb.mxu3 %v7534_v6  ;;  %2881 = vmatpush.msrb.mxu0 %v7611_v62  ;;  %v9521_v62 = vand.u32 4294901760, %v7769_v34  ;;  %v3090_v17 = vand.u32 4294901760, %v3089_v40  ;;  %v7879_v40 = vsub.f32 %v245_v14, %v7853_v7  ;;  %v7895_v14 = vand.u32 4294901760, %v166_v54 }
 0x1b2   : > { %2911 = vmatpush.msrb.mxu1 %v7534_v6  ;;  %2982 = vmatpush.msrb.mxu2 %v2813_v61  ;;  %v9525_v6 = vand.u32 4294901760, %v7742_v21  ;;  %v3077_v41 = vsub.f32 %v7732_v42, %v9526_v49  ;;  %v9522_v61 = vand.u32 4294901760, %v7764_v45  ;;  %v9772_v49 = vld [vmem:[#allocation22_spill] sm:$0xff] }
 0x1b3   : > { %3021 = vmatpush.msrb.mxu3 %v7547_v47  ;;  %2884 = vmatmul.f32.vlgmr.msrb.gmra.mxu0 %v9770_v39  ;;  %v134_v39 = vld [vmem:[#allocation5 + $0xf8] sm:$0xff] }
 0x1b4   : > { %2913 = vmatpush.msrb.mxu1 %v7547_v47  ;;  %3034 = vmatpush.msra.mxu0 %v7715_v36  ;;  %v265_v47 = vld [vmem:[#allocation5 + $0x510] sm:$0xff]  ;;  %v3083_v22 = vsub.f32 %v7742_v21, %v9525_v6  ;;  %v3078_v4 = vand.u32 4294901760, %v3077_v41  ;;  %v7869_v41 = vsub.f32 %v249_v50, %v7841_v59  ;;  %v8005_v8 = vand.u32 4294901760, %v134_v39 }
 0x1b5   : > { %2986 = vmatpush.msrb.mxu2 %v2819_v24  ;;  %3023 = vmatpush.msrb.mxu3 %v7563_v60  ;;  %v7792_v27 = vand.u32 4294901760, %v265_v47  ;;  %v7805_v24 = vand.u32 4294901760, %v261_v32 }
 0x1b6   : > { %2915 = vmatpush.msrb.mxu1 %v7563_v60  ;;  %3036 = vmatpush.msra.mxu0 %v7722_v18  ;;  %v7785_v60 = vsub.f32 %v273_v44, %v7757_v29  ;;  %v3084_v12 = vand.u32 4294901760, %v3083_v22 }
 0x1b7   : > { %2990 = vmatpush.msrb.mxu2 %v2825_v46  ;;  %3025 = vmatpush.msrb.mxu3 %v7576_v30  ;;  %v3095_v46 = vsub.f32 %v7764_v45, %v9522_v61  ;;  %v7821_v26 = vsub.f32 %v265_v47, %v7792_v27  ;;  %v7833_v53 = vsub.f32 %v261_v32, %v7805_v24  ;;  %v9513_v47 = vand.u32 4294901760, %v7845_v43  ;;  %v237_v32 = vld [vmem:[#allocation5 + $0x430] sm:$0xff] }
 0x1b8   : > { %5309 = vmatmul.msk.f32.vlgmr.msrb.gmra.mxu2 %vm6080_vm1, %v9683_v20  ;;  %3038 = vmatpush.msra.mxu0 %v7729_v2  ;;  %v9519_v63 = vand.u32 4294901760, %v7785_v60 }
 0x1b9   : > { %3177 = vmatpush.msra.mxu2 %v7732_v42  ;;  %2917 = vmatpush.msrb.mxu1 %v7576_v30  ;;  %v7808_v30 = vsub.f32 %v269_v25, %v7777_v57  ;;  %v3096_v51 = vand.u32 4294901760, %v3095_v46  ;;  %v9516_v28 = vand.u32 4294901760, %v7821_v26  ;;  %v9515_v37 = vand.u32 4294901760, %v7833_v53  ;;  %v233_v46 = vld [vmem:[#allocation5 + $0x410] sm:$0xff] }
 0x1ba   : > { %3027 = vmatpush.msrb.mxu3 %v7589_v31  ;;  %3040 = vmatpush.msra.mxu0 %v7739_v23  ;;  %v3107_v0 = vsub.f32 %v7785_v60, %v9519_v63  ;;  %v7865_v25 = vand.u32 4294901760, %v241_v48  ;;  %v3131_v50 = vsub.f32 %v7845_v43, %v9513_v47  ;;  %v158_v47 = vld [vmem:[#allocation5 + $0x1b8] sm:$0xff] }
 0x1bb   : > { %5310 = vmatmul.msk.f32.vlgmr.msrb.gmra.mxu3 %vm6080_vm1, %v9683_v20  ;;  %3180 = vmatpush.msra.mxu2 %v7742_v21  ;;  %v9518_v11 = vand.u32 4294901760, %v7808_v30  ;;  %v3119_v44 = vsub.f32 %v7821_v26, %v9516_v28  ;;  %v3125_v1 = vsub.f32 %v7833_v53, %v9515_v37  ;;  %v154_v28 = vld [vmem:[#allocation5 + $0x198] sm:$0xff] }
 0x1bc   : > { %3230 = vmatpush.msra.mxu3 %v7715_v36  ;;  %2919 = vmatpush.msrb.mxu1 %v7589_v31  ;;  %v3101_v31 = vsub.f32 %v7769_v34, %v9521_v62  ;;  %v3108_v10 = vand.u32 4294901760, %v3107_v0  ;;  %v7891_v0 = vsub.f32 %v241_v48, %v7865_v25  ;;  %v9520_v48 = vand.u32 4294901760, %v7879_v40  ;;  %v150_v63 = vld [vmem:[#allocation5 + $0x178] sm:$0xff] }
 0x1bd   : > { %3042 = vmatpush.msra.mxu0 %v7746_v3  ;;  %2923 = vmatmul.f32.vlgmr.msrb.gmra.mxu1 %v9771_v9  ;;  %v3113_v5 = vsub.f32 %v7808_v30, %v9518_v11  ;;  %v7928_v11 = vand.u32 4294901760, %v158_v47  ;;  %v7945_v61 = vand.u32 4294901760, %v150_v63  ;;  %v122_v20 = vld [vmem:[#allocation5 + $0x98] sm:$0xff] }
 0x1be   : > { %3183 = vmatpush.msra.mxu2 %v7753_v52  ;;  %3079 = vmatpush.msra.mxu1 %v3078_v4  ;;  %v3102_v15 = vand.u32 4294901760, %v3101_v31  ;;  %v9514_v4 = vand.u32 4294901760, %v7857_v19  ;;  %v3120_v31 = vand.u32 4294901760, %v3119_v44 }
 0x1bf   : > { %3232 = vmatpush.msra.mxu3 %v7722_v18  ;;  %3044 = vmatpush.msra.mxu0 %v7757_v29  ;;  %v3114_v22 = vand.u32 4294901760, %v3113_v5 }
 0x1c0   : > { %3186 = vmatpush.msra.mxu2 %v7764_v45  ;;  %3085 = vmatpush.msra.mxu1 %v3084_v12  ;;  %v7883_v12 = vand.u32 4294901760, %v237_v32  ;;  %v3137_v5 = vsub.f32 %v7857_v19, %v9514_v4  ;;  %v9524_v4 = vand.u32 4294901760, %v7891_v0 }
 0x1c1   : > { %3234 = vmatpush.msra.mxu3 %v7729_v2  ;;  %3046 = vmatpush.msra.mxu0 %v7777_v57 }
 0x1c2   : > { %3189 = vmatpush.msra.mxu2 %v7769_v34  ;;  %3091 = vmatpush.msra.mxu1 %v3090_v17  ;;  %v9517_v17 = vand.u32 4294901760, %v7869_v41  ;;  %v7907_v44 = vsub.f32 %v237_v32, %v7883_v12  ;;  %v7919_v32 = vsub.f32 %v166_v54, %v7895_v14 }
 0x1c3   : > { %3236 = vmatpush.msra.mxu3 %v7739_v23  ;;  %3048 = vmatpush.msra.mxu0 %v7792_v27 }
 0x1c4   : > { %3192 = vmatpush.msra.mxu2 %v7785_v60  ;;  %3097 = vmatpush.msra.mxu1 %v3096_v51  ;;  %v162_v51 = vld [vmem:[#allocation5 + $0x1d8] sm:$0xff]  ;;  %v9527_v54 = vand.u32 4294901760, %v7907_v44  ;;  %v9529_v62 = vand.u32 4294901760, %v7919_v32 }
 0x1c5   : > { %3238 = vmatpush.msra.mxu3 %v7746_v3  ;;  %3050 = vmatpush.msra.mxu0 %v7805_v24  ;;  %v7914_v37 = vand.u32 4294901760, %v162_v51 }
 0x1c6   : > { %3195 = vmatpush.msra.mxu2 %v7808_v30  ;;  %3103 = vmatpush.msra.mxu1 %v3102_v15  ;;  %v3126_v15 = vand.u32 4294901760, %v3125_v1  ;;  %v3143_v1 = vsub.f32 %v7869_v41, %v9517_v17 }
 0x1c7   : > { %3240 = vmatpush.msra.mxu3 %v7757_v29  ;;  %3052 = vmatpush.msra.mxu0 %v7818_v56 }
 0x1c8   : > { %3198 = vmatpush.msra.mxu2 %v7821_v26  ;;  %3109 = vmatpush.msra.mxu1 %v3108_v10  ;;  %v7901_v10 = vand.u32 4294901760, %v233_v46 }
 0x1c9   : > { %3242 = vmatpush.msra.mxu3 %v7777_v57  ;;  %3054 = vmatpush.msra.mxu0 %v7829_v38 }
 0x1ca   : > { %3201 = vmatpush.msra.mxu2 %v7833_v53  ;;  %3115 = vmatpush.msra.mxu1 %v3114_v22  ;;  %v3132_v22 = vand.u32 4294901760, %v3131_v50  ;;  %v3149_v50 = vsub.f32 %v7879_v40, %v9520_v48  ;;  %v7926_v17 = vsub.f32 %v233_v46, %v7901_v10  ;;  %v3155_v46 = vsub.f32 %v7891_v0, %v9524_v4 }
 0x1cb   : > { %3244 = vmatpush.msra.mxu3 %v7792_v27  ;;  %3056 = vmatpush.msra.mxu0 %v7841_v59  ;;  %v7940_v48 = vsub.f32 %v162_v51, %v7914_v37  ;;  %v7950_v4 = vsub.f32 %v158_v47, %v7928_v11  ;;  %v3161_v51 = vsub.f32 %v7907_v44, %v9527_v54  ;;  %v7962_v47 = vand.u32 4294901760, %v146_v33 }
 0x1cc   : > { %3204 = vmatpush.msra.mxu2 %v7845_v43  ;;  %3121 = vmatpush.msra.mxu1 %v3120_v31  ;;  %v3138_v31 = vand.u32 4294901760, %v3137_v5  ;;  %v3144_v5 = vand.u32 4294901760, %v3143_v1  ;;  %v3418_v54 = vsub.f32 %v7919_v32, %v9529_v62 }
 0x1cd   : > { %3246 = vmatpush.msra.mxu3 %v7805_v24  ;;  %3058 = vmatpush.msra.mxu0 %v7853_v7  ;;  %v3162_v62 = vand.u32 4294901760, %v3161_v51 }
 0x1ce   : > { %3207 = vmatpush.msra.mxu2 %v7857_v19  ;;  %3127 = vmatpush.msra.mxu1 %v3126_v15  ;;  %v7933_v15 = vand.u32 4294901760, %v154_v28  ;;  %v3419_v51 = vand.u32 4294901760, %v3418_v54 }
 0x1cf   : > { %3248 = vmatpush.msra.mxu3 %v7818_v56  ;;  %3060 = vmatpush.msra.mxu0 %v7865_v25 }
 0x1d0   : > { %3210 = vmatpush.msra.mxu2 %v7869_v41  ;;  %3133 = vmatpush.msra.mxu1 %v3132_v22  ;;  %v3150_v22 = vand.u32 4294901760, %v3149_v50  ;;  %v7958_v6 = vsub.f32 %v154_v28, %v7933_v15  ;;  %v3156_v50 = vand.u32 4294901760, %v3155_v46  ;;  %v7970_v28 = vsub.f32 %v150_v63, %v7945_v61  ;;  %v9781_v63 = vld [vmem:[#allocation25_spill] sm:$0xff] }
 0x1d1   : > { %3250 = vmatpush.msra.mxu3 %v7829_v38  ;;  %3062 = vmatpush.msra.mxu0 %v7883_v12  ;;  %v9774_v46 = vand.u32 4294901760, %v7926_v17 }
 0x1d2   : > { %3213 = vmatpush.msra.mxu2 %v7879_v40  ;;  %3139 = vmatpush.msra.mxu1 %v3138_v31  ;;  %v142_v31 = vld [vmem:[#allocation5 + $0x138] sm:$0xff]  ;;  %v9780_v54 = vand.u32 4294901760, %v7958_v6 }
 0x1d3   : > { %3252 = vmatpush.msra.mxu3 %v7841_v59  ;;  %3064 = vmatpush.msra.mxu0 %v7901_v10  ;;  %v3167_v1 = vsub.f32 %v7926_v17, %v9774_v46  ;;  %v7978_v9 = vand.u32 4294901760, %v142_v31  ;;  %v7989_v46 = vsub.f32 %v146_v33, %v7962_v47 }
 0x1d4   : > { %3216 = vmatpush.msra.mxu2 %v7891_v0  ;;  %3145 = vmatpush.msra.mxu1 %v3144_v5  ;;  %v9773_v5 = vand.u32 4294901760, %v7732_v42  ;;  %v9775_v42 = vand.u32 4294901760, %v7742_v21  ;;  %v9778_v21 = vand.u32 4294901760, %v7753_v52  ;;  %v3436_v52 = vsub.f32 %v7958_v6, %v9780_v54 }
 0x1d5   : > { %3254 = vmatpush.msra.mxu3 %v7853_v7  ;;  %3070 = vmatmul.f32.vlgmr.msra.gmra.mxu0 %v9772_v49  ;;  %v7991_v49 = vand.u32 4294901760, %v138_v55 }
 0x1d6   : > { %3219 = vmatpush.msra.mxu2 %v7907_v44  ;;  %3271 = vmatpush.msrb.mxu0 %v9773_v5 }
 0x1d7   : > { %3151 = vmatpush.msra.mxu1 %v3150_v22  ;;  %3256 = vmatpush.msra.mxu3 %v7865_v25  ;;  %v9776_v22 = vand.u32 4294901760, %v7940_v48 }
 0x1d8   : > { %3222 = vmatpush.msra.mxu2 %v7926_v17  ;;  %3275 = vmatpush.msrb.mxu0 %v9775_v42  ;;  %v9779_v42 = vand.u32 4294901760, %v7950_v4 }
 0x1d9   : > { %3157 = vmatpush.msra.mxu1 %v3156_v50  ;;  %v3424_v5 = vsub.f32 %v7940_v48, %v9776_v22  ;;  %3258 = vmatpush.msra.mxu3 %v7883_v12  ;;  %v3168_v50 = vand.u32 4294901760, %v3167_v1  ;;  %v8003_v22 = vsub.f32 %v142_v31, %v7978_v9  ;;  %v9782_v1 = vand.u32 4294901760, %v7764_v45 }
 0x1da   : > { %3225 = vmatmul.f32.vlgmr.msra.gmra.mxu2 %v9777_v13  ;;  %3279 = vmatpush.msrb.mxu0 %v9778_v21  ;;  %v3430_v33 = vsub.f32 %v7950_v4, %v9779_v42  ;;  %v126_v21 = vld [vmem:[#allocation5 + $0xb8] sm:$0xff]  ;;  %v8016_v31 = vsub.f32 %v138_v55, %v7991_v49  ;;  %v9784_v45 = vand.u32 4294901760, %v7769_v34  ;;  %v8028_v55 = vsub.f32 %v134_v39, %v8005_v8 }
 0x1db   : > { %3375 = vmatpush.msrb.mxu2 %v7895_v14  ;;  %3163 = vmatpush.msra.mxu1 %v3162_v62  ;;  %v3425_v13 = vand.u32 4294901760, %v3424_v5  ;;  %v9783_v62 = vand.u32 4294901760, %v7970_v28  ;;  %v8030_v42 = vand.u32 4294901760, %v126_v21  ;;  %v9786_v34 = vand.u32 4294901760, %v7989_v46 }
 0x1dc   : > { %3260 = vmatpush.msra.mxu3 %v7901_v10  ;;  %3283 = vmatpush.msrb.mxu0 %v9782_v1  ;;  %v3431_v5 = vand.u32 4294901760, %v3430_v33  ;;  %v9532_v1 = vand.u32 4294901760, %v8003_v22  ;;  %v8040_v39 = vsub.f32 %v130_v35, %v8018_v16  ;;  %v114_v33 = vld [vmem:[#allocation5 + $0x58] sm:$0xff] }
 0x1dd   : > { %3264 = vmatmul.f32.vlgmr.msra.gmra.mxu3 %v9781_v63  ;;  %3377 = vmatpush.msrb.mxu2 %v7914_v37  ;;  %v3442_v54 = vsub.f32 %v7970_v28, %v9783_v62  ;;  %v9785_v63 = vld [vmem:[#allocation23_spill] sm:$0xff]  ;;  %v8042_v62 = vand.u32 4294901760, %v122_v20  ;;  %v8053_v35 = vsub.f32 %v126_v21, %v8030_v42 }
 0x1de   : > { %3420 = vmatpush.msrb.mxu3 %v3419_v51  ;;  %3169 = vmatpush.msra.mxu1 %v3168_v50  ;;  %v3437_v51 = vand.u32 4294901760, %v3436_v52  ;;  %v3448_v50 = vsub.f32 %v7989_v46, %v9786_v34  ;;  %v8055_v34 = vand.u32 4294901760, %v118_v58 }
 0x1df   : > { %3287 = vmatpush.msrb.mxu0 %v9784_v45  ;;  %3171 = vmatmul.f32.vlgmr.msra.gmra.mxu1 %v9785_v63  ;;  %v9787_v45 = vand.u32 4294901760, %v7785_v60  ;;  %v3443_v52 = vand.u32 4294901760, %v3442_v54  ;;  %v9788_v60 = vand.u32 4294901760, %v7808_v30  ;;  %v9789_v54 = vand.u32 4294901760, %v8016_v31 }
 0x1e0   : > { %3379 = vmatpush.msrb.mxu2 %v7928_v11  ;;  %3338 = vmatpush.msrb.mxu1 %v7715_v36  ;;  %v8066_v21 = vsub.f32 %v122_v20, %v8042_v62  ;;  %v9790_v36 = vand.u32 4294901760, %v7821_v26  ;;  %v8071_v30 = vand.u32 4294901760, %v114_v33  ;;  %v8079_v20 = vsub.f32 %v118_v58, %v8055_v34 }
 0x1e1   : > { %3426 = vmatpush.msrb.mxu3 %v3425_v13  ;;  %3291 = vmatpush.msrb.mxu0 %v9787_v45  ;;  %v3454_v13 = vsub.f32 %v8003_v22, %v9532_v1  ;;  %v3471_v45 = vand.u32 4294901760, %v8040_v39  ;;  %v110_v1 = vld [vmem:[#allocation5 + $0x38] sm:$0xff]  ;;  %v9792_v26 = vand.u32 4294901760, %v7833_v53  ;;  %v9793_v58 = vand.u32 4294901760, %v7845_v43 }
 0x1e2   : > { %3381 = vmatpush.msrb.mxu2 %v7933_v15  ;;  %3340 = vmatpush.msrb.mxu1 %v7722_v18  ;;  %v3449_v18 = vand.u32 4294901760, %v3448_v50  ;;  %v8095_v53 = vsub.f32 %v114_v33, %v8071_v30  ;;  %v9794_v43 = vand.u32 4294901760, %v7857_v19 }
 0x1e3   : > { %3432 = vmatpush.msrb.mxu3 %v3431_v5  ;;  %3295 = vmatpush.msrb.mxu0 %v9788_v60  ;;  %v3460_v5 = vsub.f32 %v8016_v31, %v9789_v54  ;;  %v3477_v60 = vand.u32 4294901760, %v8053_v35  ;;  %v106_v54 = vld [vmem:[#allocation5 + $0x18] sm:$0xff] }
 0x1e4   : > { %3383 = vmatpush.msrb.mxu2 %v7945_v61  ;;  %3342 = vmatpush.msrb.mxu1 %v7729_v2  ;;  %v3455_v2 = vand.u32 4294901760, %v3454_v13  ;;  %v3483_v13 = vand.u32 4294901760, %v8066_v21  ;;  %v3495_v19 = vand.u32 4294901760, %v8095_v53 }
 0x1e5   : > { %3438 = vmatpush.msrb.mxu3 %v3437_v51  ;;  %3299 = vmatpush.msrb.mxu0 %v9790_v36  ;;  %v9791_v51 = vand.u32 4294901760, %v8028_v55  ;;  %v8084_v36 = vand.u32 4294901760, %v110_v1 }
 0x1e6   : > { %3385 = vmatpush.msrb.mxu2 %v7962_v47  ;;  %3344 = vmatpush.msrb.mxu1 %v7739_v23  ;;  %v3461_v23 = vand.u32 4294901760, %v3460_v5  ;;  %v3489_v5 = vand.u32 4294901760, %v8079_v20 }
 0x1e7   : > { %3444 = vmatpush.msrb.mxu3 %v3443_v52  ;;  %v3466_v50 = vsub.f32 %v8028_v55, %v9791_v51  ;;  %3303 = vmatpush.msrb.mxu0 %v9792_v26  ;;  %v3472_v52 = vsub.f32 %v8040_v39, %v3471_v45  ;;  %v8097_v51 = vand.u32 4294901760, %v106_v54  ;;  %v8108_v33 = vsub.f32 %v110_v1, %v8084_v36 }
 0x1e8   : > { %3387 = vmatpush.msrb.mxu2 %v7978_v9  ;;  %3346 = vmatpush.msrb.mxu1 %v7746_v3  ;;  %v3490_v1 = vsub.f32 %v8079_v20, %v3489_v5 }
 0x1e9   : > { %3450 = vmatpush.msrb.mxu3 %v3449_v18  ;;  %3307 = vmatpush.msrb.mxu0 %v9793_v58  ;;  %v3467_v3 = vand.u32 4294901760, %v3466_v50  ;;  %v3478_v18 = vsub.f32 %v8053_v35, %v3477_v60  ;;  %v9795_v50 = vand.u32 4294901760, %v7869_v41  ;;  %v8119_v26 = vsub.f32 %v106_v54, %v8097_v51 }
 0x1ea   : > { %3389 = vmatpush.msrb.mxu2 %v7991_v49  ;;  %3348 = vmatpush.msrb.mxu1 %v7757_v29  ;;  %v3473_v29 = vand.u32 4294901760, %v3472_v52  ;;  %v3501_v41 = vand.u32 4294901760, %v8108_v33  ;;  %v9797_v52 = vand.u32 4294901760, %v7891_v0  ;;  %v3491_v58 = vand.u32 4294901760, %v3490_v1 }
 0x1eb   : > { %3456 = vmatpush.msrb.mxu3 %v3455_v2  ;;  %3311 = vmatpush.msrb.mxu0 %v9794_v43  ;;  %v3484_v2 = vsub.f32 %v8066_v21, %v3483_v13  ;;  %v9799_v0 = vand.u32 4294901760, %v7926_v17  ;;  %v9801_v17 = vand.u32 4294901760, %v7940_v48 }
 0x1ec   : > { %3391 = vmatpush.msrb.mxu2 %v8005_v8  ;;  %3350 = vmatpush.msrb.mxu1 %v7777_v57  ;;  %v3479_v57 = vand.u32 4294901760, %v3478_v18 }
 0x1ed   : > { %3462 = vmatpush.msrb.mxu3 %v3461_v23  ;;  %3315 = vmatpush.msrb.mxu0 %v9795_v50  ;;  %v9796_v23 = vand.u32 4294901760, %v7879_v40  ;;  %v3485_v54 = vand.u32 4294901760, %v3484_v2  ;;  %v3507_v40 = vand.u32 4294901760, %v8119_v26  ;;  %v194_v50 = vld [vmem:[#allocation5 + $0x2d8] sm:$0xff] }
 0x1ee   : > { %3393 = vmatpush.msrb.mxu2 %v8018_v16  ;;  %3352 = vmatpush.msrb.mxu1 %v7792_v27  ;;  %v3496_v27 = vsub.f32 %v8095_v53, %v3495_v19 }
 0x1ef   : > { %3468 = vmatpush.msrb.mxu3 %v3467_v3  ;;  %3319 = vmatpush.msrb.mxu0 %v9796_v23  ;;  %v9798_v3 = vand.u32 4294901760, %v7907_v44  ;;  %v3508_v44 = vsub.f32 %v8119_v26, %v3507_v40 }
 0x1f0   : > { %3395 = vmatpush.msrb.mxu2 %v8030_v42  ;;  %3354 = vmatpush.msrb.mxu1 %v7805_v24  ;;  %v3502_v24 = vsub.f32 %v8108_v33, %v3501_v41 }
 0x1f1   : > { %3474 = vmatpush.msrb.mxu3 %v3473_v29  ;;  %3323 = vmatpush.msrb.mxu0 %v9797_v52  ;;  %v8311_v52 = vand.u32 4294901760, %v194_v50 }
 0x1f2   : > { %3397 = vmatpush.msrb.mxu2 %v8042_v62  ;;  %3356 = vmatpush.msrb.mxu1 %v7818_v56  ;;  %v3497_v56 = vand.u32 4294901760, %v3496_v27  ;;  %v3503_v18 = vand.u32 4294901760, %v3502_v24 }
 0x1f3   : > { %3480 = vmatpush.msrb.mxu3 %v3479_v57  ;;  %3327 = vmatpush.msrb.mxu0 %v9798_v3 }
 0x1f4   : > { %3399 = vmatpush.msrb.mxu2 %v8055_v34  ;;  %3358 = vmatpush.msrb.mxu1 %v7829_v38  ;;  %v3509_v38 = vand.u32 4294901760, %v3508_v44  ;;  %v182_v44 = vld [vmem:[#allocation5 + $0x278] sm:$0xff] }
 0x1f5   : > { %3486 = vmatpush.msrb.mxu3 %v3485_v54  ;;  %3331 = vmatpush.msrb.mxu0 %v9799_v0 }
 0x1f6   : > { %3401 = vmatpush.msrb.mxu2 %v8071_v30  ;;  %3360 = vmatpush.msrb.mxu1 %v7841_v59  ;;  %v9800_v59 = vand.u32 4294901760, %v7919_v32 }
 0x1f7   : > { %3492 = vmatpush.msrb.mxu3 %v3491_v58  ;;  %3333 = vmatmul.f32.vlgmr.msrb.gmra.mxu0 %v9785_v63  ;;  %v186_v58 = vld [vmem:[#allocation5 + $0x298] sm:$0xff] }
 0x1f8   : > { %3403 = vmatpush.msrb.mxu2 %v8084_v36  ;;  %3518 = vmatpush.msra.mxu0 %v7919_v32  ;;  %v222_v32 = vld [vmem:[#allocation5 + $0x3b8] sm:$0xff] }
 0x1f9   : > { %3362 = vmatpush.msrb.mxu1 %v7853_v7  ;;  %3498 = vmatpush.msrb.mxu3 %v3497_v56  ;;  %v9802_v7 = vand.u32 4294901760, %v7950_v4 }
 0x1fa   : > { %3405 = vmatpush.msrb.mxu2 %v8097_v51  ;;  %3521 = vmatpush.msra.mxu0 %v7940_v48 }
 0x1fb   : > { %3364 = vmatpush.msrb.mxu1 %v7865_v25  ;;  %3504 = vmatpush.msrb.mxu3 %v3503_v18  ;;  %v9803_v25 = vand.u32 4294901760, %v7958_v6 }
 0x1fc   : > { %3612 = vmatpush.msra.mxu2 %v9800_v59  ;;  %3524 = vmatpush.msra.mxu0 %v7950_v4  ;;  %v9804_v4 = vand.u32 4294901760, %v7970_v28  ;;  %v8336_v59 = vand.u32 4294901760, %v186_v58 }
 0x1fd   : > { %3366 = vmatpush.msrb.mxu1 %v7883_v12  ;;  %3510 = vmatpush.msrb.mxu3 %v3509_v38  ;;  %v9805_v12 = vand.u32 4294901760, %v7989_v46 }
 0x1fe   : > { %3616 = vmatpush.msra.mxu2 %v9801_v17  ;;  %3527 = vmatpush.msra.mxu0 %v7958_v6  ;;  %v9806_v6 = vand.u32 4294901760, %v8003_v22  ;;  %v8339_v17 = vsub.f32 %v194_v50, %v8311_v52 }
 0x1ff   : > { %3679 = vmatpush.msra.mxu3 %v7895_v14  ;;  %3368 = vmatpush.msrb.mxu1 %v7901_v10  ;;  %v226_v10 = vld [vmem:[#allocation5 + $0x3d8] sm:$0xff] }
 0x200   : > { %3620 = vmatpush.msra.mxu2 %v9802_v7  ;;  %3370 = vmatmul.f32.vlgmr.msrb.gmra.mxu1 %v9785_v63  ;;  %v8211_v48 = vand.u32 4294901760, %v226_v10 }
 0x201   : > { %3530 = vmatpush.msra.mxu0 %v7970_v28  ;;  %3571 = vmatpush.msra.mxu1 %v7895_v14  ;;  %v9808_v14 = vand.u32 4294901760, %v8028_v55 }
 0x202   : > { %3681 = vmatpush.msra.mxu3 %v7914_v37  ;;  %3624 = vmatpush.msra.mxu2 %v9803_v25  ;;  %v178_v25 = vld [vmem:[#allocation5 + $0x258] sm:$0xff] }
 0x203   : > { %3533 = vmatpush.msra.mxu0 %v7989_v46  ;;  %3573 = vmatpush.msra.mxu1 %v7914_v37  ;;  %v230_v37 = vld [vmem:[#allocation5 + $0x3f8] sm:$0xff] }
 0x204   : > { %3683 = vmatpush.msra.mxu3 %v7928_v11  ;;  %3628 = vmatpush.msra.mxu2 %v9804_v4  ;;  %v9812_v4 = vld [vmem:[#allocation28_spill] sm:$0xff] }
 0x205   : > { %3536 = vmatpush.msra.mxu0 %v8003_v22  ;;  %3575 = vmatpush.msra.mxu1 %v7928_v11  ;;  %v9807_v11 = vand.u32 4294901760, %v8016_v31 }
 0x206   : > { %3685 = vmatpush.msra.mxu3 %v7933_v15  ;;  %3632 = vmatpush.msra.mxu2 %v9805_v12 }
 0x207   : > { %3539 = vmatpush.msra.mxu0 %v8016_v31  ;;  %3577 = vmatpush.msra.mxu1 %v7933_v15  ;;  %v218_v15 = vld [vmem:[#allocation5 + $0x398] sm:$0xff] }
 0x208   : > { %3687 = vmatpush.msra.mxu3 %v7945_v61  ;;  %3636 = vmatpush.msra.mxu2 %v9806_v6  ;;  %v8236_v28 = vand.u32 4294901760, %v218_v15  ;;  %v210_v31 = vld [vmem:[#allocation5 + $0x358] sm:$0xff]  ;;  %v8347_v6 = vand.u32 4294901760, %v182_v44 }
 0x209   : > { %3542 = vmatpush.msra.mxu0 %v8028_v55  ;;  %3579 = vmatpush.msra.mxu1 %v7945_v61  ;;  %v8204_v61 = vand.u32 4294901760, %v230_v37  ;;  %v206_v55 = vld [vmem:[#allocation5 + $0x338] sm:$0xff] }
 0x20a   : > { %3689 = vmatpush.msra.mxu3 %v7962_v47  ;;  %3640 = vmatpush.msra.mxu2 %v9807_v11 }
 0x20b   : > { %3545 = vmatpush.msra.mxu0 %v8040_v39  ;;  %3581 = vmatpush.msra.mxu1 %v7962_v47  ;;  %v8229_v47 = vsub.f32 %v226_v10, %v8211_v48 }
 0x20c   : > { %3691 = vmatpush.msra.mxu3 %v7978_v9  ;;  %3644 = vmatpush.msra.mxu2 %v9808_v14 }
 0x20d   : > { %3548 = vmatpush.msra.mxu0 %v8053_v35  ;;  %3583 = vmatpush.msra.mxu1 %v7978_v9  ;;  %v8219_v9 = vsub.f32 %v230_v37, %v8204_v61  ;;  %v8258_v35 = vand.u32 4294901760, %v210_v31 }
 0x20e   : > { %3693 = vmatpush.msra.mxu3 %v7991_v49  ;;  %3648 = vmatpush.msra.mxu2 %v3471_v45  ;;  %v202_v45 = vld [vmem:[#allocation5 + $0x318] sm:$0xff] }
 0x20f   : > { %3551 = vmatpush.msra.mxu0 %v8066_v21  ;;  %3585 = vmatpush.msra.mxu1 %v7991_v49  ;;  %v8224_v49 = vand.u32 4294901760, %v222_v32  ;;  %v3758_v46 = vand.u32 4294901760, %v8219_v9 }
 0x210   : > { %3695 = vmatpush.msra.mxu3 %v8005_v8  ;;  %3652 = vmatpush.msra.mxu2 %v3477_v60 }
 0x211   : > { %3554 = vmatpush.msra.mxu0 %v8079_v20  ;;  %3587 = vmatpush.msra.mxu1 %v8005_v8  ;;  %v214_v8 = vld [vmem:[#allocation5 + $0x378] sm:$0xff]  ;;  %v8245_v22 = vsub.f32 %v222_v32, %v8224_v49  ;;  %v3759_v39 = vsub.f32 %v8219_v9, %v3758_v46  ;;  %v8275_v20 = vand.u32 4294901760, %v206_v55  ;;  %v8361_v32 = vand.u32 4294901760, %v178_v25 }
 0x212   : > { %3697 = vmatpush.msra.mxu3 %v8018_v16  ;;  %3656 = vmatpush.msra.mxu2 %v3483_v13  ;;  %v9809_v13 = vld [vmem:[#allocation31_spill] sm:$0xff] }
 0x213   : > { %3557 = vmatpush.msra.mxu0 %v8095_v53  ;;  %3589 = vmatpush.msra.mxu1 %v8018_v16  ;;  %v8242_v16 = vand.u32 4294901760, %v214_v8  ;;  %v3770_v21 = vand.u32 4294901760, %v8245_v22  ;;  %v8279_v53 = vand.u32 4294901760, %v202_v45  ;;  %v8300_v1 = vsub.f32 %v206_v55, %v8275_v20  ;;  %v174_v55 = vld [vmem:[#allocation5 + $0x238] sm:$0xff] }
 0x214   : > { %3699 = vmatpush.msra.mxu3 %v8030_v42  ;;  %3660 = vmatpush.msra.mxu2 %v3489_v5  ;;  %v198_v5 = vld [vmem:[#allocation5 + $0x2f8] sm:$0xff]  ;;  %v8383_v50 = vand.u32 4294901760, %v174_v55 }
 0x215   : > { %3560 = vmatpush.msra.mxu0 %v8108_v33  ;;  %3591 = vmatpush.msra.mxu1 %v8030_v42  ;;  %v3764_v42 = vand.u32 4294901760, %v8229_v47  ;;  %v8285_v33 = vsub.f32 %v210_v31, %v8258_v35  ;;  %v3771_v29 = vsub.f32 %v8245_v22, %v3770_v21  ;;  %v8297_v57 = vand.u32 4294901760, %v198_v5  ;;  %v9813_v31 = vld [vmem:[#allocation29_spill] sm:$0xff] }
 0x216   : > { %3701 = vmatpush.msra.mxu3 %v8042_v62  ;;  %3664 = vmatpush.msra.mxu2 %v3495_v19  ;;  %v9810_v19 = vmov 1.0   ;;  %v8305_v23 = vsub.f32 %v202_v45, %v8279_v53  ;;  %v9540_v24 = vand.u32 4294901760, %v8300_v1 }
 0x217   : > { %3563 = vmatpush.msra.mxu0 %v8119_v26  ;;  %3593 = vmatpush.msra.mxu1 %v8042_v62  ;;  %v8261_v62 = vsub.f32 %v218_v15, %v8236_v28  ;;  %v3765_v60 = vsub.f32 %v8229_v47, %v3764_v42  ;;  %v9543_v27 = vand.u32 4294901760, %v8285_v33  ;;  %v8324_v0 = vsub.f32 %v198_v5, %v8297_v57  ;;  %v170_v26 = vld [vmem:[#allocation5 + $0x218] sm:$0xff] }
 0x218   : > { %3703 = vmatpush.msra.mxu3 %v8055_v34  ;;  %3668 = vmatpush.msra.mxu2 %v3501_v41  ;;  %v190_v41 = vld [vmem:[#allocation5 + $0x2b8] sm:$0xff]  ;;  %v9539_v56 = vand.u32 4294901760, %v8305_v23  ;;  %v3795_v12 = vsub.f32 %v8300_v1, %v9540_v24  ;;  %v9537_v15 = vand.u32 4294901760, %v8339_v17  ;;  %v9816_v24 = vld [vmem:[#allocation26_spill] sm:$0xff] }
 0x219   : > { %3716 = vmatpush.msrb.mxu0 %v8204_v61  ;;  %3595 = vmatpush.msra.mxu1 %v8055_v34  ;;  %v8268_v34 = vsub.f32 %v214_v8, %v8242_v16  ;;  %v9547_v43 = vand.u32 4294901760, %v8261_v62  ;;  %v8320_v3 = vand.u32 4294901760, %v190_v41  ;;  %v3789_v38 = vsub.f32 %v8285_v33, %v9543_v27  ;;  %v262_v27 = vld [vmem:[#allocation5 + $0x4f8] sm:$0xff] }
 0x21a   : > { %3705 = vmatpush.msra.mxu3 %v8071_v30  ;;  %3672 = vmatpush.msra.mxu2 %v3507_v40  ;;  %v9538_v11 = vand.u32 4294901760, %v8324_v0  ;;  %v3801_v14 = vsub.f32 %v8305_v23, %v9539_v56  ;;  %v8365_v8 = vsub.f32 %v186_v58, %v8336_v59 }
 0x21b   : > { %3718 = vmatpush.msrb.mxu0 %v8211_v48  ;;  %3597 = vmatpush.msra.mxu1 %v8071_v30  ;;  %v3760_v30 = vand.u32 4294901760, %v3759_v39  ;;  %v9545_v2 = vand.u32 4294901760, %v8268_v34  ;;  %v3777_v54 = vsub.f32 %v8261_v62, %v9547_v43  ;;  %v8351_v37 = vsub.f32 %v190_v41, %v8320_v3 }
 0x21c   : > { %3707 = vmatpush.msra.mxu3 %v8084_v36  ;;  %3411 = vmatmul.f32.vlgmr.msrb.gmra.mxu2 %v9809_v13  ;;  %v3790_v10 = vand.u32 4294901760, %v3789_v38  ;;  %v3796_v39 = vand.u32 4294901760, %v3795_v12  ;;  %v3807_v45 = vsub.f32 %v8324_v0, %v9538_v11  ;;  %v8375_v13 = vsub.f32 %v182_v44, %v8347_v6  ;;  %v290_v44 = vld [vmem:[#allocation5 + $0x5d8] sm:$0xff] }
 0x21d   : > { %3720 = vmatpush.msrb.mxu0 %v8224_v49  ;;  %3859 = vmatpush.msrb.mxu2 %v8219_v9  ;;  %v3783_v40 = vsub.f32 %v8268_v34, %v9545_v2  ;;  %v3778_v18 = vand.u32 4294901760, %v3777_v54  ;;  %v3802_v5 = vand.u32 4294901760, %v3801_v14  ;;  %v8387_v41 = vsub.f32 %v178_v25, %v8361_v32  ;;  %v286_v12 = vld [vmem:[#allocation5 + $0x5b8] sm:$0xff] }
 0x21e   : > { %3599 = vmatpush.msra.mxu1 %v8084_v36  ;;  %3709 = vmatpush.msra.mxu3 %v8097_v51  ;;  %v3766_v36 = vand.u32 4294901760, %v3765_v60  ;;  %v9536_v60 = vand.u32 4294901760, %v8351_v37  ;;  %v3808_v54 = vand.u32 4294901760, %v3807_v45  ;;  %v8407_v25 = vsub.f32 %v174_v55, %v8383_v50  ;;  %v270_v11 = vld [vmem:[#allocation5 + $0x538] sm:$0xff] }
 0x21f   : > { %3722 = vmatpush.msrb.mxu0 %v8236_v28  ;;  %5311 = vmatmul.msk.f32.vlgmr.msrb.gmra.mxu3 %vm5992_vm0, %v9810_v19  ;;  %v3784_v7 = vand.u32 4294901760, %v3783_v40  ;;  %v9533_v40 = vand.u32 4294901760, %v8375_v13  ;;  %v8412_v14 = vand.u32 4294901760, %v290_v44  ;;  %v8503_v43 = vand.u32 4294901760, %v262_v27 }
 0x220   : > { %3862 = vmatpush.msrb.mxu2 %v8229_v47  ;;  %3912 = vmatpush.msrb.mxu3 %v8204_v61  ;;  %v258_v47 = vld [vmem:[#allocation5 + $0x4d8] sm:$0xff] }
 0x221   : > { %3601 = vmatpush.msra.mxu1 %v8097_v51  ;;  %3724 = vmatpush.msrb.mxu0 %v8242_v16  ;;  %v3772_v51 = vand.u32 4294901760, %v3771_v29  ;;  %v3813_v29 = vsub.f32 %v8339_v17, %v9537_v15  ;;  %v8516_v2 = vand.u32 4294901760, %v258_v47 }
 0x222   : > { %3865 = vmatpush.msrb.mxu2 %v8245_v22  ;;  %3914 = vmatpush.msrb.mxu3 %v8211_v48 }
 0x223   : > { %3761 = vmatpush.msrb.mxu1 %v3760_v30  ;;  %3726 = vmatpush.msrb.mxu0 %v8258_v35  ;;  %v294_v30 = vld [vmem:[#allocation5 + $0x5f8] sm:$0xff]  ;;  %v3814_v38 = vand.u32 4294901760, %v3813_v29 }
 0x224   : > { %3868 = vmatpush.msrb.mxu2 %v8261_v62  ;;  %3916 = vmatpush.msrb.mxu3 %v8224_v49  ;;  %v8396_v58 = vand.u32 4294901760, %v294_v30  ;;  %v278_v29 = vld [vmem:[#allocation5 + $0x578] sm:$0xff] }
 0x225   : > { %3767 = vmatpush.msrb.mxu1 %v3766_v36  ;;  %5312 = vmatmul.msk.f32.vlgmr.msra.gmra.mxu2 %vm5992_vm0, %v9810_v19  ;;  %v9534_v36 = vand.u32 4294901760, %v8365_v8 }
 0x226   : > { %3728 = vmatpush.msrb.mxu0 %v8275_v20  ;;  %3871 = vmatpush.msrb.mxu2 %v8268_v34  ;;  %v8419_v55 = vsub.f32 %v294_v30, %v8396_v58  ;;  %v9541_v30 = vand.u32 4294901760, %v8407_v25 }
 0x227   : > { %3773 = vmatpush.msrb.mxu1 %v3772_v51  ;;  %3918 = vmatpush.msrb.mxu3 %v8236_v28  ;;  %v3819_v51 = vsub.f32 %v8351_v37, %v9536_v60 }
 0x228   : > { %3566 = vmatmul.f32.vlgmr.msra.gmra.mxu0 %v9812_v4  ;;  %5313 = vmatmul.msk.f32.vlgmr.msra.gmra.mxu3 %vm5992_vm0, %v9810_v19  ;;  %v9535_v4 = vand.u32 4294901760, %v8387_v41 }
 0x229   : > { %3730 = vmatpush.msrb.mxu0 %v8279_v53  ;;  %3779 = vmatpush.msrb.mxu1 %v3778_v18  ;;  %v8400_v18 = vand.u32 4294901760, %v170_v26 }
 0x22a   : > { %3874 = vmatpush.msrb.mxu2 %v8285_v33  ;;  %3920 = vmatpush.msrb.mxu3 %v8242_v16 }
 0x22b   : > { %3605 = vmatmul.f32.vlgmr.msra.gmra.mxu1 %v9813_v31  ;;  %3732 = vmatpush.msrb.mxu0 %v8297_v57  ;;  %9814 = vst [vmem:[#allocation35_spill] sm:$0xff] %v8400_v18  ;;  %v3820_v31 = vand.u32 4294901760, %v3819_v51  ;;  %v8424_v45 = vsub.f32 %v170_v26, %v8400_v18  ;;  %v3837_v51 = vsub.f32 %v8387_v41, %v9535_v4  ;;  %v274_v4 = vld [vmem:[#allocation5 + $0x558] sm:$0xff] }
 0x22c   : > { %3785 = vmatpush.msrb.mxu1 %v3784_v7  ;;  %3877 = vmatpush.msrb.mxu2 %v8300_v1  ;;  %v3825_v7 = vsub.f32 %v8365_v8, %v9534_v36  ;;  %v8438_v26 = vsub.f32 %v290_v44, %v8412_v14  ;;  %v8442_v36 = vand.u32 4294901760, %v278_v29 }
 0x22d   : > { %3922 = vmatpush.msrb.mxu3 %v8258_v35  ;;  %3734 = vmatpush.msrb.mxu0 %v8311_v52  ;;  %v9544_v60 = vand.u32 4294901760, %v8424_v45  ;;  %v3838_v44 = vand.u32 4294901760, %v3837_v51 }
 0x22e   : > { %3791 = vmatpush.msrb.mxu1 %v3790_v10  ;;  %3880 = vmatpush.msrb.mxu2 %v8305_v23  ;;  %v282_v10 = vld [vmem:[#allocation5 + $0x598] sm:$0xff]  ;;  %v9546_v56 = vand.u32 4294901760, %v8438_v26  ;;  %v8467_v51 = vsub.f32 %v278_v29, %v8442_v36 }
 0x22f   : > { %3924 = vmatpush.msrb.mxu3 %v8275_v20  ;;  %3736 = vmatpush.msrb.mxu0 %v8320_v3 }
 0x230   : > { %3797 = vmatpush.msrb.mxu1 %v3796_v39  ;;  %3883 = vmatpush.msrb.mxu2 %v8324_v0  ;;  %v3831_v39 = vsub.f32 %v8375_v13, %v9533_v40  ;;  %v8433_v40 = vand.u32 4294901760, %v282_v10  ;;  %v4106_v9 = vsub.f32 %v8438_v26, %v9546_v56 }
 0x231   : > { %3926 = vmatpush.msrb.mxu3 %v8279_v53  ;;  %3738 = vmatpush.msrb.mxu0 %v8336_v59 }
 0x232   : > { %3803 = vmatpush.msrb.mxu1 %v3802_v5  ;;  %3886 = vmatpush.msrb.mxu2 %v8339_v17  ;;  %v8426_v5 = vand.u32 4294901760, %v286_v12 }
 0x233   : > { %3928 = vmatpush.msrb.mxu3 %v8297_v57  ;;  %3740 = vmatpush.msrb.mxu0 %v8347_v6 }
 0x234   : > { %3809 = vmatpush.msrb.mxu1 %v3808_v54  ;;  %3889 = vmatpush.msrb.mxu2 %v8351_v37  ;;  %9815 = vst [vmem:[#allocation23_spill] sm:$0xff] %v8426_v5  ;;  %v3826_v54 = vand.u32 4294901760, %v3825_v7  ;;  %v9542_v7 = vand.u32 4294901760, %v8419_v55  ;;  %v8448_v15 = vsub.f32 %v286_v12, %v8426_v5  ;;  %v8460_v12 = vand.u32 4294901760, %v274_v4 }
 0x235   : > { %3930 = vmatpush.msrb.mxu3 %v8311_v52  ;;  %3742 = vmatpush.msrb.mxu0 %v8361_v32 }
 0x236   : > { %3815 = vmatpush.msrb.mxu1 %v3814_v38  ;;  %3892 = vmatpush.msrb.mxu2 %v8365_v8  ;;  %v3832_v38 = vand.u32 4294901760, %v3831_v39  ;;  %v8455_v39 = vsub.f32 %v282_v10, %v8433_v40  ;;  %v266_v10 = vld [vmem:[#allocation5 + $0x518] sm:$0xff] }
 0x237   : > { %3932 = vmatpush.msrb.mxu3 %v8320_v3  ;;  %3744 = vmatpush.msrb.mxu0 %v8383_v50 }
 0x238   : > { %3821 = vmatpush.msrb.mxu1 %v3820_v31  ;;  %3895 = vmatpush.msrb.mxu2 %v8375_v13  ;;  %v3843_v31 = vsub.f32 %v8407_v25, %v9541_v30  ;;  %v3849_v30 = vsub.f32 %v8424_v45, %v9544_v60  ;;  %v9549_v29 = vand.u32 4294901760, %v8455_v39  ;;  %v8489_v60 = vand.u32 4294901760, %v266_v10 }
 0x239   : > { %3934 = vmatpush.msrb.mxu3 %v8336_v59  ;;  %3746 = vmatpush.msrb.mxu0 %v8400_v18 }
 0x23a   : > { %3827 = vmatpush.msrb.mxu1 %v3826_v54  ;;  %3898 = vmatpush.msrb.mxu2 %v8387_v41  ;;  %v4100_v54 = vsub.f32 %v8419_v55, %v9542_v7  ;;  %v3844_v7 = vand.u32 4294901760, %v3843_v31  ;;  %v4118_v22 = vsub.f32 %v8455_v39, %v9549_v29 }
 0x23b   : > { %3936 = vmatpush.msrb.mxu3 %v8347_v6  ;;  %3752 = vmatmul.f32.vlgmr.msrb.gmra.mxu0 %v9816_v24  ;;  %v9548_v24 = vand.u32 4294901760, %v8448_v15 }
 0x23c   : > { %3833 = vmatpush.msrb.mxu1 %v3832_v38  ;;  %3953 = vmatpush.msra.mxu0 %v3758_v46  ;;  %v8476_v38 = vand.u32 4294901760, %v270_v11  ;;  %v8487_v46 = vsub.f32 %v274_v4, %v8460_v12  ;;  %v4101_v31 = vand.u32 4294901760, %v4100_v54  ;;  %v9818_v54 = vld [vmem:[#allocation33_spill] sm:$0xff] }
 0x23d   : > { %3901 = vmatpush.msrb.mxu2 %v8407_v25  ;;  %3938 = vmatpush.msrb.mxu3 %v8361_v32  ;;  %v4112_v4 = vsub.f32 %v8448_v15, %v9548_v24 }
 0x23e   : > { %3839 = vmatpush.msrb.mxu1 %v3838_v44  ;;  %3957 = vmatpush.msra.mxu0 %v3764_v42  ;;  %v9817_v44 = vld [vmem:[#allocation32_spill] sm:$0xff]  ;;  %v3850_v42 = vand.u32 4294901760, %v3849_v30  ;;  %v8501_v56 = vsub.f32 %v270_v11, %v8476_v38  ;;  %v9819_v30 = vand.u32 4294901760, %v8261_v62  ;;  %v8514_v11 = vsub.f32 %v266_v10, %v8489_v60 }
 0x23f   : > { %3904 = vmatpush.msrb.mxu2 %v8424_v45  ;;  %3940 = vmatpush.msrb.mxu3 %v8383_v50  ;;  %v9821_v62 = vand.u32 4294901760, %v8268_v34  ;;  %v8526_v10 = vsub.f32 %v262_v27, %v8503_v43  ;;  %v9823_v34 = vand.u32 4294901760, %v8487_v46 }
 0x240   : > { %3907 = vmatmul.f32.vlgmr.msrb.gmra.mxu2 %v9817_v44  ;;  %3961 = vmatpush.msra.mxu0 %v3770_v21  ;;  %v254_v21 = vld [vmem:[#allocation5 + $0x4b8] sm:$0xff]  ;;  %v4107_v44 = vand.u32 4294901760, %v4106_v9  ;;  %v4113_v9 = vand.u32 4294901760, %v4112_v4  ;;  %v8540_v4 = vsub.f32 %v258_v47, %v8516_v2 }
 0x241   : > { %4057 = vmatpush.msra.mxu2 %v8396_v58  ;;  %3845 = vmatpush.msrb.mxu1 %v3844_v7  ;;  %v9820_v7 = vand.u32 4294901760, %v8467_v51 }
 0x242   : > { %3942 = vmatpush.msrb.mxu3 %v8400_v18  ;;  %3965 = vmatpush.msra.mxu0 %v9819_v30  ;;  %v250_v18 = vld [vmem:[#allocation5 + $0x498] sm:$0xff]  ;;  %v8528_v30 = vand.u32 4294901760, %v254_v21 }
 0x243   : > { %3946 = vmatmul.f32.vlgmr.msrb.gmra.mxu3 %v9818_v54  ;;  %4059 = vmatpush.msra.mxu2 %v8412_v14  ;;  %v4124_v29 = vsub.f32 %v8467_v51, %v9820_v7  ;;  %v246_v7 = vld [vmem:[#allocation5 + $0x478] sm:$0xff]  ;;  %v9824_v54 = vand.u32 4294901760, %v8285_v33  ;;  %v9826_v33 = vand.u32 4294901760, %v8300_v1 }
 0x244   : > { %4102 = vmatpush.msra.mxu3 %v4101_v31  ;;  %3851 = vmatpush.msrb.mxu1 %v3850_v42  ;;  %v4119_v31 = vand.u32 4294901760, %v4118_v22  ;;  %v4130_v42 = vsub.f32 %v8487_v46, %v9823_v34  ;;  %v8553_v47 = vsub.f32 %v254_v21, %v8528_v30  ;;  %v8555_v27 = vand.u32 4294901760, %v246_v7 }
 0x245   : > { %3969 = vmatpush.msra.mxu0 %v9821_v62  ;;  %5314 = vmatmul.msk.f32.vlgmr.msrb.gmra.mxu1 %vm6080_vm1, %v9810_v19  ;;  %v8542_v62 = vand.u32 4294901760, %v250_v18  ;;  %v4125_v22 = vand.u32 4294901760, %v4124_v29  ;;  %v9827_v29 = vand.u32 4294901760, %v8514_v11  ;;  %v9828_v34 = vand.u32 4294901760, %v8305_v23 }
 0x246   : > { %4061 = vmatpush.msra.mxu2 %v8426_v5  ;;  %4020 = vmatpush.msra.mxu1 %v8204_v61  ;;  %v9825_v61 = vand.u32 4294901760, %v8501_v56  ;;  %v242_v5 = vld [vmem:[#allocation5 + $0x458] sm:$0xff]  ;;  %v9830_v23 = vand.u32 4294901760, %v8324_v0 }
 0x247   : > { %4108 = vmatpush.msra.mxu3 %v4107_v44  ;;  %3973 = vmatpush.msra.mxu0 %v9824_v54  ;;  %v4153_v54 = vand.u32 4294901760, %v8540_v4  ;;  %v8566_v21 = vsub.f32 %v250_v18, %v8542_v62  ;;  %v8571_v1 = vand.u32 4294901760, %v242_v5  ;;  %v8579_v18 = vsub.f32 %v246_v7, %v8555_v27 }
 0x248   : > { %4063 = vmatpush.msra.mxu2 %v8433_v40  ;;  %4022 = vmatpush.msra.mxu1 %v8211_v48  ;;  %v4136_v44 = vsub.f32 %v8501_v56, %v9825_v61  ;;  %v4131_v48 = vand.u32 4294901760, %v4130_v42  ;;  %v238_v61 = vld [vmem:[#allocation5 + $0x438] sm:$0xff]  ;;  %v9831_v7 = vand.u32 4294901760, %v8339_v17  ;;  %v9832_v17 = vand.u32 4294901760, %v8351_v37 }
 0x249   : > { %4114 = vmatpush.msra.mxu3 %v4113_v9  ;;  %3977 = vmatpush.msra.mxu0 %v9826_v33  ;;  %v4142_v9 = vsub.f32 %v8514_v11, %v9827_v29  ;;  %v4159_v33 = vand.u32 4294901760, %v8553_v47  ;;  %v234_v29 = vld [vmem:[#allocation5 + $0x418] sm:$0xff]  ;;  %v8595_v0 = vsub.f32 %v242_v5, %v8571_v1 }
 0x24a   : > { %4065 = vmatpush.msra.mxu2 %v8442_v36  ;;  %4024 = vmatpush.msra.mxu1 %v8224_v49  ;;  %v4137_v49 = vand.u32 4294901760, %v4136_v44  ;;  %v4165_v44 = vand.u32 4294901760, %v8566_v21 }
 0x24b   : > { %4120 = vmatpush.msra.mxu3 %v4119_v31  ;;  %3981 = vmatpush.msra.mxu0 %v9828_v34  ;;  %v9829_v31 = vand.u32 4294901760, %v8526_v10  ;;  %v8584_v34 = vand.u32 4294901760, %v238_v61  ;;  %v4177_v37 = vand.u32 4294901760, %v8595_v0 }
 0x24c   : > { %4067 = vmatpush.msra.mxu2 %v8460_v12  ;;  %4026 = vmatpush.msra.mxu1 %v8236_v28  ;;  %v4143_v28 = vand.u32 4294901760, %v4142_v9  ;;  %v4171_v9 = vand.u32 4294901760, %v8579_v18 }
 0x24d   : > { %4126 = vmatpush.msra.mxu3 %v4125_v22  ;;  %v4148_v42 = vsub.f32 %v8526_v10, %v9829_v31  ;;  %3985 = vmatpush.msra.mxu0 %v9830_v23  ;;  %v4154_v22 = vsub.f32 %v8540_v4, %v4153_v54  ;;  %v8597_v31 = vand.u32 4294901760, %v234_v29  ;;  %v8608_v5 = vsub.f32 %v238_v61, %v8584_v34 }
 0x24e   : > { %4069 = vmatpush.msra.mxu2 %v8476_v38  ;;  %4028 = vmatpush.msra.mxu1 %v8242_v16  ;;  %v4172_v61 = vsub.f32 %v8579_v18, %v4171_v9 }
 0x24f   : > { %4132 = vmatpush.msra.mxu3 %v4131_v48  ;;  %3989 = vmatpush.msra.mxu0 %v9831_v7  ;;  %v4149_v16 = vand.u32 4294901760, %v4148_v42  ;;  %v4160_v48 = vsub.f32 %v8553_v47, %v4159_v33  ;;  %v9833_v42 = vand.u32 4294901760, %v8365_v8  ;;  %v8619_v23 = vsub.f32 %v234_v29, %v8597_v31 }
 0x250   : > { %4071 = vmatpush.msra.mxu2 %v8489_v60  ;;  %4030 = vmatpush.msra.mxu1 %v8258_v35  ;;  %v4155_v35 = vand.u32 4294901760, %v4154_v22  ;;  %v4183_v8 = vand.u32 4294901760, %v8608_v5  ;;  %v9835_v22 = vand.u32 4294901760, %v8387_v41  ;;  %v4173_v7 = vand.u32 4294901760, %v4172_v61 }
 0x251   : > { %4138 = vmatpush.msra.mxu3 %v4137_v49  ;;  %3993 = vmatpush.msra.mxu0 %v9832_v17  ;;  %v4166_v49 = vsub.f32 %v8566_v21, %v4165_v44  ;;  %v9837_v41 = vand.u32 4294901760, %v8424_v45 }
 0x252   : > { %4073 = vmatpush.msra.mxu2 %v8503_v43  ;;  %4032 = vmatpush.msra.mxu1 %v8275_v20  ;;  %v4161_v20 = vand.u32 4294901760, %v4160_v48  ;;  %v9839_v48 = vand.u32 4294901760, %v8419_v55 }
 0x253   : > { %4144 = vmatpush.msra.mxu3 %v4143_v28  ;;  %3997 = vmatpush.msra.mxu0 %v9833_v42  ;;  %v9834_v28 = vand.u32 4294901760, %v8375_v13  ;;  %v4167_v29 = vand.u32 4294901760, %v4166_v49  ;;  %v4189_v13 = vand.u32 4294901760, %v8619_v23 }
 0x254   : > { %4075 = vmatpush.msra.mxu2 %v8516_v2  ;;  %4034 = vmatpush.msra.mxu1 %v8279_v53  ;;  %v4178_v53 = vsub.f32 %v8595_v0, %v4177_v37 }
 0x255   : > { %4150 = vmatpush.msra.mxu3 %v4149_v16  ;;  %4001 = vmatpush.msra.mxu0 %v9834_v28  ;;  %v9836_v16 = vand.u32 4294901760, %v8407_v25  ;;  %v4190_v25 = vsub.f32 %v8619_v23, %v4189_v13 }
 0x256   : > { %4077 = vmatpush.msra.mxu2 %v8528_v30  ;;  %4036 = vmatpush.msra.mxu1 %v8297_v57  ;;  %v4184_v57 = vsub.f32 %v8608_v5, %v4183_v8 }
 0x257   : > { %4156 = vmatpush.msra.mxu3 %v4155_v35  ;;  %4005 = vmatpush.msra.mxu0 %v9835_v22  ;;  %v4191_v45 = vand.u32 4294901760, %v4190_v25 }
 0x258   : > { %4079 = vmatpush.msra.mxu2 %v8542_v62  ;;  %4038 = vmatpush.msra.mxu1 %v8311_v52  ;;  %v4179_v52 = vand.u32 4294901760, %v4178_v53 }
 0x259   : > { %4162 = vmatpush.msra.mxu3 %v4161_v20  ;;  %4009 = vmatpush.msra.mxu0 %v9836_v16 }
 0x25a   : > { %4081 = vmatpush.msra.mxu2 %v8555_v27  ;;  %4040 = vmatpush.msra.mxu1 %v8320_v3  ;;  %v4185_v3 = vand.u32 4294901760, %v4184_v57 }
 0x25b   : > { %4168 = vmatpush.msra.mxu3 %v4167_v29  ;;  %4013 = vmatpush.msra.mxu0 %v9837_v41  ;;  %v4490_v29 = vld [vmem:[#allocation8 + $0xf0] sm:$0xff] }
 0x25c   : > { %4083 = vmatpush.msra.mxu2 %v8571_v1  ;;  %4042 = vmatpush.msra.mxu1 %v8336_v59  ;;  %v9838_v59 = vld [vmem:[#allocation22_spill] sm:$0xff]  ;;  %v8787_v22 = vand.u32 4294901760, %v4490_v29 }
 0x25d   : > { %4174 = vmatpush.msra.mxu3 %v4173_v7  ;;  %5315 = vmatmul.msk.f32.vlgmr.msra.gmra.mxu0 %vm6080_vm1, %v9810_v19 }
 0x25e   : > { %4085 = vmatpush.msra.mxu2 %v8584_v34  ;;  %4200 = vmatpush.msrb.mxu0 %v8419_v55  ;;  %v9843_v55 = vand.u32 4294901760, %v8455_v39  ;;  %v8792_v16 = vsub.f32 %v4490_v29, %v8787_v22 }
 0x25f   : > { %4044 = vmatpush.msra.mxu1 %v8347_v6  ;;  %4180 = vmatpush.msra.mxu3 %v4179_v52  ;;  %v9840_v6 = vand.u32 4294901760, %v8438_v26  ;;  %v4486_v52 = vld [vmem:[#allocation8 + $0xd0] sm:$0xff] }
 0x260   : > { %4087 = vmatpush.msra.mxu2 %v8597_v31  ;;  %4203 = vmatpush.msrb.mxu0 %v8438_v26  ;;  %v9844_v26 = vld [vmem:[#allocation23_spill] sm:$0xff]  ;;  %v4541_v25 = vand.u32 4294901760, %v8792_v16 }
 0x261   : > { %4046 = vmatpush.msra.mxu1 %v8361_v32  ;;  %4186 = vmatpush.msra.mxu3 %v4185_v3  ;;  %v9841_v32 = vld [vmem:[#allocation35_spill] sm:$0xff] }
 0x262   : > { %4093 = vmatmul.f32.vlgmr.msra.gmra.mxu2 %v9838_v59  ;;  %4206 = vmatpush.msrb.mxu0 %v8448_v15 }
 0x263   : > { %4294 = vmatpush.msrb.mxu2 %v9839_v48  ;;  %4048 = vmatpush.msra.mxu1 %v8383_v50  ;;  %v9842_v50 = vand.u32 4294901760, %v8448_v15  ;;  %v9846_v15 = vand.u32 4294901760, %v8487_v46  ;;  %v4484_v48 = vld [vmem:[#allocation8 + $0xc0] sm:$0xff] }
 0x264   : > { %4192 = vmatpush.msra.mxu3 %v4191_v45  ;;  %4209 = vmatpush.msrb.mxu0 %v8455_v39  ;;  %v1521_v39 = vpop.f32.mrf.mxu0  ;;  %v8805_v45 = vand.u32 4294901760, %v4486_v52 }
 0x265   : > { %4194 = vmatmul.f32.vlgmr.msra.gmra.mxu3 %v9785_v63  ;;  %4298 = vmatpush.msrb.mxu2 %v9840_v6 }
 0x266   : > { %4361 = vmatpush.msrb.mxu3 %v8396_v58  ;;  %4050 = vmatpush.msra.mxu1 %v9841_v32  ;;  %v4542_v32 = vsub.f32 %v8792_v16, %v4541_v25 }
 0x267   : > { %4212 = vmatpush.msrb.mxu0 %v8467_v51  ;;  %5316 = vmatmul.msk.f32.vlgmr.msra.gmra.mxu1 %vm6080_vm1, %v9810_v19  ;;  %v9845_v19 = vand.u32 4294901760, %v8467_v51  ;;  %v1560_v51 = vpop.f32.mrf.mxu1 }
 0x268   : > { %4302 = vmatpush.msrb.mxu2 %v9842_v50  ;;  %4253 = vmatpush.msrb.mxu1 %v8396_v58  ;;  %v9847_v58 = vand.u32 4294901760, %v8501_v56 }
 0x269   : > { %4363 = vmatpush.msrb.mxu3 %v8412_v14  ;;  %4215 = vmatpush.msrb.mxu0 %v8487_v46 }
 0x26a   : > { %4306 = vmatpush.msrb.mxu2 %v9843_v55  ;;  %4255 = vmatpush.msrb.mxu1 %v8412_v14  ;;  %v9848_v14 = vand.u32 4294901760, %v8514_v11  ;;  %v8816_v55 = vsub.f32 %v4486_v52, %v8805_v45 }
 0x26b   : > { %4365 = vmatpush.msrb.mxu3 %v9844_v26  ;;  %4218 = vmatpush.msrb.mxu0 %v8501_v56  ;;  %v9851_v56 = vld [vmem:[#allocation25_spill] sm:$0xff] }
 0x26c   : > { %4310 = vmatpush.msrb.mxu2 %v9845_v19  ;;  %4257 = vmatpush.msrb.mxu1 %v9844_v26  ;;  %v8819_v26 = vand.u32 4294901760, %v4484_v48  ;;  %v4482_v19 = vld [vmem:[#allocation8 + $0xb0] sm:$0xff] }
 0x26d   : > { %4367 = vmatpush.msrb.mxu3 %v8433_v40  ;;  %4221 = vmatpush.msrb.mxu0 %v8514_v11 }
 0x26e   : > { %4314 = vmatpush.msrb.mxu2 %v9846_v15  ;;  %4259 = vmatpush.msrb.mxu1 %v8433_v40  ;;  %v9849_v40 = vand.u32 4294901760, %v8526_v10  ;;  %v4480_v15 = vld [vmem:[#allocation8 + $0xa0] sm:$0xff] }
 0x26f   : > { %4369 = vmatpush.msrb.mxu3 %v8442_v36  ;;  %4224 = vmatpush.msrb.mxu0 %v8526_v10  ;;  %v1808_v11 = vpop.f32.mrf.mxu1 }
 0x270   : > { %4318 = vmatpush.msrb.mxu2 %v9847_v58  ;;  %4261 = vmatpush.msrb.mxu1 %v8442_v36  ;;  %v4478_v58 = vld [vmem:[#allocation8 + $0x90] sm:$0xff] }
 0x271   : > { %4371 = vmatpush.msrb.mxu3 %v8460_v12  ;;  %4227 = vmatpush.msrb.mxu0 %v8540_v4  ;;  %v8754_v4 = vld [vmem:[#allocation7] sm:$0xf] }
 0x272   : > { %4322 = vmatpush.msrb.mxu2 %v9848_v14  ;;  %4263 = vmatpush.msrb.mxu1 %v8460_v12  ;;  %v300_v52 = vperm.slane %v8754_v4, 3 }
 0x273   : > { %4373 = vmatpush.msrb.mxu3 %v8476_v38  ;;  %4230 = vmatpush.msrb.mxu0 %v8553_v47 }
 0x274   : > { %4326 = vmatpush.msrb.mxu2 %v9849_v40  ;;  %4265 = vmatpush.msrb.mxu1 %v8476_v38  ;;  %v1707_v38 = vpop.f32.mrf.mxu0 }
 0x275   : > { %4375 = vmatpush.msrb.mxu3 %v8489_v60  ;;  %4233 = vmatpush.msrb.mxu0 %v8566_v21 }
 0x276   : > { %4330 = vmatpush.msrb.mxu2 %v4153_v54  ;;  %4267 = vmatpush.msrb.mxu1 %v8489_v60  ;;  %v1467_v60 = vpop.f32.mrf.mxu3 }
 0x277   : > { %4377 = vmatpush.msrb.mxu3 %v8503_v43  ;;  %4236 = vmatpush.msrb.mxu0 %v8579_v18 }
 0x278   : > { %4334 = vmatpush.msrb.mxu2 %v4159_v33  ;;  %4269 = vmatpush.msrb.mxu1 %v8503_v43  ;;  %v9850_v43 = vld [vmem:[#allocation24_spill] sm:$0xff] }
 0x279   : > { %4379 = vmatpush.msrb.mxu3 %v8516_v2  ;;  %4239 = vmatpush.msrb.mxu0 %v8595_v0 }
 0x27a   : > { %4338 = vmatpush.msrb.mxu2 %v4165_v44  ;;  %4271 = vmatpush.msrb.mxu1 %v8516_v2  ;;  %v1366_v2 = vpop.f32.mrf.mxu2 }
 0x27b   : > { %4381 = vmatpush.msrb.mxu3 %v8528_v30  ;;  %4242 = vmatpush.msrb.mxu0 %v8608_v5 }
 0x27c   : > { %4342 = vmatpush.msrb.mxu2 %v4171_v9  ;;  %4273 = vmatpush.msrb.mxu1 %v8528_v30  ;;  %v1970_v30 = vpop.f32.mrf.mxu0 }
 0x27d   : > { %4383 = vmatpush.msrb.mxu3 %v8542_v62  ;;  %4245 = vmatpush.msrb.mxu0 %v8619_v23 }
 0x27e   : > { %4346 = vmatpush.msrb.mxu2 %v4177_v37  ;;  %4275 = vmatpush.msrb.mxu1 %v8542_v62  ;;  %v1666_v12 = vpop.f32.mrf.mxu3  ;;  %v8757_v62 = vpop.f32.mrf.mxu1 }
 0x27f   : > { %4385 = vmatpush.msrb.mxu3 %v8555_v27  ;;  %4248 = vmatmul.f32.vlgmr.msrb.gmra.mxu0 %v9850_v43  ;;  %v8824_v43 = vand.u32 4294901760, %v4482_v19 }
 0x280   : > { %4350 = vmatpush.msrb.mxu2 %v4183_v8  ;;  %4277 = vmatpush.msrb.mxu1 %v8555_v27 }
 0x281   : > { %4387 = vmatpush.msrb.mxu3 %v8571_v1  ;;  %4499 = vmatpush.msra.mxu0 %v8787_v22 }
 0x282   : > { %4354 = vmatpush.msrb.mxu2 %v4189_v13  ;;  %4279 = vmatpush.msrb.mxu1 %v8571_v1  ;;  %v1629_v36 = vpop.f32.mrf.mxu2  ;;  %v4488_v13 = vld [vmem:[#allocation8 + $0xe0] sm:$0xff] }
 0x283   : > { %4389 = vmatpush.msrb.mxu3 %v8584_v34  ;;  %4356 = vmatmul.f32.vlgmr.msrb.gmra.mxu2 %v9785_v63  ;;  %v8794_v57 = vand.u32 4294901760, %v4488_v13 }
 0x284   : > { %4281 = vmatpush.msrb.mxu1 %v8584_v34  ;;  %v8761_v21 = vpop.f32.mrf.mxu0  ;;  %4642 = vmatpush.msra.mxu2 %v8792_v16 }
 0x285   : > { %4391 = vmatpush.msrb.mxu3 %v8597_v31  ;;  %v8802_v3 = vsub.f32 %v4488_v13, %v8794_v57  ;;  %4501 = vmatpush.msra.mxu0 %v8794_v57 }
 0x286   : > { %4393 = vmatmul.f32.vlgmr.msrb.gmra.mxu3 %v9785_v63  ;;  %4283 = vmatpush.msrb.mxu1 %v8597_v31  ;;  %v1901_v46 = vpop.f32.mrf.mxu3  ;;  %v298_v63 = vperm.slane %v8754_v4, 1  ;;  %v8765_v18 = vpop.f32.mrf.mxu1 }
 0x287   : > { %4287 = vmatmul.f32.vlgmr.msrb.gmra.mxu1 %v9851_v56  ;;  %4695 = vmatpush.msra.mxu3 %v8787_v22  ;;  %v9566_v50 = vand.u32 4294901760, %v8802_v3  ;;  %v8829_v56 = vand.u32 4294901760, %v4478_v58 }
 0x288   : > { %v1367_v54 = vadd.f32 %v1366_v2, %v298_v63  ;;  %4645 = vmatpush.msra.mxu2 %v8802_v3  ;;  %v8826_v2 = vand.u32 4294901760, %v4480_v15  ;;  %4503 = vmatpush.msra.mxu0 %v8805_v45 }
 0x289   : > { %4697 = vmatpush.msra.mxu3 %v8794_v57 }
 0x28a   : > { %v1862_v24 = vpop.f32.mrf.mxu2  ;;  %v1468_v33 = vadd.f32 %v1467_v60, %v1367_v54  ;;  %v4476_v60 = vld [vmem:[#allocation8 + $0x80] sm:$0xff]  ;;  %4648 = vmatpush.msra.mxu2 %v8816_v55  ;;  %4505 = vmatpush.msra.mxu0 %v8819_v26 }
 0x28b   : > { %4699 = vmatpush.msra.mxu3 %v8805_v45 }
 0x28c   : > { %v1522_v44 = vadd.f32 %v1521_v39, %v1468_v33  ;;  %v8769_v0 = vpop.f32.mrf.mxu0  ;;  %v4548_v39 = vsub.f32 %v8802_v3, %v9566_v50  ;;  %4507 = vmatpush.msra.mxu0 %v8824_v43 }
 0x28d   : > { %4701 = vmatpush.msra.mxu3 %v8819_v26 }
 0x28e   : > { %v8752_v27 = vpop.f32.mrf.mxu3  ;;  %v1561_v9 = vadd.f32 %v1560_v51, %v1522_v44  ;;  %v8773_v17 = vpop.f32.mrf.mxu1  ;;  %v8836_v51 = vsub.f32 %v4484_v48, %v8819_v26  ;;  %v4549_v54 = vand.u32 4294901760, %v4548_v39  ;;  %4509 = vmatpush.msra.mxu0 %v8826_v2 }
 0x28f   : > { %4703 = vmatpush.msra.mxu3 %v8824_v43 }
 0x290   : > { %v1630_v5 = vadd.f32 %v1629_v36, %v1561_v9  ;;  %v4543_v36 = vand.u32 4294901760, %v4542_v32  ;;  %v9562_v44 = vand.u32 4294901760, %v8836_v51  ;;  %4651 = vmatpush.msra.mxu2 %v8836_v51  ;;  %4511 = vmatpush.msra.mxu0 %v8829_v56 }
 0x291   : > { %4705 = vmatpush.msra.mxu3 %v8826_v2 }
 0x292   : > { %v8750_v10 = vpop.f32.mrf.mxu2  ;;  %v1667_v42 = vadd.f32 %v1666_v12, %v1630_v5  ;;  %v9563_v12 = vand.u32 4294901760, %v8816_v55  ;;  %4544 = vmatpush.msra.mxu1 %v4543_v36  ;;  %v4560_v13 = vsub.f32 %v8836_v51, %v9562_v44 }
 0x293   : > { %4707 = vmatpush.msra.mxu3 %v8829_v56 }
 0x294   : > { %v8777_v49 = vpop.f32.mrf.mxu0  ;;  %v1708_v23 = vadd.f32 %v1707_v38, %v1667_v42  ;;  %v8844_v38 = vsub.f32 %v4480_v15, %v8826_v2  ;;  %v4554_v33 = vsub.f32 %v8816_v55, %v9563_v12  ;;  %4550 = vmatpush.msra.mxu1 %v4549_v54 }
 0x296   : > { %v8763_v1 = vpop.f32.mrf.mxu3  ;;  %v8781_v20 = vpop.f32.mrf.mxu1  ;;  %v1809_v61 = vadd.f32 %v1808_v11, %v1708_v23  ;;  %v8850_v11 = vand.u32 4294901760, %v4476_v60  ;;  %v9556_v42 = vand.u32 4294901760, %v8844_v38 }
 0x298   : > { %v1863_v53 = vadd.f32 %v1862_v24, %v1809_v61  ;;  %v8841_v24 = vsub.f32 %v4482_v19, %v8824_v43  ;;  %v8867_v61 = vsub.f32 %v4476_v60, %v8850_v11  ;;  %v4572_v48 = vsub.f32 %v8844_v38, %v9556_v42  ;;  %v4474_v60 = vld [vmem:[#allocation8 + $0x70] sm:$0xff]  ;;  %4709 = vmatpush.msra.mxu3 %v8850_v11  ;;  %v4464_v42 = vld [vmem:[#allocation8 + $0x20] sm:$0xff] }
 0x299   : > { %v4561_v19 = vand.u32 4294901760, %v4560_v13  ;;  %v8898_v54 = vand.u32 4294901760, %v4474_v60  ;;  %4513 = vmatpush.msra.mxu0 %v8850_v11 }
 0x29a   : > { %v8759_v47 = vpop.f32.mrf.mxu2  ;;  %v1902_v59 = vadd.f32 %v1901_v46, %v1863_v53  ;;  %v8847_v46 = vsub.f32 %v4478_v58, %v8829_v56  ;;  %v9559_v5 = vand.u32 4294901760, %v8841_v24  ;;  %v4555_v53 = vand.u32 4294901760, %v4554_v33  ;;  %4654 = vmatpush.msra.mxu2 %v8841_v24  ;;  %v4472_v33 = vld [vmem:[#allocation8 + $0x60] sm:$0xff] }
 0x29b   : > { %v4573_v36 = vand.u32 4294901760, %v4572_v48  ;;  %v8907_v48 = vand.u32 4294901760, %v4472_v33  ;;  %4711 = vmatpush.msra.mxu3 %v8898_v54  ;;  %4515 = vmatpush.msra.mxu0 %v8898_v54 }
 0x29c   : > { %v8785_v8 = vpop.f32.mrf.mxu0  ;;  %v1971_v14 = vadd.f32 %v1970_v30, %v1902_v59  ;;  %v299_v30 = vperm.slane %v8754_v4, 2  ;;  %v9555_v23 = vand.u32 4294901760, %v8847_v46  ;;  %v4566_v59 = vsub.f32 %v8841_v24, %v9559_v5  ;;  %4556 = vmatpush.msra.mxu1 %v4555_v53  ;;  %4657 = vmatpush.msra.mxu2 %v8844_v38 }
 0x29d   : > { %4713 = vmatpush.msra.mxu3 %v8907_v48  ;;  %4517 = vmatpush.msra.mxu0 %v8907_v48 }
 0x29e   : > { %v8771_v31 = vpop.f32.mrf.mxu3  ;;  %v8798_v41 = vpop.f32.mrf.mxu1  ;;  %v2008_v29 = vadd.f32 %v8757_v62, %v1971_v14  ;;  %v9553_v62 = vand.u32 4294901760, %v8867_v61  ;;  %v4578_v4 = vsub.f32 %v8847_v46, %v9555_v23  ;;  %v2390_v15 = vadd.f32 %v8769_v0, %v299_v30  ;;  %4562 = vmatpush.msra.mxu1 %v4561_v19  ;;  %4660 = vmatpush.msra.mxu2 %v8847_v46 }
 0x29f   : > { %v4567_v14 = vand.u32 4294901760, %v4566_v59  ;;  %v8904_v59 = vsub.f32 %v4474_v60, %v8898_v54 }
 0x2a0   : > { %v4584_v39 = vsub.f32 %v8867_v61, %v9553_v62  ;;  %v2049_v0 = vadd.f32 %v8750_v10, %v2008_v29  ;;  %v4579_v13 = vand.u32 4294901760, %v4578_v4  ;;  %4663 = vmatpush.msra.mxu2 %v8867_v61  ;;  %v2491_v19 = vadd.f32 %v8773_v17, %v2390_v15  ;;  %v4470_v10 = vld [vmem:[#allocation8 + $0x50] sm:$0xff] }
 0x2a1   : > { %4568 = vmatpush.msra.mxu1 %v4567_v14  ;;  %v8919_v4 = vand.u32 4294901760, %v4470_v10  ;;  %v4468_v14 = vld [vmem:[#allocation8 + $0x40] sm:$0xff] }
 0x2a2   : > { %v8767_v34 = vpop.f32.mrf.mxu2  ;;  %v4585_v29 = vand.u32 4294901760, %v4584_v39  ;;  %4666 = vmatpush.msra.mxu2 %v8904_v59  ;;  %v2150_v17 = vadd.f32 %v8752_v27, %v2049_v0 }
 0x2a3   : > { %4574 = vmatpush.msra.mxu1 %v4573_v36  ;;  %v8929_v39 = vsub.f32 %v4470_v10, %v8919_v4  ;;  %4715 = vmatpush.msra.mxu3 %v8919_v4 }
 0x2a4   : > { %v8822_v40 = vpop.f32.mrf.mxu0  ;;  %v2204_v27 = vadd.f32 %v8761_v21, %v2150_v17  ;;  %4519 = vmatpush.msra.mxu0 %v8919_v4 }
 0x2a5   : > { %4580 = vmatpush.msra.mxu1 %v4579_v13 }
 0x2a6   : > { %v8779_v37 = vpop.f32.mrf.mxu3  ;;  %v8860_v9 = vpop.f32.mrf.mxu1  ;;  %v2243_v21 = vadd.f32 %v8765_v18, %v2204_v27 }
 0x2a7   : > { %4586 = vmatpush.msra.mxu1 %v4585_v29 }
 0x2aa   : > { %v8775_v35 = vpop.f32.mrf.mxu2 }
 0x2ac   : > { %v8890_v58 = vpop.f32.mrf.mxu0 }
 0x2ae   : > { %v8789_v7 = vpop.f32.mrf.mxu3  ;;  %v8910_v62 = vpop.f32.mrf.mxu1 }
 0x2b2   : > { %v8783_v28 = vpop.f32.mrf.mxu2 }
 0x2b4   : > { %v3567_v0 = vpop.f32.mrf.mxu0 }
 0x2b6   : > { %v8853_v63 = vpop.f32.mrf.mxu3  ;;  %v3606_v18 = vpop.f32.mrf.mxu1 }
 0x2ba   : > { %v8809_v6 = vpop.f32.mrf.mxu2 }
 0x2be   : > { %v3513_v53 = vpop.f32.mrf.mxu3 }
 0x2c2   : > { %v3412_v32 = vpop.f32.mrf.mxu2 }
 0x2c3   : > { %v3413_v30 = vadd.f32 %v3412_v32, %v300_v52  ;;  %v9554_v52 = vand.u32 4294901760, %v8904_v59  ;;  %v8916_v32 = vsub.f32 %v4472_v33, %v8907_v48  ;;  %v8932_v33 = vand.u32 4294901760, %v4468_v14 }
 0x2c5   : > { %v3514_v15 = vadd.f32 %v3513_v53, %v3413_v30  ;;  %v4590_v60 = vsub.f32 %v8904_v59, %v9554_v52  ;;  %v9557_v36 = vand.u32 4294901760, %v8916_v32  ;;  %4669 = vmatpush.msra.mxu2 %v8916_v32  ;;  %v4466_v30 = vld [vmem:[#allocation8 + $0x30] sm:$0xff]  ;;  %v2545_v53 = vadd.f32 %v8767_v34, %v2491_v19  ;;  %4717 = vmatpush.msra.mxu3 %v8932_v33 }
 0x2c6   : > { %v9558_v52 = vand.u32 4294901760, %v8929_v39  ;;  %v8945_v17 = vsub.f32 %v4468_v14, %v8932_v33  ;;  %v8947_v23 = vand.u32 4294901760, %v4466_v30  ;;  %4521 = vmatpush.msra.mxu0 %v8932_v33 }
 0x2c7   : > { %v4591_v13 = vand.u32 4294901760, %v4590_v60  ;;  %v4596_v10 = vsub.f32 %v8916_v32, %v9557_v36  ;;  %4672 = vmatpush.msra.mxu2 %v8929_v39  ;;  %v3568_v34 = vadd.f32 %v3567_v0, %v3514_v15  ;;  %v8954_v60 = vand.u32 4294901760, %v4464_v42  ;;  %v4462_v36 = vld [vmem:[#allocation8 + $0x10] sm:$0xff] }
 0x2c8   : > { %v4602_v29 = vsub.f32 %v8929_v39, %v9558_v52  ;;  %v9560_v14 = vand.u32 4294901760, %v8945_v17  ;;  %v8958_v27 = vsub.f32 %v4466_v30, %v8947_v23  ;;  %4719 = vmatpush.msra.mxu3 %v8947_v23  ;;  %v2584_v15 = vadd.f32 %v8771_v31, %v2545_v53  ;;  %4523 = vmatpush.msra.mxu0 %v8947_v23  ;;  %v4460_v31 = vld [vmem:[#allocation8] sm:$0xff] }
 0x2c9   : > { %4592 = vmatpush.msra.mxu1 %v4591_v13  ;;  %v4597_v19 = vand.u32 4294901760, %v4596_v10  ;;  %4675 = vmatpush.msra.mxu2 %v8945_v17  ;;  %v8964_v13 = vsub.f32 %v4464_v42, %v8954_v60  ;;  %v8966_v10 = vand.u32 4294901760, %v4462_v36  ;;  %v2312_v52 = vadd.f32 %v8759_v47, %v2243_v21 }
 0x2ca   : > { %v4603_v0 = vand.u32 4294901760, %v4602_v29  ;;  %v4608_v30 = vsub.f32 %v8945_v17, %v9560_v14  ;;  %v9561_v5 = vand.u32 4294901760, %v8958_v27  ;;  %4721 = vmatpush.msra.mxu3 %v8954_v60  ;;  %v3607_v53 = vadd.f32 %v3606_v18, %v3568_v34  ;;  %4525 = vmatpush.msra.mxu0 %v8954_v60  ;;  %v3675_v47 = vpop.f32.mrf.mxu2 }
 0x2cb   : > { %4598 = vmatpush.msra.mxu1 %v4597_v19  ;;  %4678 = vmatpush.msra.mxu2 %v8958_v27  ;;  %v9564_v42 = vand.u32 4294901760, %v8964_v13  ;;  %v8978_v19 = vsub.f32 %v4462_v36, %v8966_v10  ;;  %v8980_v29 = vand.u32 4294901760, %v4460_v31  ;;  %v2653_v34 = vadd.f32 %v8777_v49, %v2584_v15 }
 0x2cc   : > { %v4609_v21 = vand.u32 4294901760, %v4608_v30  ;;  %v4614_v14 = vsub.f32 %v8958_v27, %v9561_v5  ;;  %4723 = vmatpush.msra.mxu3 %v8966_v10  ;;  %4527 = vmatpush.msra.mxu0 %v8966_v10  ;;  %v2349_v30 = vadd.f32 %v8763_v1, %v2312_v52  ;;  %v3676_v44 = vadd.f32 %v3675_v47, %v3607_v53  ;;  %v9853_v52 = vld [vmem:[#allocation34_spill] sm:$0xff] }
 0x2cd   : > { %4604 = vmatpush.msra.mxu1 %v4603_v0  ;;  %9852 = vst [vmem:[#allocation31_spill] sm:$0xff] %v8980_v29  ;;  %4681 = vmatpush.msra.mxu2 %v8964_v13  ;;  %v4620_v36 = vsub.f32 %v8964_v13, %v9564_v42  ;;  %v9565_v18 = vand.u32 4294901760, %v8978_v19  ;;  %v8994_v0 = vsub.f32 %v4460_v31, %v8980_v29  ;;  %v4491_v42 = vld [vmem:[#allocation8 + $0xf8] sm:$0xff]  ;;  %v3712_v31 = vpop.f32.mrf.mxu3 }
 0x2ce   : > { %v4615_v5 = vand.u32 4294901760, %v4614_v14  ;;  %4725 = vmatpush.msra.mxu3 %v8980_v29  ;;  %4529 = vmatpush.msra.mxu0 %v8980_v29  ;;  %v9006_v1 = vand.u32 4294901760, %v4491_v42  ;;  %v5317_v14 = vmul.f32 -1.442695, %v9853_v52  ;;  %v2690_v53 = vadd.f32 %v8781_v20, %v2653_v34 }
 0x2cf   : > { %4610 = vmatpush.msra.mxu1 %v4609_v21  ;;  %4684 = vmatpush.msra.mxu2 %v8978_v19  ;;  %v4621_v12 = vand.u32 4294901760, %v4620_v36  ;;  %v4626_v49 = vsub.f32 %v8978_v19, %v9565_v18  ;;  %v9568_v15 = vand.u32 4294901760, %v8994_v0  ;;  %v4489_v36 = vld [vmem:[#allocation8 + $0xe8] sm:$0xff]  ;;  %v3753_v18 = vpop.f32.mrf.mxu0  ;;  %v5318_v52 = vmul.f32 -1.442695, %v2349_v30 }
 0x2d0   : > { %4736 = vmatpush.msrb.mxu0 %v4541_v25  ;;  %v9019_v50 = vand.u32 4294901760, %v4489_v36  ;;  %v3713_v20 = vadd.f32 %v3712_v31, %v3676_v44  ;;  %v9854_v29 = vand.u32 4294901760, %v8802_v3  ;;  %5368 = vpow2.f32 %v5317_v14  ;;  %v4485_v30 = vld [vmem:[#allocation8 + $0xc8] sm:$0xff] }
 0x2d1   : > { %4616 = vmatpush.msra.mxu1 %v4615_v5  ;;  %4687 = vmatpush.msra.mxu2 %v8994_v0  ;;  %v4627_v47 = vand.u32 4294901760, %v4626_v49  ;;  %v4632_v21 = vsub.f32 %v8994_v0, %v9568_v15  ;;  %v9017_v5 = vsub.f32 %v4491_v42, %v9006_v1  ;;  %v4487_v49 = vld [vmem:[#allocation8 + $0xd8] sm:$0xff]  ;;  %v3854_v15 = vpop.f32.mrf.mxu1  ;;  %v2731_v42 = vadd.f32 %v8775_v35, %v2690_v53 }
 0x2d2   : > { %4740 = vmatpush.msrb.mxu0 %v9854_v29  ;;  %v9025_v25 = vand.u32 4294901760, %v4487_v49  ;;  %v3754_v44 = vadd.f32 %v3753_v18, %v3713_v20  ;;  %v9855_v31 = vand.u32 4294901760, %v8816_v55  ;;  %5370 = vpow2.f32 %v5318_v52  ;;  %v4483_v55 = vld [vmem:[#allocation8 + $0xb8] sm:$0xff]  ;;  %v3908_v53 = vpop.f32.mrf.mxu2 }
 0x2d3   : > { %4622 = vmatpush.msra.mxu1 %v4621_v12  ;;  %4840 = vmatpush.msrb.mxu2 %v9006_v1  ;;  %v4633_v34 = vand.u32 4294901760, %v4632_v21  ;;  %v4882_v16 = vand.u32 4294901760, %v9017_v5  ;;  %v9028_v12 = vsub.f32 %v4489_v36, %v9019_v50  ;;  %v9856_v18 = vand.u32 4294901760, %v8836_v51  ;;  %v4481_v51 = vld [vmem:[#allocation8 + $0xa8] sm:$0xff] }
 0x2d4   : > { %4744 = vmatpush.msrb.mxu0 %v9855_v31  ;;  %v9041_v14 = vsub.f32 %v4487_v49, %v9025_v25  ;;  %v3855_v35 = vadd.f32 %v3854_v15, %v3754_v44  ;;  %v2832_v15 = vadd.f32 %v8779_v37, %v2731_v42  ;;  %v9857_v52 = vand.u32 4294901760, %v8841_v24 }
 0x2d5   : > { %4628 = vmatpush.msra.mxu1 %v4627_v47  ;;  %4842 = vmatpush.msrb.mxu2 %v9019_v50  ;;  %v4883_v3 = vsub.f32 %v9017_v5, %v4882_v16  ;;  %v4888_v29 = vand.u32 4294901760, %v9028_v12  ;;  %v9038_v47 = vand.u32 4294901760, %v4485_v30  ;;  %v9064_v31 = vand.u32 4294901760, %v4481_v51 }
 0x2d6   : > { %4748 = vmatpush.msrb.mxu0 %v9856_v18  ;;  %v9571_v20 = vand.u32 4294901760, %v9041_v14  ;;  %v2886_v42 = vadd.f32 %v8785_v8, %v2832_v15  ;;  %v9858_v18 = vand.u32 4294901760, %v8844_v38  ;;  %v9859_v15 = vand.u32 4294901760, %v8847_v46 }
 0x2d7   : > { %4634 = vmatpush.msra.mxu1 %v4633_v34  ;;  %4844 = vmatpush.msrb.mxu2 %v9025_v25  ;;  %v4884_v21 = vand.u32 4294901760, %v4883_v3  ;;  %v4889_v36 = vsub.f32 %v9028_v12, %v4888_v29  ;;  %v9051_v34 = vand.u32 4294901760, %v4483_v55  ;;  %v4479_v3 = vld [vmem:[#allocation8 + $0x98] sm:$0xff]  ;;  %v9079_v8 = vsub.f32 %v4481_v51, %v9064_v31 }
 0x2d8   : > { %4752 = vmatpush.msrb.mxu0 %v9857_v52  ;;  %v4895_v44 = vsub.f32 %v9041_v14, %v9571_v20  ;;  %v9076_v52 = vand.u32 4294901760, %v4479_v3 }
 0x2d9   : > { %4803 = vmatpush.msrb.mxu1 %v8787_v22  ;;  %4846 = vmatpush.msrb.mxu2 %v9038_v47  ;;  %v9056_v22 = vsub.f32 %v4485_v30, %v9038_v47  ;;  %v4890_v49 = vand.u32 4294901760, %v4889_v36  ;;  %v9067_v37 = vsub.f32 %v4483_v55, %v9051_v34  ;;  %v3909_v30 = vadd.f32 %v3908_v53, %v3855_v35  ;;  %v4477_v53 = vld [vmem:[#allocation8 + $0x88] sm:$0xff] }
 0x2da   : > { %4885 = vmatpush.msrb.mxu3 %v4884_v21  ;;  %4756 = vmatpush.msrb.mxu0 %v9858_v18  ;;  %v3947_v21 = vpop.f32.mrf.mxu3  ;;  %v4896_v36 = vand.u32 4294901760, %v4895_v44  ;;  %v9093_v44 = vand.u32 4294901760, %v4477_v53 }
 0x2db   : > { %4805 = vmatpush.msrb.mxu1 %v8794_v57  ;;  %4848 = vmatpush.msrb.mxu2 %v9051_v34  ;;  %v5369_v57 = vpop.eup %5368  ;;  %v9570_v24 = vand.u32 4294901760, %v9056_v22  ;;  %v9569_v55 = vand.u32 4294901760, %v9067_v37  ;;  %v3948_v18 = vadd.f32 %v3947_v21, %v3909_v30 }
 0x2dc   : > { %4891 = vmatpush.msrb.mxu3 %v4890_v49  ;;  %v5371_v35 = vpop.eup %5370  ;;  %4760 = vmatpush.msrb.mxu0 %v9859_v15  ;;  %v4016_v49 = vpop.f32.mrf.mxu0  ;;  %v9860_v15 = vand.u32 4294901760, %v8867_v61  ;;  %v9115_v61 = vsub.f32 %v4477_v53, %v9093_v44 }
 0x2dd   : > { %4807 = vmatpush.msrb.mxu1 %v8805_v45  ;;  %4850 = vmatpush.msrb.mxu2 %v9064_v31  ;;  %v2925_v45 = vadd.f32 %v8798_v41, %v2886_v42  ;;  %v4901_v38 = vsub.f32 %v9056_v22, %v9570_v24  ;;  %v4907_v51 = vsub.f32 %v9067_v37, %v9569_v55  ;;  %v9572_v41 = vand.u32 4294901760, %v9079_v8 }
 0x2de   : > { %4897 = vmatpush.msrb.mxu3 %v4896_v36  ;;  %v9098_v42 = vadd.f32 1.0, %v5369_v57  ;;  %v4475_v36 = vld [vmem:[#allocation8 + $0x78] sm:$0xff]  ;;  %4764 = vmatpush.msrb.mxu0 %v9860_v15  ;;  %v9110_v30 = vadd.f32 1.0, %v5371_v35  ;;  %v4017_v21 = vadd.f32 %v4016_v49, %v3948_v18 }
 0x2df   : > { %4809 = vmatpush.msrb.mxu1 %v8819_v26  ;;  %4852 = vmatpush.msrb.mxu2 %v9076_v52  ;;  %v9096_v26 = vsub.f32 %v4479_v3, %v9076_v52  ;;  %v4902_v46 = vand.u32 4294901760, %v4901_v38  ;;  %v4908_v24 = vand.u32 4294901760, %v4907_v51  ;;  %v4913_v20 = vsub.f32 %v9079_v8, %v9572_v41  ;;  %v4473_v38 = vld [vmem:[#allocation8 + $0x68] sm:$0xff] }
 0x2e0   : > { %v9108_v57 = vand.u32 4294901760, %v4475_v36  ;;  %v9121_v41 = vand.u32 4294901760, %v4473_v38  ;;  %5372 = vrcp.f32 %v9098_v42  ;;  %vm4406_vm4 = vweird.f32 %v9098_v42 }
 0x2e1   : > { %4811 = vmatpush.msrb.mxu1 %v8824_v43  ;;  %4854 = vmatpush.msrb.mxu2 %v9093_v44  ;;  %v4918_v3 = vand.u32 4294901760, %v9096_v26  ;;  %v2994_v43 = vadd.f32 %v8783_v28, %v2925_v45  ;;  %v4914_v51 = vand.u32 4294901760, %v4913_v20  ;;  %v9861_v28 = vand.u32 4294901760, %v8904_v59  ;;  %v4471_v45 = vld [vmem:[#allocation8 + $0x58] sm:$0xff] }
 0x2e2   : > { %4903 = vmatpush.msrb.mxu3 %v4902_v46  ;;  %v9124_v35 = vsub.f32 %v4475_v36, %v9108_v57  ;;  %v9574_v20 = vand.u32 4294901760, %v9115_v61  ;;  %v9133_v46 = vand.u32 4294901760, %v4471_v45  ;;  %v9136_v59 = vsub.f32 %v4473_v38, %v9121_v41 }
 0x2e3   : > { %4813 = vmatpush.msrb.mxu1 %v8826_v2  ;;  %v4919_v15 = vsub.f32 %v9096_v26, %v4918_v3  ;;  %4856 = vmatpush.msrb.mxu2 %v9108_v57  ;;  %v9862_v36 = vand.u32 4294901760, %v8916_v32  ;;  %5374 = vrcp.f32 %v9110_v30  ;;  %vm4425_vm5 = vweird.f32 %v9110_v30 }
 0x2e4   : > { %v4053_v55 = vpop.f32.mrf.mxu1  ;;  %4768 = vmatpush.msrb.mxu0 %v9861_v28  ;;  %4909 = vmatpush.msrb.mxu3 %v4908_v24  ;;  %v9573_v18 = vand.u32 4294901760, %v9124_v35  ;;  %v4925_v24 = vsub.f32 %v9115_v61, %v9574_v20  ;;  %v9578_v32 = vand.u32 4294901760, %v9136_v59  ;;  %v4467_v28 = vld [vmem:[#allocation8 + $0x38] sm:$0xff] }
 0x2e5   : > { %v4054_v2 = vadd.f32 %v4053_v55, %v4017_v21  ;;  %4815 = vmatpush.msrb.mxu1 %v8829_v56  ;;  %v4094_v53 = vpop.f32.mrf.mxu2  ;;  %v4920_v49 = vand.u32 4294901760, %v4919_v15  ;;  %4858 = vmatpush.msrb.mxu2 %v9121_v41  ;;  %v3031_v56 = vadd.f32 %v8789_v7, %v2994_v43  ;;  %v4469_v55 = vld [vmem:[#allocation8 + $0x48] sm:$0xff]  ;;  %v9154_v7 = vsub.f32 %v4471_v45, %v9133_v46 }
 0x2e6   : > { %4772 = vmatpush.msrb.mxu0 %v9862_v36  ;;  %4915 = vmatpush.msrb.mxu3 %v4914_v51  ;;  %v4931_v21 = vsub.f32 %v9124_v35, %v9573_v18  ;;  %v9151_v38 = vand.u32 4294901760, %v4469_v55  ;;  %v4926_v15 = vand.u32 4294901760, %v4925_v24  ;;  %v4937_v20 = vsub.f32 %v9136_v59, %v9578_v32 }
 0x2e7   : > { %4817 = vmatpush.msrb.mxu1 %v8850_v11  ;;  %4860 = vmatpush.msrb.mxu2 %v9133_v46  ;;  %v9863_v11 = vand.u32 4294901760, %v8929_v39  ;;  %v3072_v43 = vadd.f32 %v8822_v40, %v3031_v56  ;;  %v4095_v51 = vadd.f32 %v4094_v53, %v4054_v2  ;;  %v9575_v45 = vand.u32 4294901760, %v9154_v7  ;;  %v9169_v2 = vpop.eup %5372 }
 0x2e8   : > { %4921 = vmatpush.msrb.mxu3 %v4920_v49  ;;  %v4195_v36 = vpop.f32.mrf.mxu3  ;;  %v4932_v18 = vand.u32 4294901760, %v4931_v21  ;;  %v9165_v39 = vand.u32 4294901760, %v4467_v28  ;;  %v9864_v40 = vand.u32 4294901760, %v8945_v17  ;;  %v9174_v53 = vsub.f32 %v4469_v55, %v9151_v38  ;;  %v4465_v49 = vld [vmem:[#allocation8 + $0x28] sm:$0xff] }
 0x2e9   : > { %4776 = vmatpush.msrb.mxu0 %v9863_v11  ;;  %4819 = vmatpush.msrb.mxu1 %v8898_v54  ;;  %v3173_v54 = vadd.f32 %v8860_v9, %v3072_v43  ;;  %v4938_v24 = vand.u32 4294901760, %v4937_v20  ;;  %v4943_v21 = vsub.f32 %v9154_v7, %v9575_v45  ;;  %v9180_v17 = vand.u32 4294901760, %v4465_v49  ;;  %v4463_v43 = vld [vmem:[#allocation8 + $0x18] sm:$0xff] }
 0x2ea   : > { %4862 = vmatpush.msrb.mxu2 %v9151_v38  ;;  %4927 = vmatpush.msrb.mxu3 %v4926_v15  ;;  %v9183_v11 = vsub.f32 %v4467_v28, %v9165_v39  ;;  %v9865_v9 = vand.u32 4294901760, %v8958_v27  ;;  %v4196_v55 = vadd.f32 %v4195_v36, %v4095_v51  ;;  %v9577_v20 = vand.u32 4294901760, %v9174_v53 }
 0x2eb   : > { %4780 = vmatpush.msrb.mxu0 %v9864_v40  ;;  %4821 = vmatpush.msrb.mxu1 %v8907_v48  ;;  %v9187_v48 = vpop.eup %5374  ;;  %v4944_v15 = vand.u32 4294901760, %v4943_v21  ;;  %v9193_v45 = vand.u32 4294901760, %v4463_v43  ;;  %v9196_v28 = vsub.f32 %v4465_v49, %v9180_v17  ;;  %v9866_v27 = vand.u32 4294901760, %v8964_v13 }
 0x2ec   : > { %4864 = vmatpush.msrb.mxu2 %v9165_v39  ;;  %4933 = vmatpush.msrb.mxu3 %v4932_v18  ;;  %v9576_v40 = vand.u32 4294901760, %v9183_v11  ;;  %v3227_v51 = vadd.f32 %v8809_v6, %v3173_v54  ;;  %v4949_v18 = vsub.f32 %v9174_v53, %v9577_v20  ;;  %v4402_v36 = vmul.f32 %v9169_v2, %v9098_v42 }
 0x2ed   : > { %4784 = vmatpush.msrb.mxu0 %v9865_v9  ;;  %4823 = vmatpush.msrb.mxu1 %v8919_v4  ;;  %v4421_v49 = vmul.f32 %v9187_v48, %v9110_v30  ;;  %v4960_v6 = vand.u32 4294901760, %v9196_v28  ;;  %v9867_v54 = vand.u32 4294901760, %v8978_v19  ;;  %v9868_v32 = vand.u32 4294901760, %v8994_v0 }
 0x2ee   : > { %4866 = vmatpush.msrb.mxu2 %v9180_v17  ;;  %4939 = vmatpush.msrb.mxu3 %v4938_v24  ;;  %v4955_v13 = vsub.f32 %v9183_v11, %v9576_v40  ;;  %v4950_v24 = vand.u32 4294901760, %v4949_v18  ;;  %v3266_v19 = vadd.f32 %v8853_v63, %v3227_v51  ;;  %vm4407_vm2 = vweird.f32 %v9169_v2 }
 0x2ef   : > { %4788 = vmatpush.msrb.mxu0 %v9866_v27  ;;  %4825 = vmatpush.msrb.mxu1 %v8932_v33  ;;  %v4461_v33 = vld [vmem:[#allocation8 + $0x8] sm:$0xff]  ;;  %v4961_v20 = vsub.f32 %v9196_v28, %v4960_v6  ;;  %v4422_v18 = vsub.f32 1.0, %v4421_v49  ;;  %v9869_v49 = vld [vmem:[#allocation31_spill] sm:$0xff]  ;;  %vm4426_vm3 = vweird.f32 %v9187_v48  ;;  %vm4408_vm6 = vmor %vm4406_vm4, %vm4407_vm2 }
 0x2f0   : > { %4868 = vmatpush.msrb.mxu2 %v9193_v45  ;;  %4945 = vmatpush.msrb.mxu3 %v4944_v15  ;;  %v9217_v9 = vand.u32 4294901760, %v4461_v33  ;;  %v4956_v40 = vand.u32 4294901760, %v4955_v13  ;;  %v4403_v15 = vsub.f32 1.0, %v4402_v36  ;;  %v3335_v0 = vadd.f32 %v8890_v58, %v3266_v19  ;;  %vm4427_vm7 = vmor %vm4425_vm5, %vm4426_vm3 }
 0x2f1   : > { %4792 = vmatpush.msrb.mxu0 %v9867_v54  ;;  %4827 = vmatpush.msrb.mxu1 %v8947_v23  ;;  %v4962_v13 = vand.u32 4294901760, %v4961_v20  ;;  %v4429_v19 = vand.u32 2147483647, %v9110_v30 }
 0x2f2   : > { %4951 = vmatpush.msrb.mxu3 %v4950_v24  ;;  %4870 = vmatpush.msrb.mxu2 %v9217_v9  ;;  %v3372_v51 = vadd.f32 %v8910_v62, %v3335_v0  ;;  %v4412_v24 = vand.u32 2147483648, %v9098_v42 }
 0x2f3   : > { %4796 = vmatpush.msrb.mxu0 %v9868_v32  ;;  %4829 = vmatpush.msrb.mxu1 %v8954_v60  ;;  %vm4430_vm9 = vcmp.eq.f32.partialorder %v4429_v19, 8.507059e+37 }
 0x2f4   : > { %4957 = vmatpush.msrb.mxu3 %v4956_v40  ;;  %v4404_v40 = vmul.f32 %v9169_v2, %v4403_v15 }
 0x2f5   : > { %4831 = vmatpush.msrb.mxu1 %v8966_v10  ;;  %v4423_v10 = vmul.f32 %v9187_v48, %v4422_v18 }
 0x2f6   : > { %4963 = vmatpush.msrb.mxu3 %v4962_v13  ;;  %v4405_v62 = vadd.f32 %v9169_v2, %v4404_v40 }
 0x2f7   : > { %4833 = vmatpush.msrb.mxu1 %v9869_v49  ;;  %v4424_v54 = vadd.f32 %v9187_v48, %v4423_v10  ;;  %v9870_v49 = vld [vmem:[#allocation21_spill] sm:$0xff] }
 0x2f8   : > { %v4409_v15 = vsel %vm4408_vm6, %v9169_v2, %v4405_v62 }
 0x2f9   : > { %v4428_v18 = vsel %vm4427_vm7, %v9187_v48, %v4424_v54 }
 0x2fc   : > { %v4249_v56 = vpop.f32.mrf.mxu0 }
 0x2fd   : > { %v4250_v4 = vadd.f32 %v4249_v56, %v4196_v55  ;;  %v9220_v55 = vsub.f32 %v4463_v43, %v9193_v45  ;;  %v9231_v43 = vsub.f32 %v4461_v33, %v9217_v9 }
 0x2ff   : > { %v4966_v23 = vand.u32 4294901760, %v9220_v55  ;;  %v4972_v60 = vand.u32 4294901760, %v9231_v43 }
 0x301   : > { %v4967_v63 = vsub.f32 %v9220_v55, %v4966_v23  ;;  %v4973_v58 = vsub.f32 %v9231_v43, %v4972_v60 }
 0x303   : > { %v4968_v20 = vand.u32 4294901760, %v4967_v63  ;;  %v4974_v33 = vand.u32 4294901760, %v4973_v58 }
 0x304   : > { %v4288_v21 = vpop.f32.mrf.mxu1 }
 0x305   : > { %v4289_v56 = vadd.f32 %v4288_v21, %v4250_v4  ;;  %4969 = vmatpush.msrb.mxu3 %v4968_v20 }
 0x306   : > { %v4357_v27 = vpop.f32.mrf.mxu2 }
 0x307   : > { %v4358_v4 = vadd.f32 %v4357_v27, %v4289_v56  ;;  %4975 = vmatpush.msrb.mxu3 %v4974_v33  ;;  %v4431_v56 = vand.u32 2147483648, %v9110_v30  ;;  %v4410_v27 = vand.u32 2147483647, %v9098_v42 }
 0x309   : > { %v4394_v21 = vpop.f32.mrf.mxu3  ;;  %v4432_v0 = vor.u32 1.1754944e-38, %v4431_v56  ;;  %vm4411_vm8 = vcmp.eq.f32.partialorder %v4410_v27, 8.507059e+37 }
 0x30a   : > { %v4395_v32 = vadd.f32 %v4394_v21, %v4358_v4 }
 0x30c   : > { %v5319_v36 = vmul.f32 -1.442695, %v4395_v32  ;;  %v4413_v32 = vor.u32 1.1754944e-38, %v4412_v24 }
 0x30e   : > { %5376 = vpow2.f32 %v5319_v36  ;;  %v4414_v63 = vsel %vm4411_vm8, %v4413_v32, %v4409_v15 }
 0x30f   : > { %5378 = vtanh.f32 %v3372_v51  ;;  %v4433_v51 = vsel %vm4430_vm9, %v4432_v0, %v4428_v18 }
 0x310   : > { %v4455_v42 = vmul.f32 %v9870_v49, %v4433_v51 }
 0x314   : > { %v5377_v4 = vpop.eup %5376 }
 0x315   : > { %v4439_v21 = vadd.f32 1.0, %v5377_v4  ;;  %v5379_v13 = vpop.eup %5378 }
 0x316   : > { %v4456_v36 = vmul.f32 %v5379_v13, %v4414_v63  ;;  %v9871_v13 = vand.u32 4294901760, %v9041_v14  ;;  %v9881_v63 = vld [vmem:[#allocation19_spill] sm:$0xff] }
 0x317   : > { %5380 = vrcp.f32 %v4439_v21  ;;  %v4451_v2 = vand.u32 2147483648, %v4439_v21  ;;  %v4449_v40 = vand.u32 2147483647, %v4439_v21  ;;  %vm4445_vm11 = vweird.f32 %v4439_v21 }
 0x318   : > { %v9260_v30 = vadd.f32 %v4456_v36, %v4455_v42   ;;  %v9882_v36 = vld [vmem:[#allocation20_spill] sm:$0xff] }
 0x319   : > { %v4452_v62 = vor.u32 1.1754944e-38, %v4451_v2  ;;  %vm4450_vm13 = vcmp.eq.f32.partialorder %v4449_v40, 8.507059e+37 }
 0x31a   : > { %5382 = vtanh.f32 %v9260_v30  ;;  %5222 = vst [vmem:[#allocation13] sm:$0xff] (%p90_p0), %v9260_v30 }
 0x31d   : > { %v5381_v20 = vpop.eup %5380 }
 0x31e   : > { %v4441_v58 = vmul.f32 %v5381_v20, %v4439_v21  ;;  %vm4446_vm10 = vweird.f32 %v5381_v20 }
 0x31f   : > { %vm4447_vm12 = vmor %vm4445_vm11, %vm4446_vm10 }
 0x320   : > { %v4442_v10 = vsub.f32 1.0, %v4441_v58  ;;  %v5383_v56 = vpop.eup %5382 }
 0x322   : > { %v4443_v48 = vmul.f32 %v5381_v20, %v4442_v10 }
 0x324   : > { %v4444_v33 = vadd.f32 %v5381_v20, %v4443_v48 }
 0x326   : > { %v4448_v54 = vsel %vm4447_vm12, %v5381_v20, %v4444_v33 }
 0x327   : > { %v4453_v24 = vsel %vm4450_vm13, %v4452_v62, %v4448_v54 }
 0x328   : > { %v9263_v27 = vmul.f32 %v5383_v56, %v4453_v24  }
 0x32a   : > { %v9266_v19 = vand.u32 4294901760, %v9263_v27  ;;  %5221 = vst [vmem:[#allocation11] sm:$0xff] (%p90_p0), %v9263_v27 }
 0x32b   :  { %5246 = dma.vmem_to_hbm [thread:$0]  (%p90_p0), %s5242_s30, 128, %s5244_s28, [#allocation12]  }
 0x32c   : > { %4636 = vmatmul.f32.vlgmr.msra.gmra.mxu1 %v9266_v19  ;;  %v9271_v4 = vsub.f32 %v9263_v27, %v9266_v19  ;;  %5257 = dma.vmem_to_hbm [thread:$0]  (%p90_p0), %s5253_s15, 128, %s5255_s13, [#allocation12]  }
 0x32d   : > { %5036 = vmatpush.msra.mxu1 %v9006_v1 }
 0x32e   : > { %4690 = vmatmul.f32.vlgmr.msra.gmra.mxu2 %v9271_v4  ;;  %v9276_v15 = vand.u32 4294901760, %v9271_v4 }
 0x32f   : > { %5038 = vmatpush.msra.mxu1 %v9019_v50  ;;  %5077 = vmatpush.msra.mxu2 %v4882_v16  ;;  %v9872_v16 = vand.u32 4294901760, %v9056_v22 }
 0x330   : > { %4729 = vmatmul.f32.vlgmr.msra.gmra.mxu3 %v9276_v15  ;;  %v4533_v18 = vsub.f32 %v9271_v4, %v9276_v15 }
 0x331   : > { %5040 = vmatpush.msra.mxu1 %v9025_v25  ;;  %5081 = vmatpush.msra.mxu2 %v4888_v29  ;;  %v9878_v29 = vand.u32 4294901760, %v9154_v7 }
 0x332   : > { %5144 = vmatpush.msra.mxu3 %v9006_v1  ;;  %v4534_v21 = vand.u32 4294901760, %v4533_v18  ;;  %v9873_v1 = vand.u32 4294901760, %v9067_v37 }
 0x333   : > { %5042 = vmatpush.msra.mxu1 %v9038_v47  ;;  %5085 = vmatpush.msra.mxu2 %v9871_v13 }
 0x334   : > { %5146 = vmatpush.msra.mxu3 %v9019_v50  ;;  %4535 = vmatmul.f32.vlgmr.msra.gmra.mxu0 %v4534_v21  ;;  %v9874_v50 = vand.u32 4294901760, %v9079_v8 }
 0x335   : > { %4835 = vmatmul.f32.vlgmr.msrb.gmra.mxu1 %v9266_v19  ;;  %4983 = vmatpush.msra.mxu0 %v9017_v5  ;;  %v9875_v5 = vand.u32 4294901760, %v9115_v61 }
 0x336   : > { %5044 = vmatpush.msra.mxu1 %v9051_v34  ;;  %5089 = vmatpush.msra.mxu2 %v9872_v16 }
 0x337   : > { %5148 = vmatpush.msra.mxu3 %v9025_v25  ;;  %4876 = vmatmul.f32.vlgmr.msrb.gmra.mxu2 %v4534_v21  ;;  %v9876_v25 = vand.u32 4294901760, %v9124_v35 }
 0x338   : > { %4986 = vmatpush.msra.mxu0 %v9028_v12  ;;  %5046 = vmatpush.msra.mxu1 %v9064_v31  ;;  %v9877_v12 = vand.u32 4294901760, %v9136_v59 }
 0x339   : > { %5093 = vmatpush.msra.mxu2 %v9873_v1  ;;  %5150 = vmatpush.msra.mxu3 %v9038_v47  ;;  %v9879_v47 = vand.u32 4294901760, %v9174_v53 }
 0x33a   : > { %4977 = vmatmul.f32.vlgmr.msrb.gmra.mxu3 %v9266_v19  ;;  %4989 = vmatpush.msra.mxu0 %v9041_v14  ;;  %v9880_v14 = vand.u32 4294901760, %v9183_v11 }
 0x33b   : > { %5048 = vmatpush.msra.mxu1 %v9076_v52  ;;  %5097 = vmatpush.msra.mxu2 %v9874_v50 }
 0x33c   : > { %5152 = vmatpush.msra.mxu3 %v9051_v34  ;;  %4992 = vmatpush.msra.mxu0 %v9056_v22  ;;  %v4492_v34 = vld [vmem:[%s9402_s4] sm:$0x3] }
 0x33d   : > { %5050 = vmatpush.msra.mxu1 %v9093_v44  ;;  %5101 = vmatpush.msra.mxu2 %v4918_v3 }
 0x33e   : > { %5154 = vmatpush.msra.mxu3 %v9064_v31  ;;  %4798 = vmatmul.f32.vlgmr.msrb.gmra.mxu0 %v9266_v19 }
 0x33f   : > { %4995 = vmatpush.msra.mxu0 %v9067_v37  ;;  %5052 = vmatpush.msra.mxu1 %v9108_v57  ;;  %v4494_v37 = vperm.slane %v4492_v34, 0 }
 0x340   : > { %5105 = vmatpush.msra.mxu2 %v9875_v5  ;;  %5156 = vmatpush.msra.mxu3 %v9076_v52  ;;  %v9883_v5 = vmov %v9260_v30 }
 0x341   : > { %4998 = vmatpush.msra.mxu0 %v9079_v8  ;;  %5054 = vmatpush.msra.mxu1 %v9121_v41 }
 0x342   : > { %5109 = vmatpush.msra.mxu2 %v9876_v25  ;;  %5158 = vmatpush.msra.mxu3 %v9093_v44 }
 0x343   : > { %5001 = vmatpush.msra.mxu0 %v9096_v26  ;;  %5056 = vmatpush.msra.mxu1 %v9133_v46  ;;  %v4495_v26 = vperm.slane %v4492_v34, 1 }
 0x344   : > { %5113 = vmatpush.msra.mxu2 %v9877_v12  ;;  %5160 = vmatpush.msra.mxu3 %v9108_v57 }
 0x345   : > { %5004 = vmatpush.msra.mxu0 %v9115_v61  ;;  %5058 = vmatpush.msra.mxu1 %v9151_v38 }
 0x346   : > { %5117 = vmatpush.msra.mxu2 %v9878_v29  ;;  %5162 = vmatpush.msra.mxu3 %v9121_v41 }
 0x347   : > { %5007 = vmatpush.msra.mxu0 %v9124_v35  ;;  %5060 = vmatpush.msra.mxu1 %v9165_v39 }
 0x348   : > { %5121 = vmatpush.msra.mxu2 %v9879_v47  ;;  %5164 = vmatpush.msra.mxu3 %v9133_v46 }
 0x349   : > { %5010 = vmatpush.msra.mxu0 %v9136_v59  ;;  %5062 = vmatpush.msra.mxu1 %v9180_v17 }
 0x34a   : > { %5125 = vmatpush.msra.mxu2 %v9880_v14  ;;  %5166 = vmatpush.msra.mxu3 %v9151_v38 }
 0x34b   : > { %5013 = vmatpush.msra.mxu0 %v9154_v7  ;;  %5064 = vmatpush.msra.mxu1 %v9193_v45 }
 0x34c   : > { %5129 = vmatpush.msra.mxu2 %v4960_v6  ;;  %5168 = vmatpush.msra.mxu3 %v9165_v39 }
 0x34d   : > { %5016 = vmatpush.msra.mxu0 %v9174_v53  ;;  %5066 = vmatpush.msra.mxu1 %v9217_v9 }
 0x34e   : > { %5133 = vmatpush.msra.mxu2 %v4966_v23  ;;  %5170 = vmatpush.msra.mxu3 %v9180_v17 }
 0x34f   : > { %5070 = vmatmul.f32.vlgmr.msra.gmra.mxu1 %v9276_v15  ;;  %5019 = vmatpush.msra.mxu0 %v9183_v11 }
 0x350   : > { %5137 = vmatpush.msra.mxu2 %v4972_v60  ;;  %5172 = vmatpush.msra.mxu3 %v9193_v45 }
 0x351   : > { %5139 = vmatmul.f32.vlgmr.msra.gmra.mxu2 %v9266_v19  ;;  %5022 = vmatpush.msra.mxu0 %v9196_v28 }
 0x352   : > { %5174 = vmatpush.msra.mxu3 %v9217_v9 }
 0x353   : > { %5176 = vmatmul.f32.vlgmr.msra.gmra.mxu3 %v9266_v19  ;;  %5025 = vmatpush.msra.mxu0 %v9220_v55 }
 0x355   : > { %5028 = vmatpush.msra.mxu0 %v9231_v43 }
 0x356   : > { %5031 = vmatmul.f32.vlgmr.msra.gmra.mxu0 %v9271_v4 }
 0x3a9   : > { %v4637_v52 = vpop.f32.mrf.mxu1 }
 0x3b1   : > { %v4536_v22 = vpop.f32.mrf.mxu0  ;;  %v4691_v31 = vpop.f32.mrf.mxu2 }
 0x3b2   : > { %v4537_v41 = vadd.f32 %v4536_v22, %v4494_v37  ;;  %v4836_v61 = vpop.f32.mrf.mxu1 }
 0x3b3   : > { %v4730_v8 = vpop.f32.mrf.mxu3 }
 0x3b4   : > { %v4638_v44 = vadd.f32 %v4637_v52, %v4537_v41 }
 0x3b6   : > { %v4692_v35 = vadd.f32 %v4691_v31, %v4638_v44 }
 0x3b8   : > { %v4731_v38 = vadd.f32 %v4730_v8, %v4692_v35 }
 0x3ba   : > { %v4877_v57 = vpop.f32.mrf.mxu2 }
 0x3bb   : > { %v4799_v3 = vpop.f32.mrf.mxu0  ;;  %v4878_v46 = vadd.f32 %v4877_v57, %v4495_v26 }
 0x3bc   : > { %v4800_v17 = vadd.f32 %v4799_v3, %v4731_v38  ;;  %v9884_v3 = vmov %v9263_v27 }
 0x3bd   : > { %v4978_v59 = vpop.f32.mrf.mxu3 }
 0x3be   : > { %v4979_v7 = vadd.f32 %v4978_v59, %v4878_v46  ;;  %v4837_v55 = vadd.f32 %v4836_v61, %v4800_v17 }
 0x3cc   : > { %v5071_v53 = vpop.f32.mrf.mxu1 }
 0x3d3   : > { %v5032_v45 = vpop.f32.mrf.mxu0 }
 0x3d4   : > { %v5033_v39 = vadd.f32 %v5032_v45, %v4979_v7  ;;  %v5140_v28 = vpop.f32.mrf.mxu2 }
 0x3d6   : > { %v5072_v11 = vadd.f32 %v5071_v53, %v5033_v39  ;;  %v5177_v9 = vpop.f32.mrf.mxu3 }
 0x3d8   : > { %v5141_v6 = vadd.f32 %v5140_v28, %v5072_v11 }
 0x3da   : > { %v5178_v23 = vadd.f32 %v5177_v9, %v5141_v6 }
 0x3dc   : > { %v5180_v43 = vmax.f32 %v4837_v55, %v5178_v23 }
 0x3de   : > { %5181 = vmax.xlane.f32.xlu0 %v5180_v43 }
 0x451   : > { %v5182_v60 = vpop.xlane.xlu0 %5181 }
 0x452   : > { %v5183_v0 = vsub.f32 %v4837_v55, %v5182_v60  ;;  %v5184_v32 = vsub.f32 %v5178_v23, %v5182_v60  ;;  %vm5201_vm14 = vcmp.eq.f32.partialorder %v4837_v55, %v5182_v60  ;;  %vm5202_vm15 = vcmp.eq.f32.partialorder %v5178_v23, %v5182_v60 }
 0x453   : > { %v5203_v51 = vsel %vm5201_vm14, %v9881_v63, 256  ;;  %v5204_v49 = vsel %vm5202_vm15, %v9882_v36, 256 }
 0x454   : > { %vm5205_vm0 = vcmp.lt.s32.totalorder %v5203_v51, %v5204_v49  ;;  %v5185_v42 = vmul.f32 1.442695, %v5183_v0  ;;  %v5187_v20 = vmul.f32 1.442695, %v5184_v32 }
 0x455   : > { %v5206_v58 = vsel %vm5205_vm0, %v5203_v51, %v5204_v49 }
 0x456   : > { %v5208_v10 = vshra.s32 %v5206_v58, 16  ;;  %5384 = vpow2.f32 %v5185_v42  ;;  %v5207_v62 = vand.u32 65535, %v5206_v58 }
 0x457   : > { %5386 = vpow2.f32 %v5187_v20 }
 0x458   : > { %v5210_v2 = vcvt.s32.f32 %v5208_v10  ;;  %v5209_v56 = vcvt.s32.f32 %v5207_v62 }
 0x45a   : > { %5211 = vmin.xlane.f32.xlu0 %v5210_v2 }
 0x45c   : > { %v5385_v48 = vpop.eup %5384 }
 0x45d   : > { %v5387_v40 = vpop.eup %5386 }
 0x45e   : > { %v5189_v33 = vadd.f32 %v5387_v40, %v5385_v48 }
 0x460   : > { %5190 = vadd.xlane.f32.xlu1 %v5189_v33 }
 0x4cd   : > { %v5212_v54 = vpop.xlane.xlu0 %5211 }
 0x4ce   : > { %vm5213_vm1 = vcmp.eq.f32.partialorder %v5210_v2, %v5212_v54  ;;  %v5218_v13 = vcvt.f32.s32 %v5212_v54 }
 0x4cf   : > { %v5214_v24 = vsel %vm5213_vm1, %v5209_v56, inf }
 0x4d0   : > { %5215 = vmin.xlane.f32.xlu1 %v5214_v24  ;;  %v5219_v1 = vshll.u32 %v5218_v13, 16 }
 0x4d3   : > { %v5191_v19 = vpop.xlane.xlu1 %5190 }
 0x4d4   : > { %5388 = vlog2.f32 %v5191_v19 }
 0x4da   : > { %v5389_v4 = vpop.eup %5388 }
 0x4db   : > { %v5193_v15 = vmul.f32 0.6931472, %v5389_v4 }
 0x4dd   : > { %v5194_v18 = vsub.f32 %v5183_v0, %v5193_v15  ;;  %v5195_v21 = vsub.f32 %v5184_v32, %v5193_v15 }
 0x4df   : > { %5199 = vst [vmem:[%s5198_s25] sm:$0xff] %v5194_v18 }
 0x4e0   : > { %5200 = vst [vmem:[%s5198_s25 + $0x8] sm:$0xff] %v5195_v21 }
 0x4e1   :  { %5235 = dma.vmem_to_hbm [thread:$0]  (%p90_p0), %s5228_s9, 1536, %s5230_s12, [#allocation4], %s5607_s21, %s5607_s21, %s5608_s22  }
 0x542   :  { %92 = sbr.rel (!%p90_p0) target bundleno = 28 (0x1c), region = 80 }
 0x543   : > { %v5216_v16 = vpop.xlane.xlu1 %5215 }
 0x544   : > { %v5217_v50 = vcvt.f32.s32 %v5216_v16 }
 0x546   : > { %v5220_v4 = vadd.s32 %v5219_v1, %v5217_v50  }
 0x547   :  { %5581 = dma.done.wait [#allocation4], 1536  }
 0x548   :  { %5582 = vsyncadd [#allocation4], 4294965760 }
 0x549   :  { %5583 = dma.done.wait [#allocation12], 256  }
 0x54a   :  { %5584 = vsyncadd [#allocation12], 4294967040 }
 0x54b   :  { %5270 = vsyncpa [#allocation3], 1 }
 0x54c   :  { %5271 = vsyncpa [#allocation6], 1 }
 0x54d   :  { %5272 = vsyncpa [#allocation9], 1 }
 0x54e   :  { %5273 = vsyncpa [#allocation4], 1 }
 0x54f   :  { %5274 = vsyncpa [#allocation12], 1 }

</bundles_post_ra>
